<compile_context>
chip_gen: v5e
topology: v5e:2x2
jax: 0.10.0
libtpu: 0.0.40
codegen_flags: <defaults>
</compile_context>

<pallas_src>
import functools

import jax
import jax.numpy as jnp
from jax import lax
from jax.experimental import pallas as pl
from jax.experimental.pallas import tpu as pltpu


F_PAD = 128     # conv output channels padded to full lane width (zero-padded)
NC_PAD = 128    # logits padded to full lane width (zero-padded)
OUT_ROWS = 8    # sublane-aligned output rows per image (row 0 holds the logits)


# ------------------------------ fused kernel --------------------------------

def _fused_kernel(x_ref, w_ref, b_ref, mask_ref, fcw_ref, fcb_ref, o_ref,
                  acc_ref, *, h, wp, c):
    """Conv as 9 shifted matmuls + bias + ReLU + masked avg-pool + FC.

    x_ref   : [ROWS_PAD, C]       bf16 row-flattened zero-padded image
    w_ref   : [9*C, F_PAD]        bf16 conv weight (k = dy*3+dx blocks of C rows)
    b_ref   : [1, F_PAD]          f32 conv bias
    mask_ref: [h*wp, 1]           f32 (1/(H*W) on valid cols, 0 on 2 pad cols)
    fcw_ref : [F_PAD, NC_PAD]     bf16 FC weight
    fcb_ref : [1, NC_PAD]         f32 FC bias
    o_ref   : [OUT_ROWS, NC_PAD]  f32 logits (broadcast over rows)
    acc_ref : [h*wp, F_PAD]       f32 VMEM conv accumulator (over-wide output)
    """
    rows = h * wp  # over-wide output rows: W+2 columns per image row

    acc_ref[...] = jnp.zeros_like(acc_ref)

    # Conv3x3 (stride 1, pad 1) as 9 shifted bf16 matmuls with f32 accumulate.
    # For output position p = i*wp + j, input row index is p + dy*wp + dx, so
    # each (dy, dx) tap is a contiguous row-slice of the flattened input.
    for k in range(9):
        dy, dx = k // 3, k % 3
        off = dy * wp + dx
        patch = x_ref[off:off + rows, :]                 # [rows, C]   bf16
        wk = w_ref[k * c:(k + 1) * c, :]                 # [C, F_PAD]  bf16
        acc_ref[...] += jnp.dot(patch, wk, preferred_element_type=jnp.float32)

    # Bias + ReLU in f32, then masked global average pool (mask already holds
    # 1/(H*W) on valid columns and 0 on the 2 over-wide padding columns).
    feat = jnp.maximum(acc_ref[...] + b_ref[...], 0.0)             # [rows, F_PAD]
    pooled = jnp.sum(feat * mask_ref[...], axis=0, keepdims=True)  # [1, F_PAD]

    # FC epilogue: bf16 x bf16 -> f32 on the MXU, f32 bias add.
    logits = jnp.dot(pooled.astype(jnp.bfloat16), fcw_ref[...],
                     preferred_element_type=jnp.float32) + fcb_ref[...]
    o_ref[...] = jnp.broadcast_to(logits, o_ref.shape)


# ------------------------------- glue (JAX) ---------------------------------

def make_params(in_ch, feat, num_class, key):
    k1, k2, k3, k4 = jax.random.split(key, 4)
    conv_w = jax.random.normal(k1, (feat, in_ch, 3, 3), jnp.float32) * 0.1
    conv_b = jax.random.normal(k2, (feat,), jnp.float32) * 0.01
    fc_w = jax.random.normal(k3, (num_class, feat), jnp.float32) * 0.1
    fc_b = jax.random.normal(k4, (num_class,), jnp.float32) * 0.01
    return conv_w, conv_b, fc_w, fc_b


def model_forward(x_nchw, params):
    """Forward pass: Conv3x3(pad=1) -> ReLU -> GlobalAvgPool -> Linear."""
    conv_w, conv_b, fc_w, fc_b = params
    n, c, h, w = x_nchw.shape
    feat = conv_w.shape[0]
    num_class = fc_w.shape[0]
    assert feat <= F_PAD and num_class <= NC_PAD
    # TODO(synk): multi-tile F/NC and row-tiling for realistic backbone shapes.

    wp = w + 2                     # over-wide output width (W valid + 2 pad cols)
    rows = h * wp                  # conv accumulator rows per image
    flat_rows = (h + 2) * wp       # rows of the flattened zero-padded image
    # +2 halo so the (dy=2,dx=2) tap stays in-bounds; align to 16 (bf16 sublane).
    rows_pad = ((flat_rows + 2 + 15) // 16) * 16

    # NCHW -> NHWC -> zero-pad spatial by 1 -> row-flatten -> bf16, pad rows.
    x_nhwc = jnp.transpose(x_nchw, (0, 2, 3, 1))
    xp = jnp.pad(x_nhwc, ((0, 0), (1, 1), (1, 1), (0, 0)))
    x_flat = xp.reshape(n, flat_rows, c).astype(jnp.bfloat16)
    x_flat = jnp.pad(x_flat, ((0, 0), (0, rows_pad - flat_rows), (0, 0)))

    # Conv weight [F,C,3,3] (OIHW) -> [dy,dx,C,F] -> [9C, F_PAD] bf16; f32 bias.
    w_mat = jnp.transpose(conv_w, (2, 3, 1, 0)).reshape(9 * c, feat)
    w_mat = jnp.pad(w_mat, ((0, 0), (0, F_PAD - feat))).astype(jnp.bfloat16)
    b_row = jnp.pad(conv_b.reshape(1, feat), ((0, 0), (0, F_PAD - feat)))

    # Pool mask: 1/(H*W) on valid columns (j < W), 0 on the 2 over-wide cols.
    col = jnp.arange(rows, dtype=jnp.int32) % wp
    mask = jnp.where(col < w, 1.0 / float(h * w), 0.0)
    mask = mask.astype(jnp.float32).reshape(rows, 1)

    # FC [num_class, F] -> [F_PAD, NC_PAD] bf16 (zero-padded rows/cols); f32 bias.
    fcw = jnp.pad(fc_w.T, ((0, F_PAD - feat), (0, NC_PAD - num_class)))
    fcw = fcw.astype(jnp.bfloat16)
    fcb = jnp.pad(fc_b.reshape(1, num_class), ((0, 0), (0, NC_PAD - num_class)))

    kernel = functools.partial(_fused_kernel, h=h, wp=wp, c=c)

    flops = n * (2 * rows * 9 * c * F_PAD + 2 * F_PAD * NC_PAD)
    bytes_accessed = (x_flat.size * 2 + w_mat.size * 2 + fcw.size * 2
                      + (b_row.size + mask.size + fcb.size) * 4
                      + n * OUT_ROWS * NC_PAD * 4)

    out = pl.pallas_call(
        kernel,
        out_shape=jax.ShapeDtypeStruct((n, OUT_ROWS, NC_PAD), jnp.float32),
        grid_spec=pltpu.PrefetchScalarGridSpec(
            num_scalar_prefetch=0,
            grid=(n,),
            in_specs=[
                pl.BlockSpec((None, rows_pad, c), lambda b: (b, 0, 0)),   # x
                pl.BlockSpec((9 * c, F_PAD), lambda b: (0, 0)),           # conv w
                pl.BlockSpec((1, F_PAD), lambda b: (0, 0)),               # conv b
                pl.BlockSpec((rows, 1), lambda b: (0, 0)),                # pool mask
                pl.BlockSpec((F_PAD, NC_PAD), lambda b: (0, 0)),          # fc w
                pl.BlockSpec((1, NC_PAD), lambda b: (0, 0)),              # fc b
            ],
            out_specs=pl.BlockSpec((None, OUT_ROWS, NC_PAD), lambda b: (b, 0, 0)),
            scratch_shapes=[pltpu.VMEM((rows, F_PAD), jnp.float32)],
        ),
        compiler_params=pltpu.CompilerParams(
            dimension_semantics=("parallel",)),
        cost_estimate=pl.CostEstimate(flops=flops, transcendentals=0,
                                      bytes_accessed=bytes_accessed),
    )(x_flat, w_mat, b_row, mask, fcw, fcb)

    # Row 0 of each image's output block holds the logits; drop lane padding.
    return out[:, 0, :num_class]


# ------------------------------- reference ----------------------------------

def _reference(x_nchw, params):
    conv_w, conv_b, fc_w, fc_b = params
    # Match the kernel's bf16 MXU inputs (f32 accumulation) for a tight check.
    xq = x_nchw.astype(jnp.bfloat16).astype(jnp.float32)
    wq = conv_w.astype(jnp.bfloat16).astype(jnp.float32)
    y = lax.conv_general_dilated(
        xq, wq, window_strides=(1, 1), padding=((1, 1), (1, 1)),
        dimension_numbers=("NCHW", "OIHW", "NCHW"),
        precision=lax.Precision.HIGHEST)
    y = jnp.maximum(y + conv_b[None, :, None, None], 0.0)
    pooled = jnp.mean(y, axis=(2, 3))
    pooled_q = pooled.astype(jnp.bfloat16).astype(jnp.float32)
    fcw_q = fc_w.astype(jnp.bfloat16).astype(jnp.float32)
    return jnp.dot(pooled_q, fcw_q.T, precision=lax.Precision.HIGHEST) + fc_b


# --------------------------------- main --------------------------------------

if __name__ == "__main__":
    key = jax.random.PRNGKey(0)
    kx, kp = jax.random.split(key)

    N, C, H, W = 2, 4, 16, 16
    FEAT, NUM_CLASS = 32, 10

    x = jax.random.normal(kx, (N, C, H, W), jnp.float32)
    params = make_params(C, FEAT, NUM_CLASS, kp)

    out = jax.block_until_ready(model_forward(x, params))
    ref = jax.block_until_ready(_reference(x, params))

    assert out.shape == (N, NUM_CLASS), out.shape
    err = float(jnp.max(jnp.abs(out - ref)))
    assert err < 3e-3, err
    print("KERNEL_OK")
</pallas_src>

<mosaic_0001>
module attributes {stable_mosaic.version = 11 : i64} {
  func.func @_fused_kernel(%arg0: i32, %arg1: memref<1x336x4xbf16, #tpu.memory_space<vmem>>, %arg2: memref<36x128xbf16, #tpu.memory_space<vmem>>, %arg3: memref<1x128xf32, #tpu.memory_space<vmem>>, %arg4: memref<288x1xf32, #tpu.memory_space<vmem>>, %arg5: memref<128x128xbf16, #tpu.memory_space<vmem>>, %arg6: memref<1x128xf32, #tpu.memory_space<vmem>>, %arg7: memref<1x8x128xf32, #tpu.memory_space<vmem>>, %arg8: memref<288x128xf32, #tpu.memory_space<vmem>>) attributes {dimension_semantics = [#tpu.dimension_semantics<parallel>], iteration_bounds = array<i64: 2>, scalar_prefetch = 0 : i64, scratch_operands = 1 : i64, tpu.core_type = #tpu.core_type<tc>, window_params = [{transform_indices = @transform_0, window_bounds = array<i64: 1, 336, 4>}, {pipeline_mode = #tpu.pipeline_mode<synchronous>, transform_indices = @transform_1, window_bounds = array<i64: 36, 128>}, {pipeline_mode = #tpu.pipeline_mode<synchronous>, transform_indices = @transform_2, window_bounds = array<i64: 1, 128>}, {pipeline_mode = #tpu.pipeline_mode<synchronous>, transform_indices = @transform_3, window_bounds = array<i64: 288, 1>}, {pipeline_mode = #tpu.pipeline_mode<synchronous>, transform_indices = @transform_4, window_bounds = array<i64: 128, 128>}, {pipeline_mode = #tpu.pipeline_mode<synchronous>, transform_indices = @transform_5, window_bounds = array<i64: 1, 128>}, {transform_indices = @transform_6, window_bounds = array<i64: 1, 8, 128>}]} {
    %cst = arith.constant 0.000000e+00 : f32
    %0 = vector.broadcast %cst : f32 to vector<288x128xf32>
    %c0 = arith.constant 0 : index
    %c0_0 = arith.constant 0 : index
    %1 = vector.load %arg8[%c0, %c0_0] : memref<288x128xf32, #tpu.memory_space<vmem>>, vector<288x128xf32>
    tpu.vector_store %arg8[%c0, %c0_0], %0 {strides = array<i32>} : memref<288x128xf32, #tpu.memory_space<vmem>>, vector<288x128xf32>,
    %c0_1 = arith.constant 0 : index
    %c0_2 = arith.constant 0 : index
    %c0_3 = arith.constant 0 : index
    %2 = vector.load %arg1[%c0_1, %c0_2, %c0_3] : memref<1x336x4xbf16, #tpu.memory_space<vmem>>, vector<1x288x4xbf16>
    %3 = vector.shape_cast %2 : vector<1x288x4xbf16> to vector<288x4xbf16>
    %c0_4 = arith.constant 0 : index
    %c0_5 = arith.constant 0 : index
    %4 = vector.load %arg2[%c0_4, %c0_5] : memref<36x128xbf16, #tpu.memory_space<vmem>>, vector<4x128xbf16>
    %c0_6 = arith.constant 0 : index
    %c0_7 = arith.constant 0 : index
    %5 = vector.load %arg8[%c0_6, %c0_7] : memref<288x128xf32, #tpu.memory_space<vmem>>, vector<288x128xf32>
    %cst_8 = arith.constant dense<0.000000e+00> : vector<288x128xf32>
    %6 = tpu.matmul %3, %4, %cst_8 {dimension_numbers = #tpu.dot_dimension_numbers<[1], [0], [0], [1], [0, 0, 1, 1], [], []>} : vector<288x4xbf16>, vector<4x128xbf16>, vector<288x128xf32> -> vector<288x128xf32>
    %7 = arith.addf %5, %6 : vector<288x128xf32>
    %c0_9 = arith.constant 0 : index
    %c0_10 = arith.constant 0 : index
    %8 = vector.load %arg8[%c0_9, %c0_10] : memref<288x128xf32, #tpu.memory_space<vmem>>, vector<288x128xf32>
    tpu.vector_store %arg8[%c0_9, %c0_10], %7 {strides = array<i32>} : memref<288x128xf32, #tpu.memory_space<vmem>>, vector<288x128xf32>,
    %c0_11 = arith.constant 0 : index
    %c1 = arith.constant 1 : index
    %c0_12 = arith.constant 0 : index
    %9 = vector.load %arg1[%c0_11, %c1, %c0_12] : memref<1x336x4xbf16, #tpu.memory_space<vmem>>, vector<1x288x4xbf16>
    %10 = vector.shape_cast %9 : vector<1x288x4xbf16> to vector<288x4xbf16>
    %c4 = arith.constant 4 : index
    %c0_13 = arith.constant 0 : index
    %11 = vector.load %arg2[%c4, %c0_13] : memref<36x128xbf16, #tpu.memory_space<vmem>>, vector<4x128xbf16>
    %c0_14 = arith.constant 0 : index
    %c0_15 = arith.constant 0 : index
    %12 = vector.load %arg8[%c0_14, %c0_15] : memref<288x128xf32, #tpu.memory_space<vmem>>, vector<288x128xf32>
    %cst_16 = arith.constant dense<0.000000e+00> : vector<288x128xf32>
    %13 = tpu.matmul %10, %11, %cst_16 {dimension_numbers = #tpu.dot_dimension_numbers<[1], [0], [0], [1], [0, 0, 1, 1], [], []>} : vector<288x4xbf16>, vector<4x128xbf16>, vector<288x128xf32> -> vector<288x128xf32>
    %14 = arith.addf %12, %13 : vector<288x128xf32>
    %c0_17 = arith.constant 0 : index
    %c0_18 = arith.constant 0 : index
    %15 = vector.load %arg8[%c0_17, %c0_18] : memref<288x128xf32, #tpu.memory_space<vmem>>, vector<288x128xf32>
    tpu.vector_store %arg8[%c0_17, %c0_18], %14 {strides = array<i32>} : memref<288x128xf32, #tpu.memory_space<vmem>>, vector<288x128xf32>,
    %c0_19 = arith.constant 0 : index
    %c2 = arith.constant 2 : index
    %c0_20 = arith.constant 0 : index
    %16 = vector.load %arg1[%c0_19, %c2, %c0_20] : memref<1x336x4xbf16, #tpu.memory_space<vmem>>, vector<1x288x4xbf16>
    %17 = vector.shape_cast %16 : vector<1x288x4xbf16> to vector<288x4xbf16>
    %c8 = arith.constant 8 : index
    %c0_21 = arith.constant 0 : index
    %18 = vector.load %arg2[%c8, %c0_21] : memref<36x128xbf16, #tpu.memory_space<vmem>>, vector<4x128xbf16>
    %c0_22 = arith.constant 0 : index
    %c0_23 = arith.constant 0 : index
    %19 = vector.load %arg8[%c0_22, %c0_23] : memref<288x128xf32, #tpu.memory_space<vmem>>, vector<288x128xf32>
    %cst_24 = arith.constant dense<0.000000e+00> : vector<288x128xf32>
    %20 = tpu.matmul %17, %18, %cst_24 {dimension_numbers = #tpu.dot_dimension_numbers<[1], [0], [0], [1], [0, 0, 1, 1], [], []>} : vector<288x4xbf16>, vector<4x128xbf16>, vector<288x128xf32> -> vector<288x128xf32>
    %21 = arith.addf %19, %20 : vector<288x128xf32>
    %c0_25 = arith.constant 0 : index
    %c0_26 = arith.constant 0 : index
    %22 = vector.load %arg8[%c0_25, %c0_26] : memref<288x128xf32, #tpu.memory_space<vmem>>, vector<288x128xf32>
    tpu.vector_store %arg8[%c0_25, %c0_26], %21 {strides = array<i32>} : memref<288x128xf32, #tpu.memory_space<vmem>>, vector<288x128xf32>,
    %c0_27 = arith.constant 0 : index
    %c18 = arith.constant 18 : index
    %c0_28 = arith.constant 0 : index
    %23 = vector.load %arg1[%c0_27, %c18, %c0_28] : memref<1x336x4xbf16, #tpu.memory_space<vmem>>, vector<1x288x4xbf16>
    %24 = vector.shape_cast %23 : vector<1x288x4xbf16> to vector<288x4xbf16>
    %c12 = arith.constant 12 : index
    %c0_29 = arith.constant 0 : index
    %25 = vector.load %arg2[%c12, %c0_29] : memref<36x128xbf16, #tpu.memory_space<vmem>>, vector<4x128xbf16>
    %c0_30 = arith.constant 0 : index
    %c0_31 = arith.constant 0 : index
    %26 = vector.load %arg8[%c0_30, %c0_31] : memref<288x128xf32, #tpu.memory_space<vmem>>, vector<288x128xf32>
    %cst_32 = arith.constant dense<0.000000e+00> : vector<288x128xf32>
    %27 = tpu.matmul %24, %25, %cst_32 {dimension_numbers = #tpu.dot_dimension_numbers<[1], [0], [0], [1], [0, 0, 1, 1], [], []>} : vector<288x4xbf16>, vector<4x128xbf16>, vector<288x128xf32> -> vector<288x128xf32>
    %28 = arith.addf %26, %27 : vector<288x128xf32>
    %c0_33 = arith.constant 0 : index
    %c0_34 = arith.constant 0 : index
    %29 = vector.load %arg8[%c0_33, %c0_34] : memref<288x128xf32, #tpu.memory_space<vmem>>, vector<288x128xf32>
    tpu.vector_store %arg8[%c0_33, %c0_34], %28 {strides = array<i32>} : memref<288x128xf32, #tpu.memory_space<vmem>>, vector<288x128xf32>,
    %c0_35 = arith.constant 0 : index
    %c19 = arith.constant 19 : index
    %c0_36 = arith.constant 0 : index
    %30 = vector.load %arg1[%c0_35, %c19, %c0_36] : memref<1x336x4xbf16, #tpu.memory_space<vmem>>, vector<1x288x4xbf16>
    %31 = vector.shape_cast %30 : vector<1x288x4xbf16> to vector<288x4xbf16>
    %c16 = arith.constant 16 : index
    %c0_37 = arith.constant 0 : index
    %32 = vector.load %arg2[%c16, %c0_37] : memref<36x128xbf16, #tpu.memory_space<vmem>>, vector<4x128xbf16>
    %c0_38 = arith.constant 0 : index
    %c0_39 = arith.constant 0 : index
    %33 = vector.load %arg8[%c0_38, %c0_39] : memref<288x128xf32, #tpu.memory_space<vmem>>, vector<288x128xf32>
    %cst_40 = arith.constant dense<0.000000e+00> : vector<288x128xf32>
    %34 = tpu.matmul %31, %32, %cst_40 {dimension_numbers = #tpu.dot_dimension_numbers<[1], [0], [0], [1], [0, 0, 1, 1], [], []>} : vector<288x4xbf16>, vector<4x128xbf16>, vector<288x128xf32> -> vector<288x128xf32>
    %35 = arith.addf %33, %34 : vector<288x128xf32>
    %c0_41 = arith.constant 0 : index
    %c0_42 = arith.constant 0 : index
    %36 = vector.load %arg8[%c0_41, %c0_42] : memref<288x128xf32, #tpu.memory_space<vmem>>, vector<288x128xf32>
    tpu.vector_store %arg8[%c0_41, %c0_42], %35 {strides = array<i32>} : memref<288x128xf32, #tpu.memory_space<vmem>>, vector<288x128xf32>,
    %c0_43 = arith.constant 0 : index
    %c20 = arith.constant 20 : index
    %c0_44 = arith.constant 0 : index
    %37 = vector.load %arg1[%c0_43, %c20, %c0_44] : memref<1x336x4xbf16, #tpu.memory_space<vmem>>, vector<1x288x4xbf16>
    %38 = vector.shape_cast %37 : vector<1x288x4xbf16> to vector<288x4xbf16>
    %c20_45 = arith.constant 20 : index
    %c0_46 = arith.constant 0 : index
    %39 = vector.load %arg2[%c20_45, %c0_46] : memref<36x128xbf16, #tpu.memory_space<vmem>>, vector<4x128xbf16>
    %c0_47 = arith.constant 0 : index
    %c0_48 = arith.constant 0 : index
    %40 = vector.load %arg8[%c0_47, %c0_48] : memref<288x128xf32, #tpu.memory_space<vmem>>, vector<288x128xf32>
    %cst_49 = arith.constant dense<0.000000e+00> : vector<288x128xf32>
    %41 = tpu.matmul %38, %39, %cst_49 {dimension_numbers = #tpu.dot_dimension_numbers<[1], [0], [0], [1], [0, 0, 1, 1], [], []>} : vector<288x4xbf16>, vector<4x128xbf16>, vector<288x128xf32> -> vector<288x128xf32>
    %42 = arith.addf %40, %41 : vector<288x128xf32>
    %c0_50 = arith.constant 0 : index
    %c0_51 = arith.constant 0 : index
    %43 = vector.load %arg8[%c0_50, %c0_51] : memref<288x128xf32, #tpu.memory_space<vmem>>, vector<288x128xf32>
    tpu.vector_store %arg8[%c0_50, %c0_51], %42 {strides = array<i32>} : memref<288x128xf32, #tpu.memory_space<vmem>>, vector<288x128xf32>,
    %c0_52 = arith.constant 0 : index
    %c36 = arith.constant 36 : index
    %c0_53 = arith.constant 0 : index
    %44 = vector.load %arg1[%c0_52, %c36, %c0_53] : memref<1x336x4xbf16, #tpu.memory_space<vmem>>, vector<1x288x4xbf16>
    %45 = vector.shape_cast %44 : vector<1x288x4xbf16> to vector<288x4xbf16>
    %c24 = arith.constant 24 : index
    %c0_54 = arith.constant 0 : index
    %46 = vector.load %arg2[%c24, %c0_54] : memref<36x128xbf16, #tpu.memory_space<vmem>>, vector<4x128xbf16>
    %c0_55 = arith.constant 0 : index
    %c0_56 = arith.constant 0 : index
    %47 = vector.load %arg8[%c0_55, %c0_56] : memref<288x128xf32, #tpu.memory_space<vmem>>, vector<288x128xf32>
    %cst_57 = arith.constant dense<0.000000e+00> : vector<288x128xf32>
    %48 = tpu.matmul %45, %46, %cst_57 {dimension_numbers = #tpu.dot_dimension_numbers<[1], [0], [0], [1], [0, 0, 1, 1], [], []>} : vector<288x4xbf16>, vector<4x128xbf16>, vector<288x128xf32> -> vector<288x128xf32>
    %49 = arith.addf %47, %48 : vector<288x128xf32>
    %c0_58 = arith.constant 0 : index
    %c0_59 = arith.constant 0 : index
    %50 = vector.load %arg8[%c0_58, %c0_59] : memref<288x128xf32, #tpu.memory_space<vmem>>, vector<288x128xf32>
    tpu.vector_store %arg8[%c0_58, %c0_59], %49 {strides = array<i32>} : memref<288x128xf32, #tpu.memory_space<vmem>>, vector<288x128xf32>,
    %c0_60 = arith.constant 0 : index
    %c37 = arith.constant 37 : index
    %c0_61 = arith.constant 0 : index
    %51 = vector.load %arg1[%c0_60, %c37, %c0_61] : memref<1x336x4xbf16, #tpu.memory_space<vmem>>, vector<1x288x4xbf16>
    %52 = vector.shape_cast %51 : vector<1x288x4xbf16> to vector<288x4xbf16>
    %c28 = arith.constant 28 : index
    %c0_62 = arith.constant 0 : index
    %53 = vector.load %arg2[%c28, %c0_62] : memref<36x128xbf16, #tpu.memory_space<vmem>>, vector<4x128xbf16>
    %c0_63 = arith.constant 0 : index
    %c0_64 = arith.constant 0 : index
    %54 = vector.load %arg8[%c0_63, %c0_64] : memref<288x128xf32, #tpu.memory_space<vmem>>, vector<288x128xf32>
    %cst_65 = arith.constant dense<0.000000e+00> : vector<288x128xf32>
    %55 = tpu.matmul %52, %53, %cst_65 {dimension_numbers = #tpu.dot_dimension_numbers<[1], [0], [0], [1], [0, 0, 1, 1], [], []>} : vector<288x4xbf16>, vector<4x128xbf16>, vector<288x128xf32> -> vector<288x128xf32>
    %56 = arith.addf %54, %55 : vector<288x128xf32>
    %c0_66 = arith.constant 0 : index
    %c0_67 = arith.constant 0 : index
    %57 = vector.load %arg8[%c0_66, %c0_67] : memref<288x128xf32, #tpu.memory_space<vmem>>, vector<288x128xf32>
    tpu.vector_store %arg8[%c0_66, %c0_67], %56 {strides = array<i32>} : memref<288x128xf32, #tpu.memory_space<vmem>>, vector<288x128xf32>,
    %c0_68 = arith.constant 0 : index
    %c38 = arith.constant 38 : index
    %c0_69 = arith.constant 0 : index
    %58 = vector.load %arg1[%c0_68, %c38, %c0_69] : memref<1x336x4xbf16, #tpu.memory_space<vmem>>, vector<1x288x4xbf16>
    %59 = vector.shape_cast %58 : vector<1x288x4xbf16> to vector<288x4xbf16>
    %c32 = arith.constant 32 : index
    %c0_70 = arith.constant 0 : index
    %60 = vector.load %arg2[%c32, %c0_70] : memref<36x128xbf16, #tpu.memory_space<vmem>>, vector<4x128xbf16>
    %c0_71 = arith.constant 0 : index
    %c0_72 = arith.constant 0 : index
    %61 = vector.load %arg8[%c0_71, %c0_72] : memref<288x128xf32, #tpu.memory_space<vmem>>, vector<288x128xf32>
    %cst_73 = arith.constant dense<0.000000e+00> : vector<288x128xf32>
    %62 = tpu.matmul %59, %60, %cst_73 {dimension_numbers = #tpu.dot_dimension_numbers<[1], [0], [0], [1], [0, 0, 1, 1], [], []>} : vector<288x4xbf16>, vector<4x128xbf16>, vector<288x128xf32> -> vector<288x128xf32>
    %63 = arith.addf %61, %62 : vector<288x128xf32>
    %c0_74 = arith.constant 0 : index
    %c0_75 = arith.constant 0 : index
    %64 = vector.load %arg8[%c0_74, %c0_75] : memref<288x128xf32, #tpu.memory_space<vmem>>, vector<288x128xf32>
    tpu.vector_store %arg8[%c0_74, %c0_75], %63 {strides = array<i32>} : memref<288x128xf32, #tpu.memory_space<vmem>>, vector<288x128xf32>,
    %c0_76 = arith.constant 0 : index
    %c0_77 = arith.constant 0 : index
    %65 = vector.load %arg8[%c0_76, %c0_77] : memref<288x128xf32, #tpu.memory_space<vmem>>, vector<288x128xf32>
    %c0_78 = arith.constant 0 : index
    %c0_79 = arith.constant 0 : index
    %66 = vector.load %arg3[%c0_78, %c0_79] : memref<1x128xf32, #tpu.memory_space<vmem>>, vector<1x128xf32>
    %67 = vector.broadcast %66 : vector<1x128xf32> to vector<288x128xf32>
    %68 = arith.addf %65, %67 : vector<288x128xf32>
    %cst_80 = arith.constant 0.000000e+00 : f32
    %69 = vector.broadcast %cst_80 : f32 to vector<288x128xf32>
    %70 = arith.maximumf %68, %69 : vector<288x128xf32>
    %c0_81 = arith.constant 0 : index
    %c0_82 = arith.constant 0 : index
    %71 = vector.load %arg4[%c0_81, %c0_82] : memref<288x1xf32, #tpu.memory_space<vmem>>, vector<288x1xf32>
    %72 = vector.broadcast %71 : vector<288x1xf32> to vector<288x128xf32>
    %73 = arith.mulf %70, %72 : vector<288x128xf32>
    %cst_83 = arith.constant dense<0.000000e+00> : vector<128xf32>
    %74 = vector.multi_reduction <add>, %73, %cst_83 [0] : vector<288x128xf32> to vector<128xf32>
    %75 = vector.shape_cast %74 : vector<128xf32> to vector<1x128xf32>
    %76 = arith.truncf %75 : vector<1x128xf32> to vector<1x128xbf16>
    %c0_84 = arith.constant 0 : index
    %c0_85 = arith.constant 0 : index
    %77 = vector.load %arg5[%c0_84, %c0_85] : memref<128x128xbf16, #tpu.memory_space<vmem>>, vector<128x128xbf16>
    %cst_86 = arith.constant dense<0.000000e+00> : vector<1x128xf32>
    %78 = tpu.matmul %76, %77, %cst_86 {dimension_numbers = #tpu.dot_dimension_numbers<[1], [0], [0], [1], [0, 0, 1, 1], [], []>} : vector<1x128xbf16>, vector<128x128xbf16>, vector<1x128xf32> -> vector<1x128xf32>
    %c0_87 = arith.constant 0 : index
    %c0_88 = arith.constant 0 : index
    %79 = vector.load %arg6[%c0_87, %c0_88] : memref<1x128xf32, #tpu.memory_space<vmem>>, vector<1x128xf32>
    %80 = arith.addf %78, %79 : vector<1x128xf32>
    %81 = vector.shape_cast %80 : vector<1x128xf32> to vector<1x128xf32>
    %82 = vector.broadcast %81 : vector<1x128xf32> to vector<8x128xf32>
    %c0_89 = arith.constant 0 : index
    %c0_90 = arith.constant 0 : index
    %c0_91 = arith.constant 0 : index
    %83 = vector.load %arg7[%c0_89, %c0_90, %c0_91] : memref<1x8x128xf32, #tpu.memory_space<vmem>>, vector<1x8x128xf32>
    %84 = vector.shape_cast %83 : vector<1x8x128xf32> to vector<8x128xf32>
    %85 = vector.shape_cast %82 : vector<8x128xf32> to vector<1x8x128xf32>
    tpu.vector_store %arg7[%c0_89, %c0_90, %c0_91], %85 {strides = array<i32>} : memref<1x8x128xf32, #tpu.memory_space<vmem>>, vector<1x8x128xf32>,
    return
  }
  func.func @transform_0(%arg0: i32) -> (i32, i32, i32) {
    %c0_i32 = arith.constant 0 : i32
    %c0_i32_0 = arith.constant 0 : i32
    %c0_i32_1 = arith.constant 0 : i32
    return %arg0, %c0_i32, %c0_i32_0 : i32, i32, i32
  }
  func.func @transform_1(%arg0: i32) -> (i32, i32) {
    %c0_i32 = arith.constant 0 : i32
    %c0_i32_0 = arith.constant 0 : i32
    %c0_i32_1 = arith.constant 0 : i32
    return %c0_i32, %c0_i32_0 : i32, i32
  }
  func.func @transform_2(%arg0: i32) -> (i32, i32) {
    %c0_i32 = arith.constant 0 : i32
    %c0_i32_0 = arith.constant 0 : i32
    %c0_i32_1 = arith.constant 0 : i32
    return %c0_i32, %c0_i32_0 : i32, i32
  }
  func.func @transform_3(%arg0: i32) -> (i32, i32) {
    %c0_i32 = arith.constant 0 : i32
    %c0_i32_0 = arith.constant 0 : i32
    %c0_i32_1 = arith.constant 0 : i32
    return %c0_i32, %c0_i32_0 : i32, i32
  }
  func.func @transform_4(%arg0: i32) -> (i32, i32) {
    %c0_i32 = arith.constant 0 : i32
    %c0_i32_0 = arith.constant 0 : i32
    %c0_i32_1 = arith.constant 0 : i32
    return %c0_i32, %c0_i32_0 : i32, i32
  }
  func.func @transform_5(%arg0: i32) -> (i32, i32) {
    %c0_i32 = arith.constant 0 : i32
    %c0_i32_0 = arith.constant 0 : i32
    %c0_i32_1 = arith.constant 0 : i32
    return %c0_i32, %c0_i32_0 : i32, i32
  }
  func.func @transform_6(%arg0: i32) -> (i32, i32, i32) {
    %c0_i32 = arith.constant 0 : i32
    %c0_i32_0 = arith.constant 0 : i32
    %c0_i32_1 = arith.constant 0 : i32
    return %arg0, %c0_i32, %c0_i32_0 : i32, i32, i32
  }
}

</mosaic_0001>

<bundles_post_ra>
// kernel: tpu_custom_call.1
= control target key start
LH: loop header
LB: loop body
LE: loop exit
PB: predicated region body
PF: predicated region fallthrough
CT: control target
= control target key end

     0   :  { %11 = vsyncpa [#allocation4], 0  ;;  %s7655_s0 = inlined_call_operand.vmem [shape: bf16[2,336,4], index: 0, kind: input, shape index: {}]   ;;  %s7656_s1 = inlined_call_operand.vmem [shape: bf16[36,128], index: 1, kind: input, shape index: {}]   ;;  %s7657_s2 = inlined_call_operand.vmem [shape: f32[1,128], index: 2, kind: input, shape index: {}]   ;;  %s7658_s3 = inlined_call_operand.vmem [shape: f32[288,1], index: 3, kind: input, shape index: {}]   ;;  %s7659_s4 = inlined_call_operand.vmem [shape: bf16[128,128], index: 4, kind: input, shape index: {}]   ;;  %s7660_s5 = inlined_call_operand.vmem [shape: f32[1,128], index: 5, kind: input, shape index: {}]   ;;  %s7661_s6 = inlined_call_operand.hbm [shape: f32[2,8,128], index: 6, kind: output, shape index: {}]  }
   0x1   :  { %13 = vsyncpa [#allocation4 + $0x1], 0  ;;  %s6267_s21 = smov 0   ;;  %s6269_s22 = smov 0  }
   0x2   :  { %s6271_s23 = smov 0   ;;  %s6273_s24 = smov 0  }
   0x3 LB: > { %s6288_s25 = sadd.s32 4294967295, %s6229_s24   ;;  %s5096_s26 = sadd.s32 4294967294, %s6229_s24   ;;  %s6229_s24 = sphi %s6273_s24, %s7677_s24   ;;  %s6225_s23 = sphi %s6271_s23, %s7676_s23   ;;  %s6221_s22 = sphi %s6269_s22, %s7675_s22   ;;  %s6217_s21 = sphi %s6267_s21, %s7674_s21  }
   0x4   : > { %s6292_s27 = sadd.s32 1, %s6229_s24   ;;  %s157_s28 = sadd.s32 1, %s6225_s23 }
   0x5   : > { %s154_s29 = ssub.s32 %s6229_s24, %s6292_s27  ;;  %p167_p0 = scmp.ne.s32.totalorder %s6225_s23, %s6221_s22 }
   0x6   : > { %p155_p1 = scmp.eq.s32.totalorder %s154_s29, 0  ;;  %p168_p2 = scmp.eq.s32.totalorder %s6288_s25, 1 }
   0x7   : > { %p173_p3 = scmp.ne.s32.totalorder %s6221_s22, %s6217_s21  ;;  %p174_p4 = scmp.eq.s32.totalorder %s5096_s26, 1 }
   0x8   : > { %s6303_s30 = scalar_select %p155_p1, %s6225_s23, %s157_s28  }
   0x9   : > { %p6305_p5 = por %p168_p2, %p167_p0  ;;  %p6309_p6 = por %p174_p4, %p173_p3 }
   0xa   : > { %p5099_p7 = scmp.ge.s32.totalorder %s6229_s24, 1  ;;  %p215_p8 = scmp.lt.s32.totalorder %s6229_s24, 3 }
   0xc   : > { %p216_p9 = pnand %p5099_p7, %p215_p8 }
   0xe   : > { %219 = sbr.rel (%p216_p9) target bundleno = 969 (0x3c9), region = 44 }
  0x13   : > { %v323_v0 = vld [vmem:[%s7656_s1] sm:$0x3]  ;;  %vm505_vm0 = vcmask 1041408   ;;  %p245_p10 = scmp.lt.s32.totalorder %s6288_s25, 1  ;;  %v1265_v2 = vld [vmem:[%s7656_s1 + $0x4] sm:$0x3] }
  0x14   : > { %v507_v1 = vsel %vm505_vm0, %v323_v0, 0  ;;  %v1698_v3 = vld [vmem:[%s7656_s1 + $0x4] sm:$0xc]  ;;  %v1488_v4 = vsel %vm505_vm0, %v1265_v2, 0  ;;  %v2134_v6 = vld [vmem:[%s7656_s1 + $0x8] sm:$0x3] }
  0x15   : > { %6118 = vmatpush.bf16.msra.mxu1 %v507_v1  ;;  %6119 = vmatpush.bf16.msra.mxu2 %v507_v1  ;;  %s246_s15 = scalar_select %p245_p10, %s6288_s25, 1  ;;  %v1866_v5 = vunpack.c.l.b16 %v1698_v3  ;;  %v2490_v7 = vsel %vm505_vm0, %v2134_v6, 0  ;;  %vm450_vm1 = vcmask 31744   ;;  %v717_v15 = vld [vmem:[%s7656_s1] sm:$0xc]  ;;  %vm1395_vm3 = vcmask 1046528  }
  0x16   : > { %6120 = vmatpush.bf16.msra.mxu3 %v507_v1  ;;  %516 = vmatpush.bf16.msra.mxu0 %v507_v1  ;;  %v997_v16 = vunpack.c.l.b16 %v717_v15  ;;  %vm847_vm2 = vsmask.f32 7424  ;;  %v3137_v41 = vld [vmem:[%s7656_s1 + $0xc] sm:$0x3]  ;;  %v3569_v42 = vld [vmem:[%s7656_s1 + $0xc] sm:$0xc] }
  0x17   : > { %s6121_s18 = smul.u32 168, %s246_s15  ;;  %v1867_v8 = vpack.c.b16 %v1866_v5, %v1866_v5  ;;  %v3359_v43 = vsel %vm505_vm0, %v3137_v41, 0  ;;  %v3871_v44 = vunpack.c.l.b16 %v3569_v42  ;;  %v2700_v45 = vld [vmem:[%s7656_s1 + $0x8] sm:$0xc]  ;;  %v4139_v46 = vld [vmem:[%s7656_s1 + $0x10] sm:$0x3] }
  0x18   : > { %v998_v17 = vpack.c.b16 %v997_v16, %v997_v16  ;;  %v2869_v47 = vunpack.c.l.b16 %v2700_v45  ;;  %v4362_v48 = vsel %vm505_vm0, %v4139_v46, 0  ;;  %vm2264_vm4 = vsmask.f32 6400  ;;  %s242_s10 = sand.u32 1, %s6221_s22   ;;  %s5945_s12 = sshll.u32 %s6288_s25, 3 }
  0x19   : > { %1497 = vmatpush.bf16.msrb.mxu2 %v1488_v4  ;;  %s6335_s26 = scalar_lea.vmem %s7655_s0, %s6121_s18  ;;  %v1868_v9 = vrot.slane %v1867_v8, 2  ;;  %v3872_v49 = vpack.c.b16 %v3871_v44, %v3871_v44  ;;  %vm2830_vm5 = vcmask 1045504   ;;  %vm3699_vm6 = vsmask.f32 5376  ;;  %s5100_s11 = sshll.u32 %s242_s10, 3 }
  0x1a   : > { %2499 = vmatpush.bf16.msrb.mxu0 %v2490_v7  ;;  %v5953_v10 = vld [vmem:[%s6335_s26 + $0x28] sm:$0xff]  ;;  %v5956_v11 = vld [vmem:[%s6335_s26 + $0x40] sm:$0xff]  ;;  %v999_v18 = vrot.slane %v998_v17, 2  ;;  %v5954_v20 = vld [vmem:[%s6335_s26 + $0x30] sm:$0xff]  ;;  %v2870_v52 = vpack.c.b16 %v2869_v47, %v2869_v47  ;;  %vm4269_vm7 = vcmask 1044480   ;;  %s244_s17 = scalar_lea.vmem [#allocation3], %s5100_s11 }
  0x1b   : > { %v5961_v12 = vld [vmem:[%s6335_s26 + $0x68] sm:$0xff]  ;;  %v5948_v13 = vld [vmem:[%s6335_s26] sm:$0xff]  ;;  %v1924_v14 = vsel %vm505_vm0, %v1868_v9, 0  ;;  %5179 = vmatmul.msk.bf16.vlgmr.msra.gmra.mxu1 %vm450_vm1, %v5953_v10  ;;  %5182 = vmatmul.msk.bf16.vlgmr.msra.gmra.mxu2 %vm450_vm1, %v5956_v11  ;;  %v5962_v22 = vld [vmem:[%s6335_s26 + $0x70] sm:$0xff]  ;;  %v3873_v53 = vrot.slane %v3872_v49, 2  ;;  %s5034_s18 = sshll.u32 %s244_s17, 4  ;;  %s5035_s18 = int_to_ptr.vmem [resolvable:$true] %s5034_s18 }
  0x1c   : > { %5187 = vmatmul.msk.bf16.vlgmr.msra.gmra.mxu3 %vm450_vm1, %v5961_v12  ;;  %5174 = vmatmul.msk.bf16.vlgmr.msra.gmra.mxu0 %vm450_vm1, %v5948_v13  ;;  %v1055_v19 = vsel %vm505_vm0, %v999_v18, 0  ;;  %v5957_v21 = vld [vmem:[%s6335_s26 + $0x48] sm:$0xff]  ;;  %v5955_v24 = vld [vmem:[%s6335_s26 + $0x38] sm:$0xff]  ;;  %v5958_v25 = vld [vmem:[%s6335_s26 + $0x50] sm:$0xff]  ;;  %v2871_v54 = vrot.slane %v2870_v52, 2  ;;  %s5022_s20 = scalar_lea.sflag [#allocation4], %s242_s10 }
  0x1d   : > { %1933 = vmatpush.bf16.msrb.mxu3 %v1924_v14  ;;  %1064 = vmatpush.bf16.msrb.mxu1 %v1055_v19  ;;  %v5949_v23 = vld [vmem:[%s6335_s26 + $0x8] sm:$0xff]  ;;  %v5963_v26 = vld [vmem:[%s6335_s26 + $0x78] sm:$0xff]  ;;  %v5950_v27 = vld [vmem:[%s6335_s26 + $0x10] sm:$0xff]  ;;  %v3929_v55 = vsel %vm505_vm0, %v3873_v53, 0 }
  0x1e   : > { %v5966_v28 = vld [vmem:[%s6335_s26] sm:$0xff]  ;;  %v5967_v29 = vld [vmem:[%s6335_s26 + $0x8] sm:$0xff]  ;;  %v5959_v36 = vld [vmem:[%s6335_s26 + $0x58] sm:$0xff]  ;;  %3368 = vmatpush.bf16.msra.mxu2 %v3359_v43  ;;  %4371 = vmatpush.bf16.msra.mxu0 %v4362_v48  ;;  %v2927_v58 = vsel %vm505_vm0, %v2871_v54, 0 }
  0x1f   : > { %v851_v30 = vshll.u32 %v5966_v28, 16  ;;  %v849_v31 = vshrl.u32 %v5966_v28, 16  ;;  %v856_v33 = vshll.u32 %v5967_v29, 16  ;;  %v5964_v37 = vld [vmem:[%s6335_s26 + $0x80] sm:$0xff]  ;;  %v5951_v39 = vld [vmem:[%s6335_s26 + $0x18] sm:$0xff]  ;;  %v5968_v40 = vld [vmem:[%s6335_s26 + $0x10] sm:$0xff] }
  0x20   : > { %v860_v50 = vshrl.u32 %v5967_v29, 16  ;;  %v864_v51 = vshll.u32 %v5968_v40, 16  ;;  %v5464_v59 = vld [vmem:[%s6335_s26 + $0x8] sm:$0xe]  ;;  %v6020_v60 = vld [vmem:[%s6335_s26 + $0x8] sm:$0xf0] }
  0x21   : > { %v853_v32 = vrot.slane %v851_v30, 1  ;;  %v858_v35 = vrot.slane %v856_v33, 1  ;;  %3938 = vmatpush.bf16.msra.mxu3 %v3929_v55  ;;  %2936 = vmatpush.bf16.msra.mxu1 %v2927_v58  ;;  %v5960_v61 = vld [vmem:[%s6335_s26 + $0x60] sm:$0xff]  ;;  %v5965_v62 = vld [vmem:[%s6335_s26 + $0x88] sm:$0xff]  ;;  %v6021_v1 = vld [vmem:[%s6335_s26 + $0x10] sm:$0xff]  ;;  %v5465_v2 = vor.u32 %v6020_v60, %v5464_v59  ;;  %v868_v12 = vshrl.u32 %v5968_v40, 16 }
  0x22   : > { %v866_v57 = vrot.slane %v864_v51, 1  ;;  %v5952_v0 = vld [vmem:[%s6335_s26 + $0x20] sm:$0xff]  ;;  %v5969_v3 = vld [vmem:[%s6335_s26 + $0x18] sm:$0xff]  ;;  %v5374_v6 = vld [vmem:[%s6335_s26 + $0x8] sm:$0xe]  ;;  %v2274_v10 = vshrl.u32 %v6021_v1, 16 }
  0x23   : > { %v854_v34 = vor.u32 %v853_v32, %v849_v31  ;;  %v862_v56 = vor.u32 %v860_v50, %v858_v35  ;;  %v5284_v4 = vld [vmem:[%s6335_s26] sm:$0xe]  ;;  %v5984_v5 = vld [vmem:[%s6335_s26] sm:$0xf0]  ;;  %v6002_v7 = vld [vmem:[%s6335_s26 + $0x8] sm:$0xf0] }
  0x24   : > { %v2266_v8 = vshrl.u32 %v5465_v2, 16  ;;  %v2269_v9 = vshll.u32 %v5465_v2, 16  ;;  %v2277_v11 = vshll.u32 %v6021_v1, 16  ;;  %v872_v13 = vshll.u32 %v5969_v3, 16  ;;  %v5985_v14 = vld [vmem:[%s6335_s26 + $0x8] sm:$0xff]  ;;  %v6003_v16 = vld [vmem:[%s6335_s26 + $0x10] sm:$0xff] }
  0x25   : > { %v859_v38 = vsel %vm847_vm2, %v854_v34, %v858_v35  ;;  %v867_v63 = vsel %vm847_vm2, %v862_v56, %v866_v57  ;;  %v5285_v15 = vor.u32 %v5984_v5, %v5284_v4  ;;  %v5375_v17 = vor.u32 %v6002_v7, %v5374_v6  ;;  %v6022_v34 = vld [vmem:[%s6335_s26 + $0x18] sm:$0xff]  ;;  %v5970_v35 = vld [vmem:[%s6335_s26 + $0x20] sm:$0xff]  ;;  %v5986_v40 = vld [vmem:[%s6335_s26 + $0x10] sm:$0xff] }
  0x26   : > { %v2268_v18 = vrot.slane %v2266_v8, 1  ;;  %v2271_v19 = vrot.slane %v2269_v9, 2  ;;  %v6004_v41 = vld [vmem:[%s6335_s26 + $0x18] sm:$0xff]  ;;  %v1399_v46 = vrot.slane %v5986_v40, 1  ;;  %v6023_v53 = vld [vmem:[%s6335_s26 + $0x20] sm:$0xff]  ;;  %v5971_v54 = vld [vmem:[%s6335_s26 + $0x28] sm:$0xff] }
  0x27   : > { %v1831_v47 = vrot.slane %v6004_v41, 1  ;;  %v2292_v55 = vshrl.u32 %v6023_v53, 16  ;;  %v2295_v56 = vshll.u32 %v6023_v53, 16  ;;  %v888_v58 = vshll.u32 %v5971_v54, 16  ;;  %v5987_v59 = vld [vmem:[%s6335_s26 + $0x18] sm:$0xff]  ;;  %v6005_v60 = vld [vmem:[%s6335_s26 + $0x20] sm:$0xff] }
  0x28   : > { %v2272_v28 = vor.u32 %v2271_v19, %v2268_v18  ;;  %v1401_v1 = vrot.slane %v5987_v59, 1  ;;  %v1833_v2 = vrot.slane %v6005_v60, 1  ;;  %v6024_v8 = vld [vmem:[%s6335_s26 + $0x28] sm:$0xff]  ;;  %v5972_v9 = vld [vmem:[%s6335_s26 + $0x30] sm:$0xff] }
  0x29   : > { %v6007_v40 = vld [vmem:[%s6335_s26 + $0x30] sm:$0xff] }
  0x2a   : > { %v1402_v5 = vsel %vm1395_vm3, %v1399_v46, %v1401_v1  ;;  %v1834_v6 = vsel %vm1395_vm3, %v1831_v47, %v1833_v2 }
  0x2b   : > { %5180 = vmatmul.msk.bf16.gmra.mxu1 %vm450_vm1, %v5954_v20  ;;  %5183 = vmatmul.msk.bf16.gmra.mxu2 %vm450_vm1, %v5957_v21  ;;  %v2276_v20 = vrot.slane %v2274_v10, 1  ;;  %v2279_v21 = vrot.slane %v2277_v11, 2  ;;  %v2301_v10 = vshrl.u32 %v6024_v8, 16  ;;  %v2304_v11 = vshll.u32 %v6024_v8, 16 }
  0x2c   : > { %5188 = vmatmul.msk.bf16.gmra.mxu3 %vm450_vm1, %v5962_v22  ;;  %5175 = vmatmul.msk.bf16.gmra.mxu0 %vm450_vm1, %v5949_v23  ;;  %v870_v22 = vor.u32 %v868_v12, %v866_v57  ;;  %v874_v23 = vrot.slane %v872_v13, 1  ;;  %v884_v57 = vshrl.u32 %v5970_v35, 16  ;;  %v892_v12 = vshrl.u32 %v5971_v54, 16 }
  0x2d   : > { %v2280_v29 = vor.u32 %v2279_v21, %v2276_v20  ;;  %v896_v13 = vshll.u32 %v5972_v9, 16 }
  0x2e   : > { %v875_v30 = vsel %vm847_vm2, %v870_v22, %v874_v23 }
  0x2f   : > { %v2281_v33 = vsel %vm2264_vm4, %v2272_v28, %v2280_v29  ;;  %v898_v19 = vrot.slane %v896_v13, 1 }
  0x3b   : > { %5181 = vmatmul.msk.bf16.gmra.mxu1 %vm450_vm1, %v5955_v24  ;;  %5184 = vmatmul.msk.bf16.gmra.mxu2 %vm450_vm1, %v5958_v25  ;;  %v1396_v24 = vrot.slane %v5285_v15, 1  ;;  %v1397_v25 = vrot.slane %v5985_v14, 1  ;;  %v5988_v14 = vld [vmem:[%s6335_s26 + $0x20] sm:$0xff]  ;;  %v6006_v15 = vld [vmem:[%s6335_s26 + $0x28] sm:$0xff] }
  0x3c   : > { %5189 = vmatmul.msk.bf16.gmra.mxu3 %vm450_vm1, %v5963_v26  ;;  %5176 = vmatmul.msk.bf16.gmra.mxu0 %vm450_vm1, %v5950_v27  ;;  %v1829_v26 = vrot.slane %v6003_v16, 1  ;;  %v1828_v27 = vrot.slane %v5375_v17, 1  ;;  %v2303_v16 = vrot.slane %v2301_v10, 1  ;;  %v2306_v17 = vrot.slane %v2304_v11, 2 }
  0x3d   : > { %v1398_v31 = vsel %vm1395_vm3, %v1396_v24, %v1397_v25  ;;  %v1400_v50 = vsel %vm1395_vm3, %v1397_v25, %v1399_v46  ;;  %v1403_v20 = vrot.slane %v5988_v14, 1  ;;  %v1835_v21 = vrot.slane %v6006_v15, 1 }
  0x3e   : > { %v1830_v32 = vsel %vm1395_vm3, %v1828_v27, %v1829_v26  ;;  %v1832_v51 = vsel %vm1395_vm3, %v1829_v26, %v1831_v47  ;;  %v2307_v22 = vor.u32 %v2306_v17, %v2303_v16  ;;  %v1837_v46 = vrot.slane %v6007_v40, 1 }
  0x3f   : > { %v1404_v25 = vsel %vm1395_vm3, %v1401_v1, %v1403_v20  ;;  %v1836_v27 = vsel %vm1395_vm3, %v1833_v2, %v1835_v21  ;;  %v5990_v1 = vld [vmem:[%s6335_s26 + $0x30] sm:$0xff] }
  0x40   : > { %v1838_v54 = vsel %vm1395_vm3, %v1835_v21, %v1837_v46  ;;  %v1407_v8 = vrot.slane %v5990_v1, 1 }
  0x4b   : > { %5185 = vmatmul.msk.bf16.gmra.mxu2 %vm450_vm1, %v5959_v36  ;;  %5264 = vmatmul.msk.bf16.vlgmr.msrb.gmra.mxu1 %vm450_vm1, %v859_v38  ;;  %v2283_v36 = vshrl.u32 %v6022_v34, 16  ;;  %v876_v38 = vshrl.u32 %v5969_v3, 16 }
  0x4c   : > { %5190 = vmatmul.msk.bf16.gmra.mxu3 %vm450_vm1, %v5964_v37  ;;  %5177 = vmatmul.msk.bf16.gmra.mxu0 %vm450_vm1, %v5951_v39  ;;  %v2286_v37 = vshll.u32 %v6022_v34, 16  ;;  %v880_v39 = vshll.u32 %v5970_v35, 16 }
  0x4d   : > { %v2285_v42 = vrot.slane %v2283_v36, 1  ;;  %v878_v44 = vor.u32 %v876_v38, %v874_v23  ;;  %v900_v36 = vshrl.u32 %v5972_v9, 16  ;;  %v5989_v38 = vld [vmem:[%s6335_s26 + $0x28] sm:$0xff] }
  0x4e   : > { %v2288_v43 = vrot.slane %v2286_v37, 2  ;;  %v882_v45 = vrot.slane %v880_v39, 1 }
  0x50   : > { %v2289_v48 = vor.u32 %v2288_v43, %v2285_v42  ;;  %v883_v49 = vsel %vm847_vm2, %v878_v44, %v882_v45  ;;  %v902_v43 = vor.u32 %v900_v36, %v898_v19 }
  0x52   : > { %v2290_v52 = vsel %vm2264_vm4, %v2280_v29, %v2289_v48  ;;  %v6025_v29 = vld [vmem:[%s6335_s26 + $0x30] sm:$0xff] }
  0x5b   : > { %5186 = vmatmul.msk.bf16.gmra.mxu2 %vm450_vm1, %v5960_v61  ;;  %5265 = vmatmul.msk.bf16.gmra.mxu1 %vm450_vm1, %v867_v63  ;;  %v2294_v61 = vrot.slane %v2292_v55, 1  ;;  %v886_v63 = vor.u32 %v884_v57, %v882_v45  ;;  %v1405_v45 = vrot.slane %v5989_v38, 1  ;;  %v5974_v57 = vld [vmem:[%s6335_s26 + $0x40] sm:$0xff] }
  0x5c   : > { %5191 = vmatmul.msk.bf16.gmra.mxu3 %vm450_vm1, %v5965_v62  ;;  %5178 = vmatmul.msk.bf16.gmra.mxu0 %vm450_vm1, %v5952_v0  ;;  %v2297_v62 = vrot.slane %v2295_v56, 2  ;;  %v890_v0 = vrot.slane %v888_v58, 1  ;;  %v6026_v56 = vld [vmem:[%s6335_s26 + $0x38] sm:$0xff] }
  0x5d   : > { %v2319_v58 = vshrl.u32 %v6026_v56, 16  ;;  %v2322_v59 = vshll.u32 %v6026_v56, 16  ;;  %v1408_v15 = vsel %vm1395_vm3, %v1405_v45, %v1407_v8 }
  0x5e   : > { %v2298_v3 = vor.u32 %v2297_v62, %v2294_v61  ;;  %v891_v4 = vsel %vm847_vm2, %v886_v63, %v890_v0  ;;  %v894_v18 = vor.u32 %v892_v12, %v890_v0  ;;  %v912_v0 = vshll.u32 %v5974_v57, 16 }
  0x60   : > { %v2299_v7 = vsel %vm2264_vm4, %v2289_v48, %v2298_v3  ;;  %v899_v24 = vsel %vm847_vm2, %v894_v18, %v898_v19  ;;  %v2308_v28 = vsel %vm2264_vm4, %v2298_v3, %v2307_v22  ;;  %v6008_v3 = vld [vmem:[%s6335_s26 + $0x38] sm:$0xff]  ;;  %v6027_v19 = vld [vmem:[%s6335_s26 + $0x40] sm:$0xff] }
  0x61   : > { %v1839_v9 = vrot.slane %v6008_v3, 1  ;;  %v2328_v21 = vshrl.u32 %v6027_v19, 16 }
  0x63   : > { %v1840_v17 = vsel %vm1395_vm3, %v1837_v46, %v1839_v9  ;;  %v2330_v36 = vrot.slane %v2328_v21, 1 }
  0x6b   : > { %5266 = vmatmul.msk.bf16.gmra.mxu1 %vm450_vm1, %v875_v30  ;;  %5354 = vmatmul.msk.bf16.vlgmr.msrb.gmra.mxu2 %vm450_vm1, %v1398_v31  ;;  %v5973_v30 = vld [vmem:[%s6335_s26 + $0x38] sm:$0xff]  ;;  %v2310_v31 = vshrl.u32 %v6025_v29, 16 }
  0x6c   : > { %5444 = vmatmul.msk.bf16.vlgmr.msrb.gmra.mxu3 %vm450_vm1, %v1830_v32  ;;  %5534 = vmatmul.msk.bf16.vlgmr.msrb.gmra.mxu0 %vm450_vm1, %v2281_v33  ;;  %v2313_v32 = vshll.u32 %v6025_v29, 16  ;;  %v904_v37 = vshll.u32 %v5973_v30, 16  ;;  %v908_v63 = vshrl.u32 %v5973_v30, 16  ;;  %v5991_v30 = vld [vmem:[%s6335_s26 + $0x38] sm:$0xff] }
  0x6d   : > { %v2312_v41 = vrot.slane %v2310_v31, 1 }
  0x6e   : > { %v2315_v42 = vrot.slane %v2313_v32, 2  ;;  %v906_v44 = vrot.slane %v904_v37, 1  ;;  %v6009_v32 = vld [vmem:[%s6335_s26 + $0x40] sm:$0xff] }
  0x70   : > { %v2316_v47 = vor.u32 %v2315_v42, %v2312_v41  ;;  %v1409_v41 = vrot.slane %v5991_v30, 1  ;;  %v1841_v42 = vrot.slane %v6009_v32, 1 }
  0x72   : > { %v2317_v55 = vsel %vm2264_vm4, %v2307_v22, %v2316_v47  ;;  %v2331_v22 = vshll.u32 %v6027_v19, 16 }
  0x74   : > { %v2333_v37 = vrot.slane %v2331_v22, 2 }
  0x7b   : > { %5267 = vmatmul.msk.bf16.gmra.mxu1 %vm450_vm1, %v883_v49  ;;  %5355 = vmatmul.msk.bf16.gmra.mxu2 %vm450_vm1, %v1400_v50 }
  0x7c   : > { %5445 = vmatmul.msk.bf16.gmra.mxu3 %vm450_vm1, %v1832_v51  ;;  %5535 = vmatmul.msk.bf16.gmra.mxu0 %vm450_vm1, %v2290_v52  ;;  %v907_v51 = vsel %vm847_vm2, %v902_v43, %v906_v44  ;;  %v1406_v52 = vsel %vm1395_vm3, %v1403_v20, %v1405_v45  ;;  %v5975_v20 = vld [vmem:[%s6335_s26 + $0x48] sm:$0xff]  ;;  %v2334_v43 = vor.u32 %v2333_v37, %v2330_v36  ;;  %v6029_v37 = vld [vmem:[%s6335_s26 + $0x50] sm:$0xff] }
  0x7d   : > { %v920_v29 = vshll.u32 %v5975_v20, 16  ;;  %v924_v3 = vshrl.u32 %v5975_v20, 16 }
  0x7f   : > { %v922_v40 = vrot.slane %v920_v29, 1 }
  0x8b   : > { %5268 = vmatmul.msk.bf16.gmra.mxu1 %vm450_vm1, %v891_v4  ;;  %5356 = vmatmul.msk.bf16.gmra.mxu2 %vm450_vm1, %v1402_v5  ;;  %v2321_v4 = vrot.slane %v2319_v58, 1  ;;  %v2324_v5 = vrot.slane %v2322_v59, 2  ;;  %v5976_v58 = vld [vmem:[%s6335_s26 + $0x50] sm:$0xff] }
  0x8c   : > { %5446 = vmatmul.msk.bf16.gmra.mxu3 %vm450_vm1, %v1834_v6  ;;  %5536 = vmatmul.msk.bf16.gmra.mxu0 %vm450_vm1, %v2299_v7  ;;  %v910_v6 = vor.u32 %v908_v63, %v906_v44  ;;  %v914_v7 = vrot.slane %v912_v0, 1 }
  0x8d   : > { %v2325_v10 = vor.u32 %v2324_v5, %v2321_v4  ;;  %v928_v4 = vshll.u32 %v5976_v58, 16  ;;  %v5992_v5 = vld [vmem:[%s6335_s26 + $0x40] sm:$0xff] }
  0x8e   : > { %v915_v14 = vsel %vm847_vm2, %v910_v6, %v914_v7 }
  0x8f   : > { %v2326_v18 = vsel %vm2264_vm4, %v2316_v47, %v2325_v10  ;;  %v2335_v56 = vsel %vm2264_vm4, %v2325_v10, %v2334_v43 }
  0x98   : > { %v6447_v23 = vpop.f32.mrf.mxu1 }
  0x99   : > { %v6451_v26 = vpop.f32.mrf.mxu0 }
  0x9b   : > { %5269 = vmatmul.msk.bf16.gmra.mxu1 %vm450_vm1, %v899_v24  ;;  %5357 = vmatmul.msk.bf16.gmra.mxu2 %vm450_vm1, %v1404_v25 }
  0x9c   : > { %5447 = vmatmul.msk.bf16.gmra.mxu3 %vm450_vm1, %v1836_v27  ;;  %5537 = vmatmul.msk.bf16.gmra.mxu0 %vm450_vm1, %v2308_v28  ;;  %v916_v28 = vshrl.u32 %v5974_v57, 16  ;;  %v6028_v57 = vld [vmem:[%s6335_s26 + $0x48] sm:$0xff] }
  0x9d   : > { %v2340_v59 = vshll.u32 %v6028_v57, 16 }
  0x9e   : > { %v6461_v33 = vpop.f32.mrf.mxu2  ;;  %v918_v38 = vor.u32 %v916_v28, %v914_v7 }
  0x9f   : > { %v6463_v34 = vpop.f32.mrf.mxu3  ;;  %v2342_v10 = vrot.slane %v2340_v59, 2 }
  0xa0   : > { %v6465_v35 = vpop.f32.mrf.mxu1  ;;  %v923_v47 = vsel %vm847_vm2, %v918_v38, %v922_v40  ;;  %v5977_v38 = vld [vmem:[%s6335_s26 + $0x58] sm:$0xff] }
  0xa1   : > { %v6468_v39 = vpop.f32.mrf.mxu0 }
  0xa6   : > { %v6471_v48 = vpop.f32.mrf.mxu2 }
  0xa7   : > { %v6473_v49 = vpop.f32.mrf.mxu3 }
  0xa8   : > { %v6475_v50 = vpop.f32.mrf.mxu1 }
  0xa9   : > { %v6479_v53 = vpop.f32.mrf.mxu0 }
  0xab   : > { %5270 = vmatmul.msk.bf16.gmra.mxu1 %vm450_vm1, %v907_v51  ;;  %5358 = vmatmul.msk.bf16.gmra.mxu2 %vm450_vm1, %v1406_v52  ;;  %v1410_v51 = vsel %vm1395_vm3, %v1407_v8, %v1409_v41  ;;  %v6010_v8 = vld [vmem:[%s6335_s26 + $0x48] sm:$0xff] }
  0xac   : > { %5448 = vmatmul.msk.bf16.gmra.mxu3 %vm450_vm1, %v1838_v54  ;;  %5538 = vmatmul.msk.bf16.gmra.mxu0 %vm450_vm1, %v2317_v55  ;;  %v1842_v55 = vsel %vm1395_vm3, %v1839_v9, %v1841_v42 }
  0xae   : > { %v6489_v60 = vpop.f32.mrf.mxu2 }
  0xaf   : > { %v6491_v61 = vpop.f32.mrf.mxu3 }
  0xb0   : > { %v6493_v62 = vpop.f32.mrf.mxu1 }
  0xb1   : > { %v6496_v2 = vpop.f32.mrf.mxu0 }
  0xb6   : > { %v6499_v11 = vpop.f32.mrf.mxu2 }
  0xb7   : > { %v6501_v12 = vpop.f32.mrf.mxu3 }
  0xb8   : > { %v6503_v13 = vpop.f32.mrf.mxu1 }
  0xb9   : > { %v6507_v16 = vpop.f32.mrf.mxu0 }
  0xbb   : > { %5271 = vmatmul.msk.bf16.gmra.mxu1 %vm450_vm1, %v915_v14  ;;  %5359 = vmatmul.msk.bf16.gmra.mxu2 %vm450_vm1, %v1408_v15  ;;  %v926_v14 = vor.u32 %v924_v3, %v922_v40  ;;  %v930_v15 = vrot.slane %v928_v4, 1  ;;  %v2349_v40 = vshll.u32 %v6029_v37, 16 }
  0xbc   : > { %5449 = vmatmul.msk.bf16.gmra.mxu3 %vm450_vm1, %v1840_v17  ;;  %5539 = vmatmul.msk.bf16.gmra.mxu0 %vm450_vm1, %v2326_v18  ;;  %v1411_v17 = vrot.slane %v5992_v5, 1  ;;  %v1843_v18 = vrot.slane %v6010_v8, 1 }
  0xbd   : > { %v2351_v59 = vrot.slane %v2349_v40, 2 }
  0xbe   : > { %v6517_v24 = vpop.f32.mrf.mxu2  ;;  %v1412_v28 = vsel %vm1395_vm3, %v1409_v41, %v1411_v17  ;;  %v1844_v32 = vsel %vm1395_vm3, %v1841_v42, %v1843_v18 }
  0xbf   : > { %v6519_v25 = vpop.f32.mrf.mxu3 }
  0xc0   : > { %v6521_v27 = vpop.f32.mrf.mxu1 }
  0xc1   : > { %v6524_v31 = vpop.f32.mrf.mxu0 }
  0xc6   : > { %v6527_v44 = vpop.f32.mrf.mxu2 }
  0xc7   : > { %v6529_v45 = vpop.f32.mrf.mxu3 }
  0xc8   : > { %v1066_v46 = vpop.f32.mrf.mxu1 }
  0xc9   : > { %v6534_v52 = vadd.f32 %v1066_v46, %v6451_v26  ;;  %v6536_v54 = vpop.f32.mrf.mxu0  ;;  %v2337_v26 = vshrl.u32 %v6028_v57, 16  ;;  %v6011_v57 = vld [vmem:[%s6335_s26 + $0x50] sm:$0xff] }
  0xca   : > { %v1845_v5 = vrot.slane %v6011_v57, 1 }
  0xcb   : > { %5272 = vmatmul.msk.bf16.gmra.mxu1 %vm450_vm1, %v923_v47  ;;  %5360 = vmatmul.msk.bf16.gmra.mxu2 %vm450_vm1, %v1410_v51  ;;  %v2339_v9 = vrot.slane %v2337_v26, 1  ;;  %v932_v47 = vshrl.u32 %v5976_v58, 16  ;;  %v5993_v51 = vld [vmem:[%s6335_s26 + $0x48] sm:$0xff] }
  0xcc   : > { %5450 = vmatmul.msk.bf16.gmra.mxu3 %vm450_vm1, %v1842_v55  ;;  %5540 = vmatmul.msk.bf16.gmra.mxu0 %vm450_vm1, %v2335_v56  ;;  %v1413_v4 = vrot.slane %v5993_v51, 1 }
  0xcd   : > { %v2343_v19 = vor.u32 %v2342_v10, %v2339_v9 }
  0xce   : > { %v6546_v63 = vpop.f32.mrf.mxu2 }
  0xcf   : > { %v6548_v0 = vpop.f32.mrf.mxu3  ;;  %v2344_v36 = vsel %vm2264_vm4, %v2334_v43, %v2343_v19  ;;  %v936_v43 = vshll.u32 %v5977_v38, 16 }
  0xd0   : > { %v1068_v1 = vpop.f32.mrf.mxu1 }
  0xd1   : > { %v6552_v6 = vadd.f32 %v1068_v1, %v6468_v39  ;;  %v6554_v7 = vpop.f32.mrf.mxu0  ;;  %v931_v39 = vsel %vm847_vm2, %v926_v14, %v930_v15  ;;  %v934_v1 = vor.u32 %v932_v47, %v930_v15  ;;  %v938_v3 = vrot.slane %v936_v43, 1  ;;  %v5994_v47 = vld [vmem:[%s6335_s26 + $0x50] sm:$0xff] }
  0xd2   : > { %v1414_v14 = vsel %vm1395_vm3, %v1411_v17, %v1413_v4  ;;  %v1846_v15 = vsel %vm1395_vm3, %v1843_v18, %v1845_v5  ;;  %v5978_v17 = vld [vmem:[%s6335_s26 + $0x60] sm:$0xff] }
  0xd6   : > { %v6557_v21 = vpop.f32.mrf.mxu2 }
  0xd7   : > { %v6559_v20 = vpop.f32.mrf.mxu3 }
  0xd8   : > { %v1071_v22 = vpop.f32.mrf.mxu1 }
  0xd9   : > { %v6564_v29 = vadd.f32 %v1071_v22, %v6479_v53  ;;  %v6566_v30 = vpop.f32.mrf.mxu0  ;;  %v2346_v53 = vshrl.u32 %v6029_v37, 16 }
  0xdb   : > { %5273 = vmatmul.msk.bf16.gmra.mxu1 %vm450_vm1, %v931_v39  ;;  %5361 = vmatmul.msk.bf16.gmra.mxu2 %vm450_vm1, %v1412_v28  ;;  %v2348_v26 = vrot.slane %v2346_v53, 1 }
  0xdc   : > { %5451 = vmatmul.msk.bf16.gmra.mxu3 %vm450_vm1, %v1844_v32  ;;  %5541 = vmatmul.msk.bf16.gmra.mxu0 %vm450_vm1, %v2344_v36  ;;  %v6030_v32 = vld [vmem:[%s6335_s26 + $0x58] sm:$0xff] }
  0xdd   : > { %v2352_v8 = vor.u32 %v2351_v59, %v2348_v26  ;;  %v2355_v36 = vshrl.u32 %v6030_v32, 16  ;;  %v6012_v26 = vld [vmem:[%s6335_s26 + $0x58] sm:$0xff] }
  0xde   : > { %v6576_v41 = vpop.f32.mrf.mxu2 }
  0xdf   : > { %v6578_v46 = vpop.f32.mrf.mxu3  ;;  %v2353_v28 = vsel %vm2264_vm4, %v2343_v19, %v2352_v8  ;;  %v944_v19 = vshll.u32 %v5978_v17, 16  ;;  %v2357_v59 = vrot.slane %v2355_v36, 1 }
  0xe0   : > { %v1073_v42 = vpop.f32.mrf.mxu1 }
  0xe1   : > { %v6582_v55 = vadd.f32 %v1073_v42, %v6496_v2  ;;  %v6584_v56 = vpop.f32.mrf.mxu0  ;;  %v939_v2 = vsel %vm847_vm2, %v934_v1, %v938_v3  ;;  %v940_v42 = vshrl.u32 %v5977_v38, 16 }
  0xe6   : > { %v6587_v9 = vpop.f32.mrf.mxu2 }
  0xe7   : > { %v6589_v58 = vpop.f32.mrf.mxu3 }
  0xe8   : > { %v1076_v10 = vpop.f32.mrf.mxu1 }
  0xe9   : > { %v6594_v22 = vadd.f32 %v1076_v10, %v6507_v16  ;;  %v2501_v39 = vpop.f32.mrf.mxu0  ;;  %v2358_v16 = vshll.u32 %v6030_v32, 16 }
  0xeb   : > { %5274 = vmatmul.msk.bf16.gmra.mxu1 %vm450_vm1, %v939_v2  ;;  %5362 = vmatmul.msk.bf16.gmra.mxu2 %vm450_vm1, %v1414_v14  ;;  %v2360_v1 = vrot.slane %v2358_v16, 2  ;;  %v942_v2 = vor.u32 %v940_v42, %v938_v3  ;;  %v946_v14 = vrot.slane %v944_v19, 1  ;;  %v6031_v42 = vld [vmem:[%s6335_s26 + $0x60] sm:$0xff] }
  0xec   : > { %5452 = vmatmul.msk.bf16.gmra.mxu3 %vm450_vm1, %v1846_v15  ;;  %5542 = vmatmul.msk.bf16.gmra.mxu0 %vm450_vm1, %v2353_v28  ;;  %v1415_v15 = vrot.slane %v5994_v47, 1  ;;  %v2367_v19 = vshll.u32 %v6031_v42, 16 }
  0xed   : > { %v2361_v28 = vor.u32 %v2360_v1, %v2357_v59  ;;  %v5995_v1 = vld [vmem:[%s6335_s26 + $0x58] sm:$0xff] }
  0xee   : > { %v1499_v37 = vpop.f32.mrf.mxu2 }
  0xef   : > { %v1589_v53 = vadd.f32 %v1499_v37, %v6534_v52  ;;  %v1935_v18 = vpop.f32.mrf.mxu3  ;;  %v1847_v52 = vrot.slane %v6012_v26, 1  ;;  %v948_v26 = vshrl.u32 %v5978_v17, 16 }
  0xf0   : > { %v1078_v40 = vpop.f32.mrf.mxu1 }
  0xf1   : > { %v2025_v43 = vadd.f32 %v1935_v18, %v1589_v53  ;;  %v6607_v51 = vadd.f32 %v1078_v40, %v6524_v31  ;;  %v2503_v57 = vpop.f32.mrf.mxu0  ;;  %v947_v31 = vsel %vm847_vm2, %v942_v2, %v946_v14  ;;  %v1416_v18 = vsel %vm1395_vm3, %v1413_v4, %v1415_v15 }
  0xf2   : > { %v1848_v16 = vsel %vm1395_vm3, %v1845_v5, %v1847_v52  ;;  %v2362_v40 = vsel %vm2264_vm4, %v2352_v8, %v2361_v28  ;;  %v2364_v4 = vshrl.u32 %v6031_v42, 16 }
  0xf3   : > { %v6610_v10 = vadd.f32 %v2501_v39, %v2025_v43 }
  0xf6   : > { %v1501_v32 = vpop.f32.mrf.mxu2 }
  0xf7   : > { %v1590_v38 = vadd.f32 %v1501_v32, %v6552_v6  ;;  %v1937_v37 = vpop.f32.mrf.mxu3 }
  0xf8   : > { %v1081_v53 = vpop.f32.mrf.mxu1 }
  0xf9   : > { %v2026_v36 = vadd.f32 %v1937_v37, %v1590_v38  ;;  %v6616_v39 = vadd.f32 %v1081_v53, %v6536_v54  ;;  %v2506_v3 = vpop.f32.mrf.mxu0  ;;  %v5979_v54 = vld [vmem:[%s6335_s26 + $0x68] sm:$0xff]  ;;  %v6013_v38 = vld [vmem:[%s6335_s26 + $0x60] sm:$0xff]  ;;  %v2366_v37 = vrot.slane %v2364_v4, 1  ;;  %v2369_v53 = vrot.slane %v2367_v19, 2 }
  0xfa   : > { %v952_v59 = vshll.u32 %v5979_v54, 16 }
  0xfb   : > { %5275 = vmatmul.msk.bf16.gmra.mxu1 %vm450_vm1, %v947_v31  ;;  %5363 = vmatmul.msk.bf16.gmra.mxu2 %vm450_vm1, %v1416_v18  ;;  %v6623_v6 = vadd.f32 %v2503_v57, %v2026_v36  ;;  %v950_v18 = vor.u32 %v948_v26, %v946_v14  ;;  %v6032_v26 = vld [vmem:[%s6335_s26 + $0x68] sm:$0xff] }
  0xfc   : > { %5453 = vmatmul.msk.bf16.gmra.mxu3 %vm450_vm1, %v1848_v16  ;;  %5543 = vmatmul.msk.bf16.gmra.mxu0 %vm450_vm1, %v2362_v40  ;;  %v954_v36 = vrot.slane %v952_v59, 1  ;;  %v1417_v16 = vrot.slane %v5995_v1, 1  ;;  %v2370_v40 = vor.u32 %v2369_v53, %v2366_v37  ;;  %v2376_v59 = vshll.u32 %v6032_v26, 16  ;;  %v5996_v53 = vld [vmem:[%s6335_s26 + $0x60] sm:$0xff] }
  0xfe   : > { %v1504_v47 = vpop.f32.mrf.mxu2 }
  0xff   : > { %v1591_v5 = vadd.f32 %v1504_v47, %v6564_v29  ;;  %v1940_v8 = vpop.f32.mrf.mxu3  ;;  %v1849_v29 = vrot.slane %v6013_v38, 1  ;;  %v956_v38 = vshrl.u32 %v5979_v54, 16 }
 0x100   : > { %v1083_v43 = vpop.f32.mrf.mxu1 }
 0x101   : > { %v2027_v2 = vadd.f32 %v1940_v8, %v1591_v5  ;;  %v6631_v57 = vadd.f32 %v1083_v43, %v6554_v7  ;;  %v2508_v32 = vpop.f32.mrf.mxu0  ;;  %v955_v7 = vsel %vm847_vm2, %v950_v18, %v954_v36  ;;  %v1418_v8 = vsel %vm1395_vm3, %v1415_v15, %v1417_v16 }
 0x102   : > { %v1850_v19 = vsel %vm1395_vm3, %v1847_v52, %v1849_v29  ;;  %v2371_v43 = vsel %vm2264_vm4, %v2361_v28, %v2370_v40  ;;  %v2373_v15 = vshrl.u32 %v6032_v26, 16 }
 0x103   : > { %v6634_v31 = vadd.f32 %v2506_v3, %v2027_v2 }
 0x106   : > { %v1506_v42 = vpop.f32.mrf.mxu2 }
 0x107   : > { %v1592_v17 = vadd.f32 %v1506_v42, %v6582_v55  ;;  %v1942_v47 = vpop.f32.mrf.mxu3 }
 0x108   : > { %v1086_v5 = vpop.f32.mrf.mxu1 }
 0x109   : > { %v2028_v4 = vadd.f32 %v1942_v47, %v1592_v17  ;;  %v6640_v3 = vadd.f32 %v1086_v5, %v6566_v30  ;;  %v2511_v14 = vpop.f32.mrf.mxu0  ;;  %v5980_v30 = vld [vmem:[%s6335_s26 + $0x70] sm:$0xff]  ;;  %v6014_v17 = vld [vmem:[%s6335_s26 + $0x68] sm:$0xff]  ;;  %v2375_v47 = vrot.slane %v2373_v15, 1  ;;  %v2378_v5 = vrot.slane %v2376_v59, 2 }
 0x10a   : > { %v960_v37 = vshll.u32 %v5980_v30, 16 }
 0x10b   : > { %5276 = vmatmul.msk.bf16.gmra.mxu1 %vm450_vm1, %v955_v7  ;;  %5364 = vmatmul.msk.bf16.gmra.mxu2 %vm450_vm1, %v1418_v8  ;;  %v6647_v55 = vadd.f32 %v2508_v32, %v2028_v4  ;;  %v958_v8 = vor.u32 %v956_v38, %v954_v36 }
 0x10c   : > { %5454 = vmatmul.msk.bf16.gmra.mxu3 %vm450_vm1, %v1850_v19  ;;  %5544 = vmatmul.msk.bf16.gmra.mxu0 %vm450_vm1, %v2371_v43  ;;  %v962_v4 = vrot.slane %v960_v37, 1  ;;  %v1419_v19 = vrot.slane %v5996_v53, 1  ;;  %v2379_v43 = vor.u32 %v2378_v5, %v2375_v47  ;;  %v5997_v5 = vld [vmem:[%s6335_s26 + $0x68] sm:$0xff] }
 0x10e   : > { %v1509_v1 = vpop.f32.mrf.mxu2  ;;  %v1420_v15 = vsel %vm1395_vm3, %v1417_v16, %v1419_v19  ;;  %v2380_v36 = vsel %vm2264_vm4, %v2370_v40, %v2379_v43  ;;  %v5981_v16 = vld [vmem:[%s6335_s26 + $0x78] sm:$0xff] }
 0x10f   : > { %v1593_v52 = vadd.f32 %v1509_v1, %v6594_v22  ;;  %v1945_v28 = vpop.f32.mrf.mxu3  ;;  %v1851_v22 = vrot.slane %v6014_v17, 1  ;;  %v964_v17 = vshrl.u32 %v5980_v30, 16  ;;  %v968_v47 = vshll.u32 %v5981_v16, 16 }
 0x110   : > { %v1088_v2 = vpop.f32.mrf.mxu1 }
 0x111   : > { %v2029_v18 = vadd.f32 %v1945_v28, %v1593_v52  ;;  %v6655_v32 = vadd.f32 %v1088_v2, %v6584_v56  ;;  %v2513_v42 = vpop.f32.mrf.mxu0  ;;  %v963_v56 = vsel %vm847_vm2, %v958_v8, %v962_v4  ;;  %v1852_v28 = vsel %vm1395_vm3, %v1849_v29, %v1851_v22  ;;  %v6033_v2 = vld [vmem:[%s6335_s26 + $0x70] sm:$0xff] }
 0x112   : > { %v2382_v38 = vshrl.u32 %v6033_v2, 16  ;;  %v2385_v37 = vshll.u32 %v6033_v2, 16 }
 0x113   : > { %v6658_v7 = vadd.f32 %v2511_v14, %v2029_v18 }
 0x116   : > { %v1511_v26 = vpop.f32.mrf.mxu2 }
 0x117   : > { %v1594_v54 = vadd.f32 %v1511_v26, %v6607_v51  ;;  %v1947_v1 = vpop.f32.mrf.mxu3 }
 0x118   : > { %v6661_v52 = vpop.f32.mrf.mxu1 }
 0x119   : > { %v2030_v59 = vadd.f32 %v1947_v1, %v1594_v54  ;;  %v2516_v14 = vpop.f32.mrf.mxu0  ;;  %v2384_v54 = vrot.slane %v2382_v38, 1  ;;  %v2387_v1 = vrot.slane %v2385_v37, 2 }
 0x11b   : > { %5277 = vmatmul.msk.bf16.gmra.mxu1 %vm450_vm1, %v963_v56  ;;  %5365 = vmatmul.msk.bf16.gmra.mxu2 %vm450_vm1, %v1420_v15  ;;  %v6670_v51 = vadd.f32 %v2513_v42, %v2030_v59  ;;  %v6015_v42 = vld [vmem:[%s6335_s26 + $0x70] sm:$0xff]  ;;  %v966_v15 = vor.u32 %v964_v17, %v962_v4  ;;  %v970_v59 = vrot.slane %v968_v47, 1  ;;  %v2388_v2 = vor.u32 %v2387_v1, %v2384_v54  ;;  %v6034_v17 = vld [vmem:[%s6335_s26 + $0x78] sm:$0xff] }
 0x11c   : > { %5455 = vmatmul.msk.bf16.gmra.mxu3 %vm450_vm1, %v1852_v28  ;;  %5545 = vmatmul.msk.bf16.gmra.mxu0 %vm450_vm1, %v2380_v36  ;;  %v1421_v28 = vrot.slane %v5997_v5, 1  ;;  %v1853_v36 = vrot.slane %v6015_v42, 1  ;;  %v2391_v47 = vshrl.u32 %v6034_v17, 16  ;;  %v2394_v5 = vshll.u32 %v6034_v17, 16 }
 0x11d   : > { %7664 = vst [vmem:[#allocation6_spill] sm:$0xff] %v6670_v51  ;;  %v2389_v4 = vsel %vm2264_vm4, %v2379_v43, %v2388_v2  ;;  %v972_v54 = vshrl.u32 %v5981_v16, 16 }
 0x11e   : > { %v1514_v53 = vpop.f32.mrf.mxu2  ;;  %v1422_v38 = vsel %vm1395_vm3, %v1419_v19, %v1421_v28  ;;  %v5982_v19 = vld [vmem:[%s6335_s26 + $0x80] sm:$0xff] }
 0x11f   : > { %v1595_v29 = vadd.f32 %v1514_v53, %v6616_v39  ;;  %v1950_v40 = vpop.f32.mrf.mxu3  ;;  %v976_v1 = vshll.u32 %v5982_v19, 16 }
 0x120   : > { %v6676_v18 = vpop.f32.mrf.mxu1 }
 0x121   : > { %v2031_v8 = vadd.f32 %v1950_v40, %v1595_v29  ;;  %v2518_v26 = vpop.f32.mrf.mxu0  ;;  %v971_v29 = vsel %vm847_vm2, %v966_v15, %v970_v59  ;;  %v1854_v40 = vsel %vm1395_vm3, %v1851_v22, %v1853_v36  ;;  %v5998_v15 = vld [vmem:[%s6335_s26 + $0x70] sm:$0xff] }
 0x123   : > { %v6680_v56 = vadd.f32 %v2516_v14, %v2031_v8 }
 0x125   : > { %7665 = vst [vmem:[#allocation7_spill] sm:$0xff] %v6680_v56 }
 0x126   : > { %v1516_v39 = vpop.f32.mrf.mxu2 }
 0x127   : > { %v1596_v53 = vadd.f32 %v1516_v39, %v6631_v57  ;;  %v1952_v30 = vpop.f32.mrf.mxu3 }
 0x128   : > { %v6683_v51 = vpop.f32.mrf.mxu1 }
 0x129   : > { %v2032_v37 = vadd.f32 %v1952_v30, %v1596_v53  ;;  %v2521_v14 = vpop.f32.mrf.mxu0  ;;  %v2393_v30 = vrot.slane %v2391_v47, 1 }
 0x12b   : > { %5278 = vmatmul.msk.bf16.gmra.mxu1 %vm450_vm1, %v971_v29  ;;  %5366 = vmatmul.msk.bf16.gmra.mxu2 %vm450_vm1, %v1422_v38  ;;  %v6692_v57 = vadd.f32 %v2518_v26, %v2032_v37  ;;  %v6016_v26 = vld [vmem:[%s6335_s26 + $0x78] sm:$0xff]  ;;  %v2396_v29 = vrot.slane %v2394_v5, 2  ;;  %v974_v37 = vor.u32 %v972_v54, %v970_v59  ;;  %v6035_v54 = vld [vmem:[%s6335_s26 + $0x80] sm:$0xff] }
 0x12c   : > { %5456 = vmatmul.msk.bf16.gmra.mxu3 %vm450_vm1, %v1854_v40  ;;  %5546 = vmatmul.msk.bf16.gmra.mxu0 %vm450_vm1, %v2389_v4  ;;  %v978_v40 = vrot.slane %v976_v1, 1  ;;  %v1423_v4 = vrot.slane %v5998_v15, 1  ;;  %v1855_v17 = vrot.slane %v6016_v26, 1  ;;  %v1166_v1 = vadd.f32 %v6661_v52, %v6447_v23 }
 0x12d   : > { %7666 = vst [vmem:[#allocation8_spill] sm:$0xff] %v6692_v57  ;;  %v2397_v57 = vor.u32 %v2396_v29, %v2393_v30  ;;  %v2403_v15 = vshll.u32 %v6035_v54, 16  ;;  %v980_v29 = vshrl.u32 %v5982_v19, 16 }
 0x12e   : > { %v1519_v8 = vpop.f32.mrf.mxu2  ;;  %v1424_v47 = vsel %vm1395_vm3, %v1421_v28, %v1423_v4  ;;  %v5983_v28 = vld [vmem:[%s6335_s26 + $0x88] sm:$0xff] }
 0x12f   : > { %v1597_v22 = vadd.f32 %v1519_v8, %v6640_v3  ;;  %v1955_v43 = vpop.f32.mrf.mxu3  ;;  %v2398_v59 = vsel %vm2264_vm4, %v2388_v2, %v2397_v57 }
 0x130   : > { %v6698_v42 = vpop.f32.mrf.mxu1 }
 0x131   : > { %v2033_v39 = vadd.f32 %v1955_v43, %v1597_v22  ;;  %v2523_v53 = vpop.f32.mrf.mxu0  ;;  %v979_v22 = vsel %vm847_vm2, %v974_v37, %v978_v40  ;;  %v1856_v43 = vsel %vm1395_vm3, %v1853_v36, %v1855_v17  ;;  %v2400_v36 = vshrl.u32 %v6035_v54, 16  ;;  %v5999_v37 = vld [vmem:[%s6335_s26 + $0x78] sm:$0xff] }
 0x132   : > { %v1425_v52 = vrot.slane %v5999_v37, 1 }
 0x133   : > { %v6702_v38 = vadd.f32 %v2521_v14, %v2033_v39 }
 0x135   : > { %7667 = vst [vmem:[#allocation9_spill] sm:$0xff] %v6702_v38 }
 0x136   : > { %v1521_v3 = vpop.f32.mrf.mxu2 }
 0x137   : > { %v1598_v8 = vadd.f32 %v1521_v3, %v6655_v32  ;;  %v1957_v16 = vpop.f32.mrf.mxu3 }
 0x138   : > { %v6705_v56 = vpop.f32.mrf.mxu1 }
 0x139   : > { %v2034_v5 = vadd.f32 %v1957_v16, %v1598_v8  ;;  %v2526_v14 = vpop.f32.mrf.mxu0  ;;  %v6017_v16 = vld [vmem:[%s6335_s26 + $0x80] sm:$0xff] }
 0x13a   : > { %v1857_v54 = vrot.slane %v6017_v16, 1 }
 0x13b   : > { %5279 = vmatmul.msk.bf16.gmra.mxu1 %vm450_vm1, %v979_v22  ;;  %5367 = vmatmul.msk.bf16.gmra.mxu2 %vm450_vm1, %v1424_v47  ;;  %v6714_v32 = vadd.f32 %v2523_v53, %v2034_v5  ;;  %v984_v53 = vshll.u32 %v5983_v28, 16  ;;  %v2402_v22 = vrot.slane %v2400_v36, 1  ;;  %v2405_v47 = vrot.slane %v2403_v15, 2 }
 0x13c   : > { %5457 = vmatmul.msk.bf16.gmra.mxu3 %vm450_vm1, %v1856_v43  ;;  %5547 = vmatmul.msk.bf16.gmra.mxu0 %vm450_vm1, %v2398_v59  ;;  %v982_v43 = vor.u32 %v980_v29, %v978_v40  ;;  %v1167_v59 = vadd.f32 %v6676_v18, %v6465_v35  ;;  %v1858_v29 = vsel %vm1395_vm3, %v1855_v17, %v1857_v54  ;;  %v6036_v35 = vld [vmem:[%s6335_s26 + $0x88] sm:$0xff] }
 0x13d   : > { %7668 = vst [vmem:[#allocation10_spill] sm:$0xff] %v6714_v32  ;;  %v986_v23 = vrot.slane %v984_v53, 1  ;;  %v2409_v17 = vshrl.u32 %v6036_v35, 16 }
 0x13e   : > { %v1524_v2 = vpop.f32.mrf.mxu2 }
 0x13f   : > { %v1599_v39 = vadd.f32 %v1524_v2, %v1166_v1  ;;  %v1960_v26 = vpop.f32.mrf.mxu3  ;;  %v2406_v1 = vor.u32 %v2405_v47, %v2402_v22  ;;  %v716_v2 = vld [vmem:[%s6335_s26 + $0x90] sm:$0x1]  ;;  %v987_v36 = vsel %vm847_vm2, %v982_v43, %v986_v23  ;;  %v988_v22 = vshrl.u32 %v5983_v28, 16 }
 0x140   : > { %v6721_v30 = vpop.f32.mrf.mxu1  ;;  %v827_v15 = vunpack.c.l.b16 %v716_v2  ;;  %v6749_v2 = vld [vmem:[%s6335_s26 + $0x88] sm:$0xff] }
 0x141   : > { %v2035_v3 = vadd.f32 %v1960_v26, %v1599_v39  ;;  %v2528_v8 = vpop.f32.mrf.mxu0  ;;  %v2407_v53 = vsel %vm2264_vm4, %v2397_v57, %v2406_v1 }
 0x143   : > { %v6725_v5 = vadd.f32 %v2526_v14, %v2035_v3  ;;  %v1426_v14 = vsel %vm1395_vm3, %v1423_v4, %v1425_v52  ;;  %v846_v4 = vpack.c.b16 %v827_v15, %v827_v15  ;;  %v990_v15 = vor.u32 %v988_v22, %v986_v23 }
 0x145   : > { %v992_v47 = vshll.u32 %v846_v4, 16 }
 0x146   : > { %v1526_v19 = vpop.f32.mrf.mxu2 }
 0x147   : > { %v1600_v32 = vadd.f32 %v1526_v19, %v1167_v59  ;;  %v1962_v38 = vpop.f32.mrf.mxu3  ;;  %v2411_v19 = vrot.slane %v2409_v17, 1 }
 0x148   : > { %v6730_v39 = vpop.f32.mrf.mxu1 }
 0x149   : > { %v2036_v40 = vadd.f32 %v1962_v38, %v1600_v32  ;;  %v2531_v26 = vpop.f32.mrf.mxu0  ;;  %v1168_v38 = vadd.f32 %v6683_v51, %v6475_v50  ;;  %v2412_v32 = vshll.u32 %v6036_v35, 16  ;;  %v994_v50 = vrot.slane %v992_v47, 1 }
 0x14b   : > { %5280 = vmatmul.msk.bf16.gmra.mxu1 %vm450_vm1, %v987_v36  ;;  %5368 = vmatmul.msk.bf16.gmra.mxu2 %vm450_vm1, %v1426_v14  ;;  %v6739_v18 = vadd.f32 %v2528_v8, %v2036_v40  ;;  %v6000_v8 = vld [vmem:[%s6335_s26 + $0x80] sm:$0xff]  ;;  %v2414_v36 = vrot.slane %v2412_v32, 2  ;;  %v1169_v40 = vadd.f32 %v6698_v42, %v6493_v62  ;;  %v6037_v42 = vld [vmem:[%s6335_s26 + $0x90] sm:$0xff] }
 0x14c   : > { %5458 = vmatmul.msk.bf16.gmra.mxu3 %vm450_vm1, %v1858_v29  ;;  %5548 = vmatmul.msk.bf16.gmra.mxu0 %vm450_vm1, %v2407_v53  ;;  %v1427_v51 = vrot.slane %v6000_v8, 1  ;;  %v1859_v29 = vrot.slane %v6749_v2, 1  ;;  %v2421_v22 = vshll.u32 %v6037_v42, 16 }
 0x14d   : > { %v2415_v28 = vor.u32 %v2414_v36, %v2411_v19  ;;  %v6779_v19 = vld [vmem:[%s6335_s26 + $0x10] sm:$0xff] }
 0x14e   : > { %v1529_v57 = vpop.f32.mrf.mxu2  ;;  %v1428_v23 = vsel %vm1395_vm3, %v1425_v52, %v1427_v51  ;;  %v1170_v52 = vadd.f32 %v6705_v56, %v6503_v13  ;;  %v2423_v56 = vrot.slane %v2421_v22, 2 }
 0x14f   : > { %v1601_v37 = vadd.f32 %v1529_v57, %v1168_v38  ;;  %v1965_v3 = vpop.f32.mrf.mxu3  ;;  %v1860_v57 = vsel %vm1395_vm3, %v1857_v54, %v1859_v29  ;;  %v2416_v62 = vsel %vm2264_vm4, %v2406_v1, %v2415_v28  ;;  %v5554_v54 = vld [vmem:[%s6335_s26 + $0x8] sm:$0xc]  ;;  %v6038_v1 = vld [vmem:[%s6335_s26 + $0x8] sm:$0xf0] }
 0x150   : > { %v6745_v16 = vpop.f32.mrf.mxu1  ;;  %v5555_v36 = vor.u32 %v6038_v1, %v5554_v54 }
 0x151   : > { %v2037_v43 = vadd.f32 %v1965_v3, %v1601_v37  ;;  %v2533_v59 = vpop.f32.mrf.mxu0  ;;  %v2418_v3 = vshrl.u32 %v6037_v42, 16 }
 0x153   : > { %v6751_v14 = vadd.f32 %v2531_v26, %v2037_v43  ;;  %v995_v26 = vsel %vm847_vm2, %v990_v15, %v994_v50  ;;  %v2420_v13 = vrot.slane %v2418_v3, 1 }
 0x156   : > { %v1531_v53 = vpop.f32.mrf.mxu2 }
 0x157   : > { %v1602_v35 = vadd.f32 %v1531_v53, %v1169_v40  ;;  %v1967_v4 = vpop.f32.mrf.mxu3  ;;  %v6782_v40 = vld [vmem:[%s6335_s26 + $0x90] sm:$0xff]  ;;  %v2133_v53 = vld [vmem:[%s6335_s26 + $0x98] sm:$0x3] }
 0x158   : > { %v6756_v38 = vpop.f32.mrf.mxu1  ;;  %v2244_v42 = vunpack.c.l.b16 %v2133_v53 }
 0x159   : > { %v2038_v17 = vadd.f32 %v1967_v4, %v1602_v35  ;;  %v2536_v32 = vpop.f32.mrf.mxu0  ;;  %v1171_v4 = vadd.f32 %v6721_v30, %v6521_v27 }
 0x15b   : > { %5281 = vmatmul.msk.bf16.gmra.mxu1 %vm450_vm1, %v995_v26  ;;  %5369 = vmatmul.msk.bf16.gmra.mxu2 %vm450_vm1, %v1428_v23  ;;  %v6765_v37 = vadd.f32 %v2533_v59, %v2038_v17  ;;  %v6776_v59 = vld [vmem:[%s6335_s26 + $0x88] sm:$0xff]  ;;  %v2831_v23 = vrot.slane %v5555_v36, 2  ;;  %v2832_v17 = vrot.slane %v6779_v19, 2  ;;  %v1697_v19 = vld [vmem:[%s6335_s26 + $0x98] sm:$0x1] }
 0x15c   : > { %5459 = vmatmul.msk.bf16.gmra.mxu3 %vm450_vm1, %v1860_v57  ;;  %5549 = vmatmul.msk.bf16.gmra.mxu0 %vm450_vm1, %v2416_v62  ;;  %v1429_v26 = vrot.slane %v6776_v59, 1  ;;  %v1861_v57 = vrot.slane %v6782_v40, 1  ;;  %v2424_v62 = vor.u32 %v2423_v56, %v2420_v13  ;;  %v2263_v59 = vpack.c.b16 %v2244_v42, %v2244_v42 }
 0x15d   : > { %v2833_v27 = vsel %vm2830_vm5, %v2831_v23, %v2832_v17  ;;  %v6811_v23 = vld [vmem:[%s6335_s26 + $0x18] sm:$0xff] }
 0x15e   : > { %v1534_v47 = vpop.f32.mrf.mxu2  ;;  %v1430_v3 = vsel %vm1395_vm3, %v1427_v51, %v1429_v26  ;;  %v2430_v40 = vshll.u32 %v2263_v59, 16 }
 0x15f   : > { %v1603_v8 = vadd.f32 %v1534_v47, %v1170_v52  ;;  %v1970_v43 = vpop.f32.mrf.mxu3  ;;  %v1862_v47 = vsel %vm1395_vm3, %v1859_v29, %v1861_v57  ;;  %v1172_v29 = vadd.f32 %v6730_v39, %v6461_v33 }
 0x160   : > { %v6773_v2 = vpop.f32.mrf.mxu1 }
 0x161   : > { %v2039_v15 = vadd.f32 %v1970_v43, %v1603_v8  ;;  %v2538_v50 = vpop.f32.mrf.mxu0  ;;  %v2425_v8 = vsel %vm2264_vm4, %v2415_v28, %v2424_v62  ;;  %v1264_v43 = vld [vmem:[%s6335_s26 + $0x90] sm:$0x1]  ;;  %v2427_v28 = vshrl.u32 %v2263_v59, 16  ;;  %v6074_v59 = vld [vmem:[%s6335_s26 + $0x10] sm:$0xf0] }
 0x162   : > { %v1375_v51 = vunpack.c.l.b16 %v1264_v43  ;;  %v5734_v43 = vld [vmem:[%s6335_s26 + $0x10] sm:$0xc] }
 0x163   : > { %v6785_v35 = vadd.f32 %v2536_v32, %v2039_v15  ;;  %v1808_v15 = vunpack.c.l.b16 %v1697_v19 }
 0x166   : > { %v1536_v52 = vpop.f32.mrf.mxu2 }
 0x167   : > { %v1604_v54 = vadd.f32 %v1536_v52, %v1171_v4  ;;  %v1972_v1 = vpop.f32.mrf.mxu3 }
 0x168   : > { %v6792_v32 = vpop.f32.mrf.mxu1 }
 0x169   : > { %v2040_v30 = vadd.f32 %v1972_v1, %v1604_v54  ;;  %v2541_v22 = vpop.f32.mrf.mxu0  ;;  %v1827_v54 = vpack.c.b16 %v1808_v15, %v1808_v15  ;;  %v2429_v1 = vrot.slane %v2427_v28, 1  ;;  %v6075_v28 = vld [vmem:[%s6335_s26 + $0x18] sm:$0xff] }
 0x16b   : > { %5370 = vmatmul.msk.bf16.gmra.mxu2 %vm450_vm1, %v1430_v3  ;;  %5624 = vmatmul.msk.bf16.vlgmr.msra.gmra.mxu1 %vm450_vm1, %v2833_v27  ;;  %v6802_v36 = vadd.f32 %v2538_v50, %v2040_v30  ;;  %v1394_v50 = vpack.c.b16 %v1375_v51, %v1375_v51  ;;  %v2432_v3 = vrot.slane %v2430_v40, 2  ;;  %v2834_v27 = vrot.slane %v6811_v23, 2  ;;  %v4648_v23 = vld [vmem:[%s7658_s3 + $0x8] sm:$0xff] }
 0x16c   : > { %5460 = vmatmul.msk.bf16.gmra.mxu3 %vm450_vm1, %v1862_v47  ;;  %5550 = vmatmul.msk.bf16.gmra.mxu0 %vm450_vm1, %v2425_v8  ;;  %v1173_v30 = vadd.f32 %v6745_v16, %v6471_v48  ;;  %v1863_v47 = vrot.slane %v1827_v54, 1  ;;  %v5735_v40 = vor.u32 %v6074_v59, %v5734_v43  ;;  %v5644_v54 = vld [vmem:[%s6335_s26 + $0x10] sm:$0xc]  ;;  %v6844_v43 = vld [vmem:[%s6335_s26 + $0x20] sm:$0xff]  ;;  %v6847_v59 = vld [vmem:[%s6335_s26 + $0x18] sm:$0xff] }
 0x16d   : > { %v1431_v39 = vrot.slane %v1394_v50, 1  ;;  %v2433_v8 = vor.u32 %v2432_v3, %v2429_v1  ;;  %v3712_v1 = vshll.u32 %v6075_v28, 16 }
 0x16e   : > { %v1539_v13 = vpop.f32.mrf.mxu2  ;;  %v3704_v50 = vshll.u32 %v5735_v40, 16 }
 0x16f   : > { %v1605_v56 = vadd.f32 %v1539_v13, %v1172_v29  ;;  %v1975_v53 = vpop.f32.mrf.mxu3  ;;  %v1432_v15 = vsel %vm1395_vm3, %v1429_v26, %v1431_v39  ;;  %v5824_v39 = vld [vmem:[%s6335_s26 + $0x10] sm:$0x8] }
 0x170   : > { %v6808_v4 = vpop.f32.mrf.mxu1 }
 0x171   : > { %v2041_v42 = vadd.f32 %v1975_v53, %v1605_v56  ;;  %v2543_v52 = vpop.f32.mrf.mxu0  ;;  %v1864_v56 = vsel %vm1395_vm3, %v1861_v57, %v1863_v47  ;;  %v2434_v53 = vsel %vm2264_vm4, %v2424_v62, %v2433_v8  ;;  %v1174_v57 = vadd.f32 %v6756_v38, %v6489_v60  ;;  %v6056_v62 = vld [vmem:[%s6335_s26 + $0x10] sm:$0xf0] }
 0x173   : > { %v6813_v33 = vadd.f32 %v2541_v22, %v2041_v42  ;;  %v2835_v22 = vsel %vm2830_vm5, %v2832_v17, %v2834_v27  ;;  %v3701_v17 = vshrl.u32 %v5735_v40, 16  ;;  %v3709_v42 = vshrl.u32 %v6075_v28, 16  ;;  %v6850_v28 = vld [vmem:[%s6335_s26 + $0x18] sm:$0xff] }
 0x176   : > { %v1541_v19 = vpop.f32.mrf.mxu2 }
 0x177   : > { %v1606_v51 = vadd.f32 %v1541_v19, %v1173_v30  ;;  %v1977_v29 = vpop.f32.mrf.mxu3  ;;  %v5645_v19 = vor.u32 %v6056_v62, %v5644_v54 }
 0x178   : > { %v6820_v13 = vpop.f32.mrf.mxu1 }
 0x179   : > { %v2042_v48 = vadd.f32 %v1977_v29, %v1606_v51  ;;  %v2546_v16 = vpop.f32.mrf.mxu0  ;;  %v3703_v51 = vrot.slane %v3701_v17, 2  ;;  %v3706_v29 = vrot.slane %v3704_v50, 3  ;;  %v1175_v17 = vadd.f32 %v6773_v2, %v6499_v11 }
 0x17a   : > { %v2836_v50 = vrot.slane %v6844_v43, 2 }
 0x17b   : > { %5371 = vmatmul.msk.bf16.gmra.mxu2 %vm450_vm1, %v1432_v15  ;;  %5625 = vmatmul.msk.bf16.gmra.mxu1 %vm450_vm1, %v2835_v22  ;;  %v6831_v26 = vadd.f32 %v2543_v52, %v2042_v48  ;;  %v6092_v52 = vld [vmem:[%s6335_s26 + $0x10] sm:$0xf0]  ;;  %v3711_v15 = vrot.slane %v3709_v42, 2  ;;  %v3714_v22 = vrot.slane %v3712_v1, 3  ;;  %v4647_v48 = vld [vmem:[%s7658_s3] sm:$0xff]  ;;  %v3267_v42 = vrot.slane %v5645_v19, 2 }
 0x17c   : > { %5461 = vmatmul.msk.bf16.gmra.mxu3 %vm450_vm1, %v1864_v56  ;;  %5551 = vmatmul.msk.bf16.gmra.mxu0 %vm450_vm1, %v2434_v53  ;;  %v5825_v40 = vor.u32 %v6092_v52, %v5824_v39  ;;  %v6231_v56 = vmov 0   ;;  %v3707_v54 = vor.u32 %v3706_v29, %v3703_v51  ;;  %v2837_v11 = vsel %vm2830_vm5, %v2834_v27, %v2836_v50  ;;  %v6076_v51 = vld [vmem:[%s6335_s26 + $0x20] sm:$0xff] }
 0x17d   : > { %6162 = vset.pattern.permute.xlu0 %v6231_v56  ;;  %6163 = vset.pattern.permute.xlu1 %v6231_v56  ;;  %v3715_v62 = vor.u32 %v3714_v22, %v3711_v15  ;;  %v1176_v27 = vadd.f32 %v6792_v32, %v6517_v24  ;;  %v3718_v15 = vshrl.u32 %v6076_v51, 16 }
 0x17e   : > { %v1544_v3 = vpop.f32.mrf.mxu2  ;;  %4685 = vperm.xlu0 %6162, %v4647_v48   ;;  %6164 = vset.pattern.permute.xlu2 %v6231_v56  ;;  %v4270_v1 = vrot.slane %v5825_v40, 3  ;;  %v6042_v48 = vld [vmem:[%s6335_s26 + $0x28] sm:$0xff]  ;;  %v6058_v56 = vld [vmem:[%s6335_s26 + $0x20] sm:$0xff] }
 0x17f   : > { %v1607_v30 = vadd.f32 %v1544_v3, %v1174_v57  ;;  %v1980_v47 = vpop.f32.mrf.mxu3  ;;  %v3268_v57 = vrot.slane %v6847_v59, 2  ;;  %v4271_v3 = vrot.slane %v6850_v28, 3  ;;  %v3716_v59 = vsel %vm3699_vm6, %v3707_v54, %v3715_v62 }
 0x180   : > { %v6841_v8 = vpop.f32.mrf.mxu1  ;;  %v3720_v54 = vrot.slane %v3718_v15, 2  ;;  %v2838_v32 = vrot.slane %v6042_v48, 2 }
 0x181   : > { %v2043_v60 = vadd.f32 %v1980_v47, %v1607_v30  ;;  %v2548_v38 = vpop.f32.mrf.mxu0  ;;  %v3269_v2 = vsel %vm2830_vm5, %v3267_v42, %v3268_v57  ;;  %v4272_v19 = vsel %vm4269_vm7, %v4270_v1, %v4271_v3 }
 0x183   : > { %v6855_v53 = vadd.f32 %v2546_v16, %v2043_v60  ;;  %v3721_v60 = vshll.u32 %v6076_v51, 16 }
 0x185   : > { %v3723_v1 = vrot.slane %v3721_v60, 3 }
 0x186   : > { %v1546_v39 = vpop.f32.mrf.mxu2  ;;  %4690 = vperm.xlu0 %6162, %v4648_v23  }
 0x187   : > { %v1608_v52 = vadd.f32 %v1546_v39, %v1175_v17  ;;  %v1982_v16 = vpop.f32.mrf.mxu3  ;;  %v6094_v39 = vld [vmem:[%s6335_s26 + $0x20] sm:$0xff] }
 0x188   : > { %v6862_v30 = vpop.f32.mrf.mxu1 }
 0x189   : > { %v2044_v47 = vadd.f32 %v1982_v16, %v1608_v52  ;;  %v2551_v43 = vpop.f32.mrf.mxu0  ;;  %v4649_v52 = vld [vmem:[%s7658_s3 + $0x10] sm:$0xff]  ;;  %v3270_v16 = vrot.slane %v6058_v56, 2 }
 0x18a   : > { %4695 = vperm.xlu1 %6163, %v4649_v52  }
 0x18b   : > { %5626 = vmatmul.msk.bf16.gmra.mxu1 %vm450_vm1, %v2837_v11  ;;  %5714 = vmatmul.msk.bf16.vlgmr.msra.gmra.mxu2 %vm450_vm1, %v3269_v2  ;;  %v6873_v29 = vadd.f32 %v2548_v38, %v2044_v47  ;;  %v1177_v11 = vadd.f32 %v6808_v4, %v6527_v44  ;;  %v3724_v2 = vor.u32 %v3723_v1, %v3720_v54  ;;  %v4273_v47 = vrot.slane %v6094_v39, 3  ;;  %v4650_v4 = vld [vmem:[%s7658_s3 + $0x18] sm:$0xff]  ;;  %v6059_v54 = vld [vmem:[%s6335_s26 + $0x28] sm:$0xff] }
 0x18c   : > { %5804 = vmatmul.msk.bf16.vlgmr.msra.gmra.mxu3 %vm450_vm1, %v3716_v59  ;;  %5894 = vmatmul.msk.bf16.vlgmr.msra.gmra.mxu0 %vm450_vm1, %v4272_v19  ;;  %v3271_v15 = vsel %vm2830_vm5, %v3268_v57, %v3270_v16 }
 0x18e   : > { %v1549_v22 = vpop.f32.mrf.mxu2 }
 0x18f   : > { %v1609_v28 = vadd.f32 %v1549_v22, %v1176_v27  ;;  %v1985_v40 = vpop.f32.mrf.mxu3  ;;  %v2839_v27 = vsel %vm2830_vm5, %v2836_v50, %v2838_v32  ;;  %v3725_v22 = vsel %vm3699_vm6, %v3715_v62, %v3724_v2  ;;  %v1178_v50 = vadd.f32 %v6820_v13, %v6546_v63 }
 0x190   : > { %v6882_v38 = vpop.f32.mrf.mxu1  ;;  %v3272_v63 = vrot.slane %v6059_v54, 2  ;;  %v1179_v13 = vadd.f32 %v6841_v8, %v6557_v21  ;;  %v6078_v21 = vld [vmem:[%s6335_s26 + $0x30] sm:$0xff]  ;;  %v6939_v54 = vld [vmem:[%s6335_s26 + $0x38] sm:$0xff] }
 0x191   : > { %v2045_v17 = vadd.f32 %v1985_v40, %v1609_v28  ;;  %v2553_v42 = vpop.f32.mrf.mxu0  ;;  %v4274_v28 = vsel %vm4269_vm7, %v4271_v3, %v4273_v47  ;;  %v6077_v40 = vld [vmem:[%s6335_s26 + $0x28] sm:$0xff] }
 0x192   : > { %v3727_v57 = vshrl.u32 %v6077_v40, 16  ;;  %v3730_v62 = vshll.u32 %v6077_v40, 16  ;;  %4700 = vperm.xlu1 %6163, %v4650_v4  }
 0x193   : > { %v6890_v24 = vadd.f32 %v2551_v43, %v2045_v17 }
 0x194   : > { %v3729_v52 = vrot.slane %v3727_v57, 2 }
 0x196   : > { %v1551_v59 = vpop.f32.mrf.mxu2 }
 0x197   : > { %v1610_v19 = vadd.f32 %v1551_v59, %v1177_v11  ;;  %v1987_v51 = vpop.f32.mrf.mxu3  ;;  %v3732_v11 = vrot.slane %v3730_v62, 3  ;;  %v6095_v59 = vld [vmem:[%s6335_s26 + $0x28] sm:$0xff] }
 0x198   : > { %v6894_v23 = vpop.f32.mrf.mxu1 }
 0x199   : > { %v2046_v60 = vadd.f32 %v1987_v51, %v1610_v19  ;;  %v2556_v43 = vpop.f32.mrf.mxu0 }
 0x19b   : > { %5627 = vmatmul.msk.bf16.gmra.mxu1 %vm450_vm1, %v2839_v27  ;;  %5715 = vmatmul.msk.bf16.gmra.mxu2 %vm450_vm1, %v3271_v15  ;;  %v6903_v44 = vadd.f32 %v2553_v42, %v2046_v60  ;;  %v6043_v42 = vld [vmem:[%s6335_s26 + $0x30] sm:$0xff]  ;;  %v3733_v27 = vor.u32 %v3732_v11, %v3729_v52  ;;  %v4275_v15 = vrot.slane %v6095_v59, 3 }
 0x19c   : > { %5805 = vmatmul.msk.bf16.gmra.mxu3 %vm450_vm1, %v3725_v22  ;;  %5895 = vmatmul.msk.bf16.gmra.mxu0 %vm450_vm1, %v4274_v28  ;;  %v2840_v51 = vrot.slane %v6043_v42, 2 }
 0x19d   : > { %v3734_v62 = vsel %vm3699_vm6, %v3724_v2, %v3733_v27  ;;  %v3739_v2 = vshll.u32 %v6078_v21, 16 }
 0x19e   : > { %v1554_v3 = vpop.f32.mrf.mxu2  ;;  %v2841_v4 = vsel %vm2830_vm5, %v2838_v32, %v2840_v51  ;;  %v1180_v32 = vadd.f32 %v6862_v30, %v6576_v41  ;;  %v4653_v41 = vld [vmem:[%s7658_s3 + $0x30] sm:$0xff] }
 0x19f   : > { %v1611_v48 = vadd.f32 %v1554_v3, %v1178_v50  ;;  %v1990_v56 = vpop.f32.mrf.mxu3  ;;  %v3273_v50 = vsel %vm2830_vm5, %v3270_v16, %v3272_v63  ;;  %v4276_v3 = vsel %vm4269_vm7, %v4273_v47, %v4275_v15  ;;  %v3736_v16 = vshrl.u32 %v6078_v21, 16  ;;  %4715 = vperm.xlu0 %6162, %v4653_v41  }
 0x1a0   : > { %v6912_v17 = vpop.f32.mrf.mxu1  ;;  %v3741_v59 = vrot.slane %v3739_v2, 3 }
 0x1a1   : > { %v2047_v1 = vadd.f32 %v1990_v56, %v1611_v48  ;;  %v2558_v39 = vpop.f32.mrf.mxu0  ;;  %v3738_v11 = vrot.slane %v3736_v16, 2 }
 0x1a3   : > { %v6917_v19 = vadd.f32 %v2556_v43, %v2047_v1  ;;  %v6942_v1 = vld [vmem:[%s6335_s26 + $0x30] sm:$0xff] }
 0x1a6   : > { %v1556_v60 = vpop.f32.mrf.mxu2 }
 0x1a7   : > { %v1612_v22 = vadd.f32 %v1556_v60, %v1179_v13  ;;  %v1992_v28 = vpop.f32.mrf.mxu3  ;;  %v6096_v13 = vld [vmem:[%s6335_s26 + $0x30] sm:$0xff]  ;;  %v2842_v60 = vrot.slane %v6939_v54, 2 }
 0x1a8   : > { %v6921_v40 = vpop.f32.mrf.mxu1 }
 0x1a9   : > { %v2048_v57 = vadd.f32 %v1992_v28, %v1612_v22  ;;  %v2561_v43 = vpop.f32.mrf.mxu0  ;;  %v3274_v22 = vrot.slane %v6942_v1, 2  ;;  %v1181_v28 = vadd.f32 %v6882_v38, %v6587_v9  ;;  %v4651_v38 = vld [vmem:[%s7658_s3 + $0x20] sm:$0xff] }
 0x1aa   : > { %4705 = vperm.xlu2 %6164, %v4651_v38  }
 0x1ab   : > { %5628 = vmatmul.msk.bf16.gmra.mxu1 %vm450_vm1, %v2841_v4  ;;  %5716 = vmatmul.msk.bf16.gmra.mxu2 %vm450_vm1, %v3273_v50  ;;  %v6930_v8 = vadd.f32 %v2558_v39, %v2048_v57  ;;  %v3742_v4 = vor.u32 %v3741_v59, %v3738_v11  ;;  %v4277_v50 = vrot.slane %v6096_v13, 3  ;;  %v6045_v11 = vld [vmem:[%s6335_s26 + $0x40] sm:$0xff]  ;;  %v6061_v59 = vld [vmem:[%s6335_s26 + $0x38] sm:$0xff] }
 0x1ac   : > { %5806 = vmatmul.msk.bf16.gmra.mxu3 %vm450_vm1, %v3734_v62  ;;  %5896 = vmatmul.msk.bf16.gmra.mxu0 %vm450_vm1, %v4276_v3 }
 0x1ae   : > { %v1559_v48 = vpop.f32.mrf.mxu2 }
 0x1af   : > { %v1613_v56 = vadd.f32 %v1559_v48, %v1180_v32  ;;  %v1995_v47 = vpop.f32.mrf.mxu3  ;;  %v2843_v32 = vsel %vm2830_vm5, %v2840_v51, %v2842_v60  ;;  %v3743_v48 = vsel %vm3699_vm6, %v3733_v27, %v3742_v4  ;;  %v4654_v51 = vld [vmem:[%s7658_s3 + $0x38] sm:$0xff] }
 0x1b0   : > { %v6936_v42 = vpop.f32.mrf.mxu1  ;;  %4720 = vperm.xlu1 %6163, %v4654_v51  }
 0x1b1   : > { %v2049_v39 = vadd.f32 %v1995_v47, %v1613_v56  ;;  %v2563_v52 = vpop.f32.mrf.mxu0  ;;  %v4278_v56 = vsel %vm4269_vm7, %v4275_v15, %v4277_v50  ;;  %v6079_v47 = vld [vmem:[%s6335_s26 + $0x38] sm:$0xff] }
 0x1b2   : > { %v3745_v27 = vshrl.u32 %v6079_v47, 16  ;;  %v3748_v15 = vshll.u32 %v6079_v47, 16 }
 0x1b3   : > { %v6948_v30 = vadd.f32 %v2561_v43, %v2049_v39  ;;  %v3275_v43 = vsel %vm2830_vm5, %v3272_v63, %v3274_v22  ;;  %v1182_v63 = vadd.f32 %v6894_v23, %v6463_v34  ;;  %v4652_v34 = vld [vmem:[%s7658_s3 + $0x28] sm:$0xff] }
 0x1b4   : > { %4710 = vperm.xlu2 %6164, %v4652_v34  }
 0x1b6   : > { %v1561_v57 = vpop.f32.mrf.mxu2 }
 0x1b7   : > { %v1614_v62 = vadd.f32 %v1561_v57, %v1181_v28  ;;  %v1997_v3 = vpop.f32.mrf.mxu3  ;;  %v3747_v28 = vrot.slane %v3745_v27, 2  ;;  %v3750_v57 = vrot.slane %v3748_v15, 3 }
 0x1b8   : > { %v6954_v21 = vpop.f32.mrf.mxu1 }
 0x1b9   : > { %v2050_v16 = vadd.f32 %v1997_v3, %v1614_v62  ;;  %v2566_v2 = vpop.f32.mrf.mxu0  ;;  %v6097_v62 = vld [vmem:[%s6335_s26 + $0x38] sm:$0xff]  ;;  %v2844_v3 = vrot.slane %v6045_v11, 2 }
 0x1bb   : > { %5629 = vmatmul.msk.bf16.gmra.mxu1 %vm450_vm1, %v2843_v32  ;;  %5717 = vmatmul.msk.bf16.gmra.mxu2 %vm450_vm1, %v3275_v43  ;;  %v6963_v9 = vadd.f32 %v2563_v52, %v2050_v16  ;;  %v3276_v32 = vrot.slane %v6061_v59, 2  ;;  %v1183_v43 = vadd.f32 %v6912_v17, %v6473_v49  ;;  %v3751_v16 = vor.u32 %v3750_v57, %v3747_v28  ;;  %v6080_v49 = vld [vmem:[%s6335_s26 + $0x40] sm:$0xff] }
 0x1bc   : > { %5807 = vmatmul.msk.bf16.gmra.mxu3 %vm450_vm1, %v3743_v48  ;;  %5897 = vmatmul.msk.bf16.gmra.mxu0 %vm450_vm1, %v4278_v56  ;;  %v4279_v48 = vrot.slane %v6097_v62, 3  ;;  %v6062_v28 = vld [vmem:[%s6335_s26 + $0x40] sm:$0xff] }
 0x1bd   : > { %v3277_v27 = vsel %vm2830_vm5, %v3274_v22, %v3276_v32  ;;  %v1184_v22 = vadd.f32 %v6921_v40, %v6491_v61 }
 0x1be   : > { %v1564_v54 = vpop.f32.mrf.mxu2 }
 0x1bf   : > { %v1615_v1 = vadd.f32 %v1564_v54, %v1182_v63  ;;  %v2000_v39 = vpop.f32.mrf.mxu3  ;;  %v2845_v63 = vsel %vm2830_vm5, %v2842_v60, %v2844_v3  ;;  %v3752_v54 = vsel %vm3699_vm6, %v3742_v4, %v3751_v16  ;;  %v4656_v60 = vld [vmem:[%s7658_s3 + $0x48] sm:$0xff]  ;;  %v3754_v4 = vshrl.u32 %v6080_v49, 16 }
 0x1c0   : > { %v6975_v52 = vpop.f32.mrf.mxu1  ;;  %4730 = vperm.xlu0 %6162, %v4656_v60  }
 0x1c1   : > { %v2051_v13 = vadd.f32 %v2000_v39, %v1615_v1  ;;  %v2568_v41 = vpop.f32.mrf.mxu0  ;;  %v4280_v1 = vsel %vm4269_vm7, %v4277_v50, %v4279_v48  ;;  %v3757_v50 = vshll.u32 %v6080_v49, 16  ;;  %v3756_v34 = vrot.slane %v3754_v4, 2 }
 0x1c3   : > { %v6983_v23 = vadd.f32 %v2566_v2, %v2051_v13 }
 0x1c6   : > { %v1566_v56 = vpop.f32.mrf.mxu2 }
 0x1c7   : > { %v1616_v47 = vadd.f32 %v1566_v56, %v1183_v43  ;;  %v2002_v38 = vpop.f32.mrf.mxu3  ;;  %v3759_v43 = vrot.slane %v3757_v50, 3  ;;  %v6098_v56 = vld [vmem:[%s6335_s26 + $0x40] sm:$0xff] }
 0x1c8   : > { %v6987_v51 = vpop.f32.mrf.mxu1 }
 0x1c9   : > { %v2052_v2 = vadd.f32 %v2002_v38, %v1616_v47  ;;  %v2571_v15 = vpop.f32.mrf.mxu0  ;;  %v4657_v47 = vld [vmem:[%s7658_s3 + $0x50] sm:$0xff]  ;;  %v3278_v38 = vrot.slane %v6062_v28, 2 }
 0x1ca   : > { %4735 = vperm.xlu1 %6163, %v4657_v47  }
 0x1cb   : > { %5630 = vmatmul.msk.bf16.gmra.mxu1 %vm450_vm1, %v2845_v63  ;;  %5718 = vmatmul.msk.bf16.gmra.mxu2 %vm450_vm1, %v3277_v27  ;;  %v6996_v17 = vadd.f32 %v2568_v41, %v2052_v2  ;;  %v6046_v41 = vld [vmem:[%s6335_s26 + $0x48] sm:$0xff]  ;;  %v1185_v63 = vadd.f32 %v6936_v42, %v6501_v12  ;;  %v3760_v27 = vor.u32 %v3759_v43, %v3756_v34  ;;  %v4281_v2 = vrot.slane %v6098_v56, 3  ;;  %v4655_v42 = vld [vmem:[%s7658_s3 + $0x40] sm:$0xff] }
 0x1cc   : > { %5808 = vmatmul.msk.bf16.gmra.mxu3 %vm450_vm1, %v3752_v54  ;;  %5898 = vmatmul.msk.bf16.gmra.mxu0 %vm450_vm1, %v4280_v1  ;;  %v2846_v40 = vrot.slane %v6046_v41, 2  ;;  %v3279_v4 = vsel %vm2830_vm5, %v3276_v32, %v3278_v38  ;;  %v7041_v34 = vld [vmem:[%s6335_s26 + $0x48] sm:$0xff] }
 0x1cd   : > { %4725 = vperm.xlu2 %6164, %v4655_v42  }
 0x1ce   : > { %v1569_v39 = vpop.f32.mrf.mxu2 }
 0x1cf   : > { %v1617_v11 = vadd.f32 %v1569_v39, %v1184_v22  ;;  %v2005_v59 = vpop.f32.mrf.mxu3  ;;  %v2847_v22 = vsel %vm2830_vm5, %v2844_v3, %v2846_v40  ;;  %v3761_v39 = vsel %vm3699_vm6, %v3751_v16, %v3760_v27  ;;  %v1186_v3 = vadd.f32 %v6954_v21, %v6519_v25  ;;  %v4659_v25 = vld [vmem:[%s7658_s3 + $0x60] sm:$0xff] }
 0x1d0   : > { %v7005_v13 = vpop.f32.mrf.mxu1  ;;  %4745 = vperm.xlu0 %6162, %v4659_v25  }
 0x1d1   : > { %v2053_v57 = vadd.f32 %v2005_v59, %v1617_v11  ;;  %v2573_v62 = vpop.f32.mrf.mxu0  ;;  %v4282_v11 = vsel %vm4269_vm7, %v4279_v48, %v4281_v2  ;;  %v6081_v59 = vld [vmem:[%s6335_s26 + $0x48] sm:$0xff] }
 0x1d2   : > { %v3763_v32 = vshrl.u32 %v6081_v59, 16  ;;  %v3766_v16 = vshll.u32 %v6081_v59, 16 }
 0x1d3   : > { %v7013_v61 = vadd.f32 %v2571_v15, %v2053_v57 }
 0x1d4   : > { %v3765_v47 = vrot.slane %v3763_v32, 2 }
 0x1d6   : > { %v1571_v54 = vpop.f32.mrf.mxu2 }
 0x1d7   : > { %v1618_v1 = vadd.f32 %v1571_v54, %v1185_v63  ;;  %v2007_v49 = vpop.f32.mrf.mxu3  ;;  %v3768_v63 = vrot.slane %v3766_v16, 3  ;;  %v7044_v54 = vld [vmem:[%s6335_s26 + $0x48] sm:$0xff] }
 0x1d8   : > { %v7017_v60 = vpop.f32.mrf.mxu1 }
 0x1d9   : > { %v2054_v50 = vadd.f32 %v2007_v49, %v1618_v1  ;;  %v2576_v15 = vpop.f32.mrf.mxu0  ;;  %v3280_v49 = vrot.slane %v7041_v34, 2 }
 0x1db   : > { %5631 = vmatmul.msk.bf16.gmra.mxu1 %vm450_vm1, %v2847_v22  ;;  %5719 = vmatmul.msk.bf16.gmra.mxu2 %vm450_vm1, %v3279_v4  ;;  %v7026_v12 = vadd.f32 %v2573_v62, %v2054_v50  ;;  %v7038_v62 = vld [vmem:[%s6335_s26 + $0x50] sm:$0xff]  ;;  %v1187_v22 = vadd.f32 %v6975_v52, %v6529_v45  ;;  %v3769_v4 = vor.u32 %v3768_v63, %v3765_v47  ;;  %v4283_v50 = vrot.slane %v7044_v54, 3 }
 0x1dc   : > { %5809 = vmatmul.msk.bf16.gmra.mxu3 %vm450_vm1, %v3761_v39  ;;  %5899 = vmatmul.msk.bf16.gmra.mxu0 %vm450_vm1, %v4282_v11  ;;  %v2848_v1 = vrot.slane %v7038_v62, 2  ;;  %v6082_v52 = vld [vmem:[%s6335_s26 + $0x50] sm:$0xff] }
 0x1dd   : > { %v4284_v45 = vsel %vm4269_vm7, %v4281_v2, %v4283_v50  ;;  %v7079_v47 = vld [vmem:[%s6335_s26 + $0x50] sm:$0xff] }
 0x1de   : > { %v1574_v48 = vpop.f32.mrf.mxu2 }
 0x1df   : > { %v1619_v41 = vadd.f32 %v1574_v48, %v1186_v3  ;;  %v2010_v28 = vpop.f32.mrf.mxu3  ;;  %v2849_v3 = vsel %vm2830_vm5, %v2846_v40, %v2848_v1  ;;  %v1188_v40 = vadd.f32 %v6987_v51, %v6548_v0  ;;  %v4658_v0 = vld [vmem:[%s7658_s3 + $0x58] sm:$0xff] }
 0x1e0   : > { %v7035_v57 = vpop.f32.mrf.mxu1  ;;  %4740 = vperm.xlu2 %6164, %v4658_v0  }
 0x1e1   : > { %v2055_v43 = vadd.f32 %v2010_v28, %v1619_v41  ;;  %v2578_v56 = vpop.f32.mrf.mxu0  ;;  %v3770_v41 = vsel %vm3699_vm6, %v3760_v27, %v3769_v4  ;;  %v3775_v27 = vshll.u32 %v6082_v52, 16 }
 0x1e3   : > { %v7049_v21 = vadd.f32 %v2576_v15, %v2055_v43  ;;  %v3281_v15 = vsel %vm2830_vm5, %v3278_v38, %v3280_v49  ;;  %v3772_v38 = vshrl.u32 %v6082_v52, 16 }
 0x1e6   : > { %v1576_v39 = vpop.f32.mrf.mxu2 }
 0x1e7   : > { %v1620_v11 = vadd.f32 %v1576_v39, %v1187_v22  ;;  %v2012_v59 = vpop.f32.mrf.mxu3  ;;  %v3774_v22 = vrot.slane %v3772_v38, 2  ;;  %v3777_v39 = vrot.slane %v3775_v27, 3 }
 0x1e8   : > { %v2938_v42 = vpop.f32.mrf.mxu1 }
 0x1e9   : > { %v2056_v32 = vadd.f32 %v2012_v59, %v1620_v11  ;;  %v7059_v16 = vadd.f32 %v2938_v42, %v6610_v10  ;;  %v2581_v48 = vpop.f32.mrf.mxu0  ;;  %v4660_v10 = vld [vmem:[%s7658_s3 + $0x68] sm:$0xff]  ;;  %v7085_v11 = vld [vmem:[%s6335_s26 + $0x50] sm:$0xff]  ;;  %v3282_v42 = vrot.slane %v7079_v47, 2  ;;  %v7117_v47 = vld [vmem:[%s6335_s26 + $0x60] sm:$0xff] }
 0x1ea   : > { %4750 = vperm.xlu1 %6163, %v4660_v10  }
 0x1eb   : > { %5632 = vmatmul.msk.bf16.gmra.mxu1 %vm450_vm1, %v2849_v3  ;;  %5720 = vmatmul.msk.bf16.gmra.mxu2 %vm450_vm1, %v3281_v15  ;;  %v7066_v28 = vadd.f32 %v2578_v56, %v2056_v32  ;;  %v7076_v56 = vld [vmem:[%s6335_s26 + $0x58] sm:$0xff]  ;;  %v3778_v3 = vor.u32 %v3777_v39, %v3774_v22  ;;  %v4285_v15 = vrot.slane %v7085_v11, 3 }
 0x1ec   : > { %5810 = vmatmul.msk.bf16.gmra.mxu3 %vm450_vm1, %v3770_v41  ;;  %5900 = vmatmul.msk.bf16.gmra.mxu0 %vm450_vm1, %v4284_v45  ;;  %v2850_v59 = vrot.slane %v7076_v56, 2 }
 0x1ee   : > { %v1579_v2 = vpop.f32.mrf.mxu2  ;;  %v2851_v10 = vsel %vm2830_vm5, %v2848_v1, %v2850_v59  ;;  %v1190_v1 = vadd.f32 %v7017_v60, %v6578_v46  ;;  %v6117_v46 = vld [vmem:[%s7659_s4 + $0x38] sm:$0xff]  ;;  %v4663_v60 = vld [vmem:[%s7658_s3 + $0x80] sm:$0xff] }
 0x1ef   : > { %v1621_v62 = vadd.f32 %v1579_v2, %v1188_v40  ;;  %v2015_v34 = vpop.f32.mrf.mxu3  ;;  %v3779_v2 = vsel %vm3699_vm6, %v3769_v4, %v3778_v3  ;;  %5006 = vmatpush.bf16.msrb.mxu1 %v6117_v46  ;;  %v7169_v46 = vld [vmem:[%s6335_s26 + $0x60] sm:$0xff] }
 0x1f0   : > { %v2940_v43 = vpop.f32.mrf.mxu1 }
 0x1f1   : > { %v2057_v63 = vadd.f32 %v2015_v34, %v1621_v62  ;;  %v7082_v54 = vadd.f32 %v2940_v43, %v6623_v6  ;;  %v2583_v25 = vpop.f32.mrf.mxu0  ;;  %v1189_v6 = vadd.f32 %v7005_v13, %v6559_v20  ;;  %v4286_v20 = vsel %vm4269_vm7, %v4283_v50, %v4285_v15  ;;  %v6083_v13 = vld [vmem:[%s6335_s26 + $0x58] sm:$0xff] }
 0x1f2   : > { %v3784_v4 = vshll.u32 %v6083_v13, 16  ;;  %4765 = vperm.xlu1 %6163, %v4663_v60  }
 0x1f3   : > { %v7090_v51 = vadd.f32 %v2581_v48, %v2057_v63  ;;  %v3283_v48 = vsel %vm2830_vm5, %v3280_v49, %v3282_v42  ;;  %v3781_v49 = vshrl.u32 %v6083_v13, 16  ;;  %v7120_v63 = vld [vmem:[%s6335_s26 + $0x58] sm:$0xff] }
 0x1f4   : > { %v3786_v0 = vrot.slane %v3784_v4, 3 }
 0x1f5   : > { %v3783_v11 = vrot.slane %v3781_v49, 2 }
 0x1f6   : > { %v1581_v32 = vpop.f32.mrf.mxu2 }
 0x1f7   : > { %v1622_v41 = vadd.f32 %v1581_v32, %v1189_v6  ;;  %v2017_v45 = vpop.f32.mrf.mxu3  ;;  %v7126_v6 = vld [vmem:[%s6335_s26 + $0x58] sm:$0xff] }
 0x1f8   : > { %v2943_v52 = vpop.f32.mrf.mxu1 }
 0x1f9   : > { %v2058_v40 = vadd.f32 %v2017_v45, %v1622_v41  ;;  %v7100_v38 = vadd.f32 %v2943_v52, %v6634_v31  ;;  %v2586_v27 = vpop.f32.mrf.mxu0  ;;  %v4662_v31 = vld [vmem:[%s7658_s3 + $0x78] sm:$0xff]  ;;  %v2852_v41 = vrot.slane %v7117_v47, 2  ;;  %v1191_v45 = vadd.f32 %v7035_v57, %v6589_v58  ;;  %v7163_v47 = vld [vmem:[%s6335_s26 + $0x60] sm:$0xff] }
 0x1fa   : > { %4760 = vperm.xlu0 %6162, %v4662_v31   ;;  %v3787_v52 = vor.u32 %v3786_v0, %v3783_v11  ;;  %v6084_v31 = vld [vmem:[%s6335_s26 + $0x60] sm:$0xff]  ;;  %v7669_v11 = vld [vmem:[#allocation6_spill] sm:$0xff] }
 0x1fb   : > { %5633 = vmatmul.msk.bf16.gmra.mxu1 %vm450_vm1, %v2851_v10  ;;  %5721 = vmatmul.msk.bf16.gmra.mxu2 %vm450_vm1, %v3283_v48  ;;  %v7107_v62 = vadd.f32 %v2583_v25, %v2058_v40  ;;  %v4287_v10 = vrot.slane %v7126_v6, 3  ;;  %v2853_v13 = vsel %vm2830_vm5, %v2850_v59, %v2852_v41  ;;  %v3793_v59 = vshll.u32 %v6084_v31, 16 }
 0x1fc   : > { %5811 = vmatmul.msk.bf16.gmra.mxu3 %vm450_vm1, %v3779_v2  ;;  %5901 = vmatmul.msk.bf16.gmra.mxu0 %vm450_vm1, %v4286_v20  ;;  %v3788_v58 = vsel %vm3699_vm6, %v3778_v3, %v3787_v52 }
 0x1fd   : > { %v4288_v57 = vsel %vm4269_vm7, %v4285_v15, %v4287_v10 }
 0x1fe   : > { %v1584_v50 = vpop.f32.mrf.mxu2 }
 0x1ff   : > { %v1623_v34 = vadd.f32 %v1584_v50, %v1190_v1  ;;  %v2020_v43 = vpop.f32.mrf.mxu3 }
 0x200   : > { %v2945_v56 = vpop.f32.mrf.mxu1 }
 0x201   : > { %v2059_v25 = vadd.f32 %v2020_v43, %v1623_v34  ;;  %v7123_v22 = vadd.f32 %v2945_v56, %v6647_v55  ;;  %v2588_v39 = vpop.f32.mrf.mxu0  ;;  %v3284_v55 = vrot.slane %v7120_v63, 2  ;;  %v7160_v56 = vld [vmem:[%s6335_s26 + $0x68] sm:$0xff] }
 0x203   : > { %v7134_v32 = vadd.f32 %v2586_v27, %v2059_v25  ;;  %v3285_v27 = vsel %vm2830_vm5, %v3282_v42, %v3284_v55  ;;  %v4661_v42 = vld [vmem:[%s7658_s3 + $0x70] sm:$0xff]  ;;  %v3795_v25 = vrot.slane %v3793_v59, 3  ;;  %v6085_v59 = vld [vmem:[%s6335_s26 + $0x68] sm:$0xff] }
 0x204   : > { %4755 = vperm.xlu2 %6164, %v4661_v42  }
 0x206   : > { %v1586_v48 = vpop.f32.mrf.mxu2 }
 0x207   : > { %v1624_v40 = vadd.f32 %v1586_v48, %v1191_v45  ;;  %v2022_v2 = vpop.f32.mrf.mxu3  ;;  %v4686_v45 = vpop.permute.xlu0 %4685  ;;  %v2854_v48 = vrot.slane %v7160_v56, 2 }
 0x208   : > { %v2948_v20 = vpop.f32.mrf.mxu1 }
 0x209   : > { %v2060_v1 = vadd.f32 %v2022_v2, %v1624_v40  ;;  %v7145_v49 = vadd.f32 %v2948_v20, %v6658_v7  ;;  %v4373_v4 = vpop.f32.mrf.mxu0  ;;  %v3790_v7 = vshrl.u32 %v6084_v31, 16  ;;  %v3286_v40 = vrot.slane %v7163_v47, 2  ;;  %v7181_v20 = vld [vmem:[%s7657_s2] ss:$0 sm:$0xff] }
 0x20a   : > { %v4671_v47 = vld [vmem:[%s7658_s3 + $0xc0] sm:$0xff] }
 0x20b   : > { %5634 = vmatmul.msk.bf16.gmra.mxu1 %vm450_vm1, %v2853_v13  ;;  %5722 = vmatmul.msk.bf16.gmra.mxu2 %vm450_vm1, %v3285_v27  ;;  %v7151_v50 = vadd.f32 %v2588_v39, %v2060_v1  ;;  %v3792_v63 = vrot.slane %v3790_v7, 2  ;;  %v4289_v13 = vrot.slane %v7169_v46, 3 }
 0x20c   : > { %5812 = vmatmul.msk.bf16.gmra.mxu3 %vm450_vm1, %v3788_v58  ;;  %5902 = vmatmul.msk.bf16.gmra.mxu0 %vm450_vm1, %v4288_v57  ;;  %v2855_v58 = vsel %vm2830_vm5, %v2852_v41, %v2854_v48  ;;  %v3287_v57 = vsel %vm2830_vm5, %v3284_v55, %v3286_v40  ;;  %v3799_v55 = vshrl.u32 %v6085_v59, 16 }
 0x20d   : > { %v7176_v2 = vor.u32 %v3795_v25, %v3792_v63  ;;  %v4666_v63 = vld [vmem:[%s7658_s3 + $0x98] sm:$0xff] }
 0x20e   : > { %v3370_v3 = vpop.f32.mrf.mxu2  ;;  %4780 = vperm.xlu1 %6163, %v4666_v63  }
 0x20f   : > { %v3460_v15 = vadd.f32 %v3370_v3, %v7059_v16  ;;  %v3940_v34 = vpop.f32.mrf.mxu3  ;;  %v4665_v16 = vld [vmem:[%s7658_s3 + $0x90] sm:$0xff]  ;;  %v3797_v7 = vsel %vm3699_vm6, %v3787_v52, %v7176_v2  ;;  %v3802_v52 = vshll.u32 %v6085_v59, 16 }
 0x210   : > { %v2950_v43 = vpop.f32.mrf.mxu1  ;;  %4775 = vperm.xlu0 %6162, %v4665_v16  }
 0x211   : > { %v4030_v39 = vadd.f32 %v3940_v34, %v3460_v15  ;;  %v7166_v0 = vadd.f32 %v2950_v43, %v7669_v11  ;;  %v4375_v6 = vpop.f32.mrf.mxu0  ;;  %v7670_v15 = vld [vmem:[#allocation7_spill] sm:$0xff]  ;;  %v4290_v43 = vsel %vm4269_vm7, %v4287_v10, %v4289_v13  ;;  %v4691_v11 = vpop.permute.xlu0 %4690 }
 0x213   : > { %v4463_v60 = vadd.f32 %v4373_v4, %v4030_v39 }
 0x215   : > { %v4575_v3 = vadd.f32 %v7181_v20, %v4463_v60 }
 0x216   : > { %v3372_v27 = vpop.f32.mrf.mxu2 }
 0x217   : > { %v3461_v31 = vadd.f32 %v3372_v27, %v7082_v54  ;;  %v3942_v1 = vpop.f32.mrf.mxu3  ;;  %v4611_v25 = vmax.f32 %v4575_v3, 0.0 }
 0x218   : > { %v2953_v4 = vpop.f32.mrf.mxu1 }
 0x219   : > { %v4031_v42 = vadd.f32 %v3942_v1, %v3461_v31  ;;  %v7196_v34 = vadd.f32 %v2953_v4, %v7670_v15  ;;  %v4378_v54 = vpop.f32.mrf.mxu0  ;;  %v7211_v31 = vld [vmem:[%s6335_s26 + $0x70] sm:$0xff]  ;;  %v7214_v1 = vld [vmem:[%s6335_s26 + $0x68] sm:$0xff]  ;;  %v3801_v4 = vrot.slane %v3799_v55, 2 }
 0x21a   : > { %v4669_v55 = vld [vmem:[%s7658_s3 + $0xb0] sm:$0xff] }
 0x21b   : > { %v4464_v41 = vadd.f32 %v4375_v6, %v4031_v42  ;;  %5635 = vmatmul.msk.bf16.gmra.mxu1 %vm450_vm1, %v2855_v58  ;;  %5723 = vmatmul.msk.bf16.gmra.mxu2 %vm450_vm1, %v3287_v57  ;;  %v3804_v58 = vrot.slane %v3802_v52, 3  ;;  %v4863_v57 = vmul.f32 %v4686_v45, %v4611_v25  ;;  %v7671_v42 = vld [vmem:[#allocation8_spill] sm:$0xff]  ;;  %v4664_v45 = vld [vmem:[%s7658_s3 + $0x88] sm:$0xff]  ;;  %v4696_v52 = vpop.permute.xlu1 %4695  ;;  %v2856_v25 = vrot.slane %v7211_v31, 2 }
 0x21c   : > { %5813 = vmatmul.msk.bf16.gmra.mxu3 %vm450_vm1, %v3797_v7  ;;  %5903 = vmatmul.msk.bf16.gmra.mxu0 %vm450_vm1, %v4290_v43  ;;  %v7220_v43 = vld [vmem:[%s6335_s26 + $0x68] sm:$0xff] }
 0x21d   : > { %v4576_v10 = vadd.f32 %v7181_v20, %v4464_v41  ;;  %4770 = vperm.xlu2 %6164, %v4664_v45   ;;  %4795 = vperm.xlu1 %6163, %v4669_v55  }
 0x21e   : > { %v3375_v39 = vpop.f32.mrf.mxu2 }
 0x21f   : > { %v3462_v6 = vadd.f32 %v3375_v39, %v7100_v38  ;;  %v3945_v60 = vpop.f32.mrf.mxu3  ;;  %v4612_v16 = vmax.f32 %v4576_v10, 0.0  ;;  %v4668_v38 = vld [vmem:[%s7658_s3 + $0xa8] sm:$0xff]  ;;  %v3288_v10 = vrot.slane %v7214_v1, 2  ;;  %v7233_v39 = vor.u32 %v3804_v58, %v3801_v4  ;;  %v4677_v1 = vld [vmem:[%s7658_s3 + $0xf0] sm:$0xff] }
 0x220   : > { %v2955_v27 = vpop.f32.mrf.mxu1  ;;  %4790 = vperm.xlu0 %6162, %v4668_v38   ;;  %v7672_v38 = vld [vmem:[#allocation9_spill] sm:$0xff] }
 0x221   : > { %v4032_v7 = vadd.f32 %v3945_v60, %v3462_v6  ;;  %v4864_v59 = vmul.f32 %v4691_v11, %v4612_v16  ;;  %v7217_v3 = vadd.f32 %v2955_v27, %v7671_v42  ;;  %v4380_v15 = vpop.f32.mrf.mxu0  ;;  %v4291_v11 = vrot.slane %v7220_v43, 3 }
 0x222   : > { %v3289_v4 = vsel %vm2830_vm5, %v3286_v40, %v3288_v10  ;;  %v3806_v58 = vsel %vm3699_vm6, %v7176_v2, %v7233_v39  ;;  %v6116_v2 = vld [vmem:[%s7659_s4 + $0x30] sm:$0xff] }
 0x223   : > { %v4465_v41 = vadd.f32 %v4378_v54, %v4032_v7  ;;  %v4899_v63 = vadd.f32 %v4864_v59, %v4863_v57  ;;  %v2857_v7 = vsel %vm2830_vm5, %v2854_v48, %v2856_v25  ;;  %v4292_v56 = vsel %vm4269_vm7, %v4289_v13, %v4291_v11  ;;  %5007 = vmatpush.bf16.msrb.mxu1 %v6116_v2  ;;  %v4675_v2 = vld [vmem:[%s7658_s3 + $0xe0] sm:$0xff] }
 0x225   : > { %v4577_v54 = vadd.f32 %v7181_v20, %v4465_v41 }
 0x226   : > { %v3377_v6 = vpop.f32.mrf.mxu2 }
 0x227   : > { %v3463_v60 = vadd.f32 %v3377_v6, %v7123_v22  ;;  %v3947_v16 = vpop.f32.mrf.mxu3  ;;  %v4613_v27 = vmax.f32 %v4577_v54, 0.0  ;;  %v6086_v22 = vld [vmem:[%s6335_s26 + $0x70] sm:$0xff] }
 0x228   : > { %v2958_v57 = vpop.f32.mrf.mxu1  ;;  %v3808_v46 = vshrl.u32 %v6086_v22, 16  ;;  %v3811_v13 = vshll.u32 %v6086_v22, 16  ;;  %4805 = vperm.xlu0 %6162, %v4671_v47  }
 0x229   : > { %v4033_v59 = vadd.f32 %v3947_v16, %v3463_v60  ;;  %v4865_v42 = vmul.f32 %v4696_v52, %v4613_v27  ;;  %v7253_v41 = vadd.f32 %v2958_v57, %v7672_v38  ;;  %v4383_v55 = vpop.f32.mrf.mxu0  ;;  %v4701_v52 = vpop.permute.xlu1 %4700  ;;  %v7276_v27 = vld [vmem:[%s6335_s26 + $0x78] sm:$0xff]  ;;  %v7279_v57 = vld [vmem:[%s6335_s26 + $0x70] sm:$0xff] }
 0x22b   : > { %v4466_v48 = vadd.f32 %v4380_v15, %v4033_v59  ;;  %v4900_v40 = vadd.f32 %v4899_v63, %v4865_v42  ;;  %5636 = vmatmul.msk.bf16.gmra.mxu1 %vm450_vm1, %v2857_v7  ;;  %5724 = vmatmul.msk.bf16.gmra.mxu2 %vm450_vm1, %v3289_v4  ;;  %v4672_v15 = vld [vmem:[%s7658_s3 + $0xc8] sm:$0xff]  ;;  %v3810_v7 = vrot.slane %v3808_v46, 2  ;;  %v3813_v4 = vrot.slane %v3811_v13, 3  ;;  %v7673_v59 = vld [vmem:[#allocation10_spill] sm:$0xff]  ;;  %v4667_v46 = vld [vmem:[%s7658_s3 + $0xa0] sm:$0xff]  ;;  %v4706_v13 = vpop.permute.xlu2 %4705 }
 0x22c   : > { %5814 = vmatmul.msk.bf16.gmra.mxu3 %vm450_vm1, %v3806_v58  ;;  %5904 = vmatmul.msk.bf16.gmra.mxu0 %vm450_vm1, %v4292_v56  ;;  %v7285_v56 = vld [vmem:[%s6335_s26 + $0x70] sm:$0xff] }
 0x22d   : > { %v4578_v63 = vadd.f32 %v7181_v20, %v4466_v48  ;;  %4810 = vperm.xlu1 %6163, %v4672_v15   ;;  %v2858_v15 = vrot.slane %v7276_v27, 2  ;;  %4785 = vperm.xlu2 %6164, %v4667_v46  }
 0x22e   : > { %v3380_v45 = vpop.f32.mrf.mxu2 }
 0x22f   : > { %v3464_v54 = vadd.f32 %v3380_v45, %v7145_v49  ;;  %v3950_v6 = vpop.f32.mrf.mxu3  ;;  %v4614_v60 = vmax.f32 %v4578_v63, 0.0  ;;  %v4674_v49 = vld [vmem:[%s7658_s3 + $0xd8] sm:$0xff]  ;;  %v3290_v63 = vrot.slane %v7279_v57, 2  ;;  %v7298_v45 = vor.u32 %v3813_v4, %v3810_v7 }
 0x230   : > { %v2960_v16 = vpop.f32.mrf.mxu1  ;;  %4820 = vperm.xlu0 %6162, %v4674_v49   ;;  %v2859_v7 = vsel %vm2830_vm5, %v2856_v25, %v2858_v15 }
 0x231   : > { %v4034_v58 = vadd.f32 %v3950_v6, %v3464_v54  ;;  %v4866_v22 = vmul.f32 %v4701_v52, %v4614_v60  ;;  %v7282_v42 = vadd.f32 %v2960_v16, %v7673_v59  ;;  %v4385_v38 = vpop.f32.mrf.mxu0  ;;  %v3291_v4 = vsel %vm2830_vm5, %v3288_v10, %v3290_v63 }
 0x233   : > { %v4467_v47 = vadd.f32 %v4383_v55, %v4034_v58  ;;  %v4901_v48 = vadd.f32 %v4900_v40, %v4866_v22  ;;  %v4293_v40 = vrot.slane %v7285_v56, 3  ;;  %v3815_v58 = vsel %vm3699_vm6, %v7233_v39, %v7298_v45  ;;  %v4678_v39 = vld [vmem:[%s7658_s3 + $0xf8] sm:$0xff]  ;;  %v6115_v56 = vld [vmem:[%s7659_s4 + $0x28] sm:$0xff] }
 0x234   : > { %5008 = vmatpush.bf16.msrb.mxu1 %v6115_v56 }
 0x235   : > { %v4579_v55 = vadd.f32 %v7181_v20, %v4467_v47  ;;  %4825 = vperm.xlu1 %6163, %v4675_v2   ;;  %v4294_v31 = vsel %vm4269_vm7, %v4291_v11, %v4293_v40  ;;  %v4670_v11 = vld [vmem:[%s7658_s3 + $0xb8] sm:$0xff]  ;;  %v4711_v2 = vpop.permute.xlu2 %4710 }
 0x236   : > { %v3382_v52 = vpop.f32.mrf.mxu2  ;;  %4800 = vperm.xlu2 %6164, %v4670_v11   ;;  %v4716_v11 = vpop.permute.xlu0 %4715 }
 0x237   : > { %v3465_v54 = vadd.f32 %v3382_v52, %v7166_v0  ;;  %v3952_v6 = vpop.f32.mrf.mxu3  ;;  %v4615_v60 = vmax.f32 %v4579_v55, 0.0  ;;  %v6087_v0 = vld [vmem:[%s6335_s26 + $0x78] sm:$0xff] }
 0x238   : > { %v2963_v16 = vpop.f32.mrf.mxu1  ;;  %v3820_v43 = vshll.u32 %v6087_v0, 16  ;;  %4835 = vperm.xlu0 %6162, %v4677_v1   ;;  %v4681_v1 = vld [vmem:[%s7658_s3 + $0x110] sm:$0xff] }
 0x239   : > { %v4035_v22 = vadd.f32 %v3952_v6, %v3465_v54  ;;  %v4867_v59 = vmul.f32 %v4706_v13, %v4615_v60  ;;  %v7318_v49 = vadd.f32 %v2963_v16, %v6725_v5  ;;  %v4388_v47 = vpop.f32.mrf.mxu0  ;;  %v3817_v5 = vshrl.u32 %v6087_v0, 16  ;;  %v7341_v54 = vld [vmem:[%s6335_s26 + $0x80] sm:$0xff]  ;;  %v7344_v6 = vld [vmem:[%s6335_s26 + $0x78] sm:$0xff] }
 0x23a   : > { %v3822_v16 = vrot.slane %v3820_v43, 3 }
 0x23b   : > { %v4468_v25 = vadd.f32 %v4385_v38, %v4035_v22  ;;  %v4902_v10 = vadd.f32 %v4901_v48, %v4867_v59  ;;  %5637 = vmatmul.msk.bf16.gmra.mxu1 %vm450_vm1, %v2859_v7  ;;  %5725 = vmatmul.msk.bf16.gmra.mxu2 %vm450_vm1, %v3291_v4  ;;  %v3819_v60 = vrot.slane %v3817_v5, 2  ;;  %v7350_v22 = vld [vmem:[%s6335_s26 + $0x78] sm:$0xff]  ;;  %v3292_v5 = vrot.slane %v7344_v6, 2 }
 0x23c   : > { %5815 = vmatmul.msk.bf16.gmra.mxu3 %vm450_vm1, %v3815_v58  ;;  %5905 = vmatmul.msk.bf16.gmra.mxu0 %vm450_vm1, %v4294_v31 }
 0x23d   : > { %v4580_v38 = vadd.f32 %v7181_v20, %v4468_v25  ;;  %4840 = vperm.xlu1 %6163, %v4678_v39   ;;  %v4673_v25 = vld [vmem:[%s7658_s3 + $0xd0] sm:$0xff]  ;;  %v7363_v43 = vor.u32 %v3822_v16, %v3819_v60 }
 0x23e   : > { %v3385_v48 = vpop.f32.mrf.mxu2  ;;  %4815 = vperm.xlu2 %6164, %v4673_v25  }
 0x23f   : > { %v3466_v46 = vadd.f32 %v3385_v48, %v7196_v34  ;;  %v3955_v13 = vpop.f32.mrf.mxu3  ;;  %v4616_v55 = vmax.f32 %v4580_v38, 0.0  ;;  %v4680_v34 = vld [vmem:[%s7658_s3 + $0x108] sm:$0xff] }
 0x240   : > { %v2965_v52 = vpop.f32.mrf.mxu1  ;;  %4850 = vperm.xlu0 %6162, %v4680_v34   ;;  %v4721_v34 = vpop.permute.xlu1 %4720 }
 0x241   : > { %v4036_v7 = vadd.f32 %v3955_v13, %v3466_v46  ;;  %v4868_v4 = vmul.f32 %v4711_v2, %v4616_v55  ;;  %v7347_v58 = vadd.f32 %v2965_v52, %v6739_v18  ;;  %v4390_v0 = vpop.f32.mrf.mxu0  ;;  %v2860_v18 = vrot.slane %v7341_v54, 2 }
 0x242   : > { %v3293_v55 = vsel %vm2830_vm5, %v3290_v63, %v3292_v5  ;;  %v3824_v52 = vsel %vm3699_vm6, %v7298_v45, %v7363_v43  ;;  %v4676_v45 = vld [vmem:[%s7658_s3 + $0xe8] sm:$0xff] }
 0x243   : > { %v4469_v59 = vadd.f32 %v4388_v47, %v4036_v7  ;;  %v4903_v31 = vadd.f32 %v4902_v10, %v4868_v4  ;;  %v4295_v47 = vrot.slane %v7350_v22, 3  ;;  %v2861_v13 = vsel %vm2830_vm5, %v2858_v15, %v2860_v18  ;;  %v4682_v22 = vld [vmem:[%s7658_s3 + $0x118] sm:$0xff] }
 0x245   : > { %v4581_v39 = vadd.f32 %v7181_v20, %v4469_v59  ;;  %4855 = vperm.xlu1 %6163, %v4681_v1   ;;  %v4296_v27 = vsel %vm4269_vm7, %v4293_v40, %v4295_v47 }
 0x246   : > { %v3387_v10 = vpop.f32.mrf.mxu2  ;;  %4830 = vperm.xlu2 %6164, %v4676_v45  }
 0x247   : > { %v3467_v38 = vadd.f32 %v3387_v10, %v7217_v3  ;;  %v3957_v48 = vpop.f32.mrf.mxu3  ;;  %v4617_v2 = vmax.f32 %v4581_v39, 0.0  ;;  %v6088_v3 = vld [vmem:[%s6335_s26 + $0x80] sm:$0xff]  ;;  %v7405_v39 = vld [vmem:[%s6335_s26 + $0x88] sm:$0xff] }
 0x248   : > { %v2968_v46 = vpop.f32.mrf.mxu1  ;;  %v3829_v63 = vshll.u32 %v6088_v3, 16  ;;  %v7408_v10 = vld [vmem:[%s6335_s26 + $0x80] sm:$0xff] }
 0x249   : > { %v4037_v60 = vadd.f32 %v3957_v48, %v3467_v38  ;;  %v4869_v16 = vmul.f32 %v4716_v11, %v4617_v2  ;;  %v7383_v7 = vadd.f32 %v2968_v46, %v6751_v14  ;;  %v4393_v4 = vpop.f32.mrf.mxu0  ;;  %v3826_v14 = vshrl.u32 %v6088_v3, 16 }
 0x24a   : > { %v3831_v38 = vrot.slane %v3829_v63, 3  ;;  %v2862_v3 = vrot.slane %v7405_v39, 2  ;;  %v4726_v63 = vpop.permute.xlu2 %4725 }
 0x24b   : > { %v4470_v57 = vadd.f32 %v4390_v0, %v4037_v60  ;;  %v4904_v15 = vadd.f32 %v4903_v31, %v4869_v16  ;;  %5638 = vmatmul.msk.bf16.gmra.mxu1 %vm450_vm1, %v2861_v13  ;;  %5726 = vmatmul.msk.bf16.gmra.mxu2 %vm450_vm1, %v3293_v55  ;;  %v3828_v11 = vrot.slane %v3826_v14, 2  ;;  %v7411_v13 = vld [vmem:[%s6335_s26 + $0x80] sm:$0xff]  ;;  %v3294_v60 = vrot.slane %v7408_v10, 2  ;;  %v4731_v10 = vpop.permute.xlu0 %4730 }
 0x24c   : > { %5816 = vmatmul.msk.bf16.gmra.mxu3 %vm450_vm1, %v3824_v52  ;;  %5906 = vmatmul.msk.bf16.gmra.mxu0 %vm450_vm1, %v4296_v27 }
 0x24d   : > { %v4582_v40 = vadd.f32 %v7181_v20, %v4470_v57  ;;  %v3832_v16 = vor.u32 %v3831_v38, %v3828_v11  ;;  %v4297_v57 = vrot.slane %v7411_v13, 3 }
 0x24e   : > { %v3390_v0 = vpop.f32.mrf.mxu2 }
 0x24f   : > { %v3468_v59 = vadd.f32 %v3390_v0, %v7253_v41  ;;  %v3960_v31 = vpop.f32.mrf.mxu3  ;;  %v4618_v1 = vmax.f32 %v4582_v40, 0.0  ;;  %v4679_v41 = vld [vmem:[%s7658_s3 + $0x100] sm:$0xff]  ;;  %v2863_v40 = vsel %vm2830_vm5, %v2860_v18, %v2862_v3  ;;  %v3295_v0 = vsel %vm2830_vm5, %v3292_v5, %v3294_v60 }
 0x250   : > { %v7402_v25 = vpop.f32.mrf.mxu1  ;;  %4845 = vperm.xlu2 %6164, %v4679_v41   ;;  %v4298_v54 = vsel %vm4269_vm7, %v4295_v47, %v4297_v57 }
 0x251   : > { %v4038_v48 = vadd.f32 %v3960_v31, %v3468_v59  ;;  %v4870_v2 = vmul.f32 %v4721_v34, %v4618_v1  ;;  %v4395_v46 = vpop.f32.mrf.mxu0  ;;  %v3833_v34 = vsel %vm3699_vm6, %v7363_v43, %v3832_v16  ;;  %v6089_v59 = vld [vmem:[%s6335_s26 + $0x88] sm:$0xff] }
 0x252   : > { %v3838_v5 = vshll.u32 %v6089_v59, 16 }
 0x253   : > { %v4471_v55 = vadd.f32 %v4393_v4, %v4038_v48  ;;  %v4905_v52 = vadd.f32 %v4904_v15, %v4870_v2 }
 0x254   : > { %v3840_v41 = vrot.slane %v3838_v5, 3 }
 0x255   : > { %v4583_v27 = vadd.f32 %v7181_v20, %v4471_v55  ;;  %v7451_v55 = vld [vmem:[%s6335_s26 + $0x88] sm:$0xff] }
 0x256   : > { %v3392_v14 = vpop.f32.mrf.mxu2 }
 0x257   : > { %v3469_v4 = vadd.f32 %v3392_v14, %v7282_v42  ;;  %v3962_v15 = vpop.f32.mrf.mxu3  ;;  %v4619_v56 = vmax.f32 %v4583_v27, 0.0 }
 0x258   : > { %v2973_v45 = vpop.f32.mrf.mxu1  ;;  %4860 = vperm.xlu2 %6164, %v4682_v22   ;;  %v6090_v22 = vld [vmem:[%s6335_s26 + $0x90] sm:$0xff] }
 0x259   : > { %v4039_v31 = vadd.f32 %v3962_v15, %v3469_v4  ;;  %v4871_v1 = vmul.f32 %v4726_v63, %v4619_v56  ;;  %v7431_v39 = vadd.f32 %v2973_v45, %v6785_v35  ;;  %v4398_v42 = vpop.f32.mrf.mxu0  ;;  %v3835_v35 = vshrl.u32 %v6089_v59, 16  ;;  %v7457_v15 = vld [vmem:[%s6335_s26 + $0x88] sm:$0xff] }
 0x25a   : > { %v4299_v59 = vrot.slane %v7457_v15, 3 }
 0x25b   : > { %v4472_v18 = vadd.f32 %v4395_v46, %v4039_v31  ;;  %v4906_v6 = vadd.f32 %v4905_v52, %v4871_v1  ;;  %5639 = vmatmul.msk.bf16.gmra.mxu1 %vm450_vm1, %v2863_v40  ;;  %5727 = vmatmul.msk.bf16.gmra.mxu2 %vm450_vm1, %v3295_v0  ;;  %v7448_v46 = vld [vmem:[%s6335_s26 + $0x90] sm:$0xff]  ;;  %v3837_v52 = vrot.slane %v3835_v35, 2  ;;  %v3296_v40 = vrot.slane %v7451_v55, 2 }
 0x25c   : > { %5817 = vmatmul.msk.bf16.gmra.mxu3 %vm450_vm1, %v3833_v34  ;;  %5907 = vmatmul.msk.bf16.gmra.mxu0 %vm450_vm1, %v4298_v54  ;;  %v2864_v45 = vrot.slane %v7448_v46, 2 }
 0x25d   : > { %v4584_v43 = vadd.f32 %v7181_v20, %v4472_v18  ;;  %v7461_v0 = vor.u32 %v3840_v41, %v3837_v52  ;;  %v3297_v35 = vsel %vm2830_vm5, %v3294_v60, %v3296_v40  ;;  %v3844_v60 = vshrl.u32 %v6090_v22, 16 }
 0x25e   : > { %v3395_v47 = vpop.f32.mrf.mxu2 }
 0x25f   : > { %v3470_v11 = vadd.f32 %v3395_v47, %v7318_v49  ;;  %v3965_v38 = vpop.f32.mrf.mxu3  ;;  %v4620_v48 = vmax.f32 %v4584_v43, 0.0  ;;  %v3842_v5 = vsel %vm3699_vm6, %v3832_v16, %v7461_v0  ;;  %v3847_v16 = vshll.u32 %v6090_v22, 16 }
 0x260   : > { %v2975_v2 = vpop.f32.mrf.mxu1 }
 0x261   : > { %v4040_v27 = vadd.f32 %v3965_v38, %v3470_v11  ;;  %v4872_v14 = vmul.f32 %v4731_v10, %v4620_v48  ;;  %v7454_v63 = vadd.f32 %v2975_v2, %v6802_v36  ;;  %v4400_v4 = vpop.f32.mrf.mxu0  ;;  %v4736_v36 = vpop.permute.xlu1 %4735  ;;  %v2699_v11 = vld [vmem:[%s6335_s26 + $0x98] sm:$0x3] }
 0x263   : > { %v4473_v56 = vadd.f32 %v4398_v42, %v4040_v27  ;;  %v4907_v49 = vadd.f32 %v4906_v6, %v4872_v14  ;;  %v2865_v6 = vsel %vm2830_vm5, %v2862_v3, %v2864_v45  ;;  %v4300_v3 = vsel %vm4269_vm7, %v4297_v57, %v4299_v59  ;;  %v4741_v57 = vpop.permute.xlu2 %4740 }
 0x265   : > { %v4585_v34 = vadd.f32 %v7181_v20, %v4473_v56  ;;  %v7491_v56 = vld [vmem:[%s6335_s26 + $0x90] sm:$0xff] }
 0x266   : > { %v3397_v31 = vpop.f32.mrf.mxu2 }
 0x267   : > { %v3471_v1 = vadd.f32 %v3397_v31, %v7347_v58  ;;  %v3967_v54 = vpop.f32.mrf.mxu3  ;;  %v4621_v18 = vmax.f32 %v4585_v34, 0.0  ;;  %v3849_v34 = vrot.slane %v3847_v16, 3 }
 0x268   : > { %v2978_v42 = vpop.f32.mrf.mxu1 }
 0x269   : > { %v4041_v43 = vadd.f32 %v3967_v54, %v3471_v1  ;;  %v4873_v47 = vmul.f32 %v4736_v36, %v4621_v18  ;;  %v7476_v10 = vadd.f32 %v2978_v42, %v6813_v33  ;;  %v4403_v58 = vpop.f32.mrf.mxu0  ;;  %v2810_v33 = vunpack.c.l.b16 %v2699_v11  ;;  %v7497_v18 = vld [vmem:[%s6335_s26 + $0x90] sm:$0xff] }
 0x26b   : > { %v4474_v38 = vadd.f32 %v4400_v4, %v4041_v43  ;;  %v4908_v48 = vadd.f32 %v4907_v49, %v4873_v47  ;;  %5640 = vmatmul.msk.bf16.gmra.mxu1 %vm450_vm1, %v2865_v6  ;;  %5728 = vmatmul.msk.bf16.gmra.mxu2 %vm450_vm1, %v3297_v35  ;;  %v2829_v4 = vpack.c.b16 %v2810_v33, %v2810_v33  ;;  %v3846_v49 = vrot.slane %v3844_v60, 2 }
 0x26c   : > { %5818 = vmatmul.msk.bf16.gmra.mxu3 %vm450_vm1, %v3842_v5  ;;  %5908 = vmatmul.msk.bf16.gmra.mxu0 %vm450_vm1, %v4300_v3  ;;  %v3298_v5 = vrot.slane %v7491_v56, 2  ;;  %v3041_v43 = vadd.f32 %v7402_v25, %v6765_v37  ;;  %v4301_v47 = vrot.slane %v7497_v18, 3  ;;  %v6091_v25 = vld [vmem:[%s6335_s26 + $0x98] sm:$0xff] }
 0x26d   : > { %v4586_v13 = vadd.f32 %v7181_v20, %v4474_v38  ;;  %v2866_v35 = vrot.slane %v2829_v4, 2  ;;  %v3850_v22 = vor.u32 %v3849_v34, %v3846_v49  ;;  %v3853_v55 = vshrl.u32 %v6091_v25, 16  ;;  %v7529_v56 = vld [vmem:[%s6335_s26 + $0x98] sm:$0xff] }
 0x26e   : > { %v3400_v2 = vpop.f32.mrf.mxu2  ;;  %v3299_v16 = vsel %vm2830_vm5, %v3296_v40, %v3298_v5  ;;  %v4302_v46 = vsel %vm4269_vm7, %v4299_v59, %v4301_v47 }
 0x26f   : > { %v3472_v52 = vadd.f32 %v3400_v2, %v7383_v7  ;;  %v3970_v41 = vpop.f32.mrf.mxu3  ;;  %v4622_v27 = vmax.f32 %v4586_v13, 0.0  ;;  %v6114_v7 = vld [vmem:[%s7659_s4 + $0x20] sm:$0xff]  ;;  %v2867_v60 = vsel %vm2830_vm5, %v2864_v45, %v2866_v35  ;;  %v3851_v37 = vsel %vm3699_vm6, %v7461_v0, %v3850_v22  ;;  %v4751_v0 = vpop.permute.xlu1 %4750 }
 0x270   : > { %v2980_v14 = vpop.f32.mrf.mxu1  ;;  %5009 = vmatpush.bf16.msrb.mxu1 %v6114_v7  ;;  %v3855_v49 = vrot.slane %v3853_v55, 2  ;;  %v4138_v55 = vld [vmem:[%s6335_s26 + $0xa0] sm:$0x7] }
 0x271   : > { %v4042_v31 = vadd.f32 %v3970_v41, %v3472_v52  ;;  %v4874_v36 = vmul.f32 %v4741_v57, %v4622_v27  ;;  %v7494_v1 = vadd.f32 %v2980_v14, %v6831_v26  ;;  %v4405_v54 = vpop.f32.mrf.mxu0 }
 0x273   : > { %v4475_v42 = vadd.f32 %v4403_v58, %v4042_v31  ;;  %v4909_v6 = vadd.f32 %v4908_v48, %v4874_v36  ;;  %v4746_v58 = vpop.permute.xlu0 %4745 }
 0x275   : > { %v4587_v26 = vadd.f32 %v7181_v20, %v4475_v42  ;;  %v7535_v42 = vld [vmem:[%s6335_s26 + $0x98] sm:$0xff] }
 0x276   : > { %v3402_v3 = vpop.f32.mrf.mxu2 }
 0x277   : > { %v3473_v11 = vadd.f32 %v3402_v3, %v3041_v43  ;;  %v3972_v38 = vpop.f32.mrf.mxu3  ;;  %v4623_v48 = vmax.f32 %v4587_v26, 0.0 }
 0x278   : > { %v2983_v33 = vpop.f32.mrf.mxu1 }
 0x279   : > { %v4043_v13 = vadd.f32 %v3972_v38, %v3473_v11  ;;  %v4875_v2 = vmul.f32 %v4746_v58, %v4623_v48  ;;  %v7517_v57 = vadd.f32 %v2983_v33, %v6855_v53  ;;  %v4408_v52 = vpop.f32.mrf.mxu0  ;;  %v3856_v53 = vshll.u32 %v6091_v25, 16  ;;  %v4756_v38 = vpop.permute.xlu2 %4755 }
 0x27a   : > { %v4303_v58 = vrot.slane %v7535_v42, 3 }
 0x27b   : > { %v4476_v45 = vadd.f32 %v4405_v54, %v4043_v13  ;;  %v4910_v41 = vadd.f32 %v4909_v6, %v4875_v2  ;;  %5641 = vmatmul.msk.bf16.gmra.mxu1 %vm450_vm1, %v2867_v60  ;;  %5729 = vmatmul.msk.bf16.gmra.mxu2 %vm450_vm1, %v3299_v16  ;;  %v3858_v34 = vrot.slane %v3856_v53, 3  ;;  %v3568_v6 = vld [vmem:[%s6335_s26 + $0xa0] sm:$0x7] }
 0x27c   : > { %5819 = vmatmul.msk.bf16.gmra.mxu3 %vm450_vm1, %v3851_v37  ;;  %5909 = vmatmul.msk.bf16.gmra.mxu0 %vm450_vm1, %v4302_v46  ;;  %v3679_v26 = vunpack.c.l.b16 %v3568_v6 }
 0x27d   : > { %v4588_v40 = vadd.f32 %v7181_v20, %v4476_v45  ;;  %v3859_v43 = vor.u32 %v3858_v34, %v3855_v49  ;;  %v4304_v45 = vsel %vm4269_vm7, %v4301_v47, %v4303_v58 }
 0x27e   : > { %v3405_v15 = vpop.f32.mrf.mxu2  ;;  %v3698_v25 = vpack.c.b16 %v3679_v26, %v3679_v26 }
 0x27f   : > { %v3474_v59 = vadd.f32 %v3405_v15, %v7431_v39  ;;  %v3975_v27 = vpop.f32.mrf.mxu3  ;;  %v4624_v14 = vmax.f32 %v4588_v40, 0.0  ;;  %v3300_v39 = vrot.slane %v7529_v56, 2  ;;  %v3860_v37 = vsel %vm3699_vm6, %v3850_v22, %v3859_v43 }
 0x280   : > { %v2985_v4 = vpop.f32.mrf.mxu1  ;;  %v3862_v22 = vshrl.u32 %v3698_v25, 16  ;;  %v3865_v40 = vshll.u32 %v3698_v25, 16 }
 0x281   : > { %v4044_v31 = vadd.f32 %v3975_v27, %v3474_v59  ;;  %v4876_v36 = vmul.f32 %v4751_v0, %v4624_v14  ;;  %v7532_v54 = vadd.f32 %v2985_v4, %v6873_v29  ;;  %v4410_v18 = vpop.f32.mrf.mxu0  ;;  %v3301_v16 = vsel %vm2830_vm5, %v3298_v5, %v3300_v39  ;;  %v4761_v59 = vpop.permute.xlu0 %4760 }
 0x282   : > { %v3864_v49 = vrot.slane %v3862_v22, 2  ;;  %v3867_v34 = vrot.slane %v3865_v40, 3 }
 0x283   : > { %v4477_v7 = vadd.f32 %v4408_v52, %v4044_v31  ;;  %v4911_v35 = vadd.f32 %v4910_v41, %v4876_v36  ;;  %v3136_v41 = vld [vmem:[%s6335_s26 + $0xa0] sm:$0x3]  ;;  %s5032_s26 = scalar_lea.hbm %s7661_s6, %s5945_s12  ;;  %s6187_s12 = scalar_lea.hbm %s7661_s6, 16 }
 0x284   : > { %v3247_v5 = vunpack.c.l.b16 %v3136_v41  ;;  %s5036_s19 = sshll.u32 %s5032_s26, 4  ;;  %s5037_s19 = int_to_ptr.hbm [resolvable:$true] %s5036_s19 }
 0x285   : > { %v4589_v3 = vadd.f32 %v7181_v20, %v4477_v7  ;;  %s6181_s25 = sshra.s32 %s5037_s19, 4  ;;  %s6182_s25 = int_to_ptr.hbm [resolvable:$true] %s6181_s25 }
 0x286   : > { %v3407_v11 = vpop.f32.mrf.mxu2  ;;  %v3266_v56 = vpack.c.b16 %v3247_v5, %v3247_v5  ;;  %s6183_s28 = scalar_lea.hbm %s6182_s25, 8  ;;  %p6188_p0 = scmp.lt.s32.totalorder %s6182_s25, %s7661_s6 }
 0x287   : > { %v3475_v29 = vadd.f32 %v3407_v11, %v7454_v63  ;;  %v3977_v48 = vpop.f32.mrf.mxu3  ;;  %v4625_v33 = vmax.f32 %v4589_v3, 0.0  ;;  %v3868_v3 = vor.u32 %v3867_v34, %v3864_v49  ;;  %p6184_p11 = scmp.ne.s32.totalorder %s6182_s25, %s6183_s28  ;;  %p6189_p1 = scmp.lt.s32.totalorder %s6187_s12, %s6183_s28 }
 0x288   : > { %v2988_v60 = vpop.f32.mrf.mxu1  ;;  %v3302_v26 = vrot.slane %v3266_v56, 2 }
 0x289   : > { %v4045_v13 = vadd.f32 %v3977_v48, %v3475_v29  ;;  %v4877_v2 = vmul.f32 %v4756_v38, %v4625_v33  ;;  %v7545_v52 = vadd.f32 %v2988_v60, %v6890_v24  ;;  %v4413_v46 = vpop.f32.mrf.mxu0  ;;  %v4249_v24 = vunpack.c.l.b16 %v4138_v55  ;;  %v4766_v29 = vpop.permute.xlu1 %4765  ;;  %p6185_p12 = pnand %p6184_p11, %p6305_p5  ;;  %p6190_p2 = por %p6189_p1, %p6188_p0 }
 0x28b   : > { %v4478_v53 = vadd.f32 %v4410_v18, %v4045_v13  ;;  %v4912_v63 = vadd.f32 %v4911_v35, %v4877_v2  ;;  %5730 = vmatmul.msk.bf16.gmra.mxu2 %vm450_vm1, %v3301_v16  ;;  %v4268_v6 = vpack.c.b16 %v4249_v24, %v4249_v24  ;;  %p6186_p13 = pneg %p6185_p12 }
 0x28c   : > { %5820 = vmatmul.msk.bf16.gmra.mxu3 %vm450_vm1, %v3860_v37  ;;  %5910 = vmatmul.msk.bf16.gmra.mxu0 %vm450_vm1, %v4304_v45  ;;  %v3303_v37 = vsel %vm2830_vm5, %v3300_v39, %v3302_v26 }
 0x28d   : > { %v4590_v15 = vadd.f32 %v7181_v20, %v4478_v53  ;;  %p6191_p3 = pnand %p6190_p2, %p6186_p13 }
 0x28e   : > { %v3410_v0 = vpop.f32.mrf.mxu2 }
 0x28f   : > { %v3476_v47 = vadd.f32 %v3410_v0, %v7476_v10  ;;  %v3980_v27 = vpop.f32.mrf.mxu3  ;;  %v4626_v14 = vmax.f32 %v4590_v15, 0.0  ;;  %v4305_v10 = vrot.slane %v4268_v6, 3 }
 0x290   : > { %v2990_v4 = vpop.f32.mrf.mxu1 }
 0x291   : > { %v4046_v31 = vadd.f32 %v3980_v27, %v3476_v47  ;;  %v4878_v36 = vmul.f32 %v4761_v59, %v4626_v14  ;;  %v7556_v18 = vadd.f32 %v2990_v4, %v6903_v44  ;;  %v4415_v42 = vpop.f32.mrf.mxu0  ;;  %v3869_v44 = vsel %vm3699_vm6, %v3859_v43, %v3868_v3  ;;  %v4776_v14 = vpop.permute.xlu0 %4775 }
 0x292   : > { %v4306_v45 = vsel %vm4269_vm7, %v4303_v58, %v4305_v10  ;;  %v4781_v10 = vpop.permute.xlu1 %4780 }
 0x293   : > { %v4479_v7 = vadd.f32 %v4413_v46, %v4046_v31  ;;  %v4913_v35 = vadd.f32 %v4912_v63, %v4878_v36 }
 0x295   : > { %v4591_v11 = vadd.f32 %v7181_v20, %v4479_v7 }
 0x296   : > { %v3412_v38 = vpop.f32.mrf.mxu2 }
 0x297   : > { %v3477_v48 = vadd.f32 %v3412_v38, %v7494_v1  ;;  %v3982_v33 = vpop.f32.mrf.mxu3  ;;  %v4627_v60 = vmax.f32 %v4591_v11, 0.0  ;;  %v6113_v1 = vld [vmem:[%s7659_s4 + $0x18] sm:$0xff] }
 0x298   : > { %v2993_v16 = vpop.f32.mrf.mxu1  ;;  %5010 = vmatpush.bf16.msrb.mxu1 %v6113_v1 }
 0x299   : > { %v4047_v25 = vadd.f32 %v3982_v33, %v3477_v48  ;;  %v4879_v13 = vmul.f32 %v4766_v29, %v4627_v60  ;;  %v3050_v2 = vadd.f32 %v2993_v16, %v6917_v19  ;;  %v4418_v46 = vpop.f32.mrf.mxu0  ;;  %v4771_v19 = vpop.permute.xlu2 %4770 }
 0x29b   : > { %v4480_v41 = vadd.f32 %v4415_v42, %v4047_v25  ;;  %v4914_v55 = vadd.f32 %v4913_v35, %v4879_v13  ;;  %5731 = vmatmul.msk.bf16.gmra.mxu2 %vm450_vm1, %v3303_v37 }
 0x29c   : > { %5821 = vmatmul.msk.bf16.gmra.mxu3 %vm450_vm1, %v3869_v44  ;;  %5911 = vmatmul.msk.bf16.gmra.mxu0 %vm450_vm1, %v4306_v45 }
 0x29d   : > { %v4592_v39 = vadd.f32 %v7181_v20, %v4480_v41 }
 0x29e   : > { %v3415_v43 = vpop.f32.mrf.mxu2 }
 0x29f   : > { %v3478_v53 = vadd.f32 %v3415_v43, %v7517_v57  ;;  %v3985_v58 = vpop.f32.mrf.mxu3  ;;  %v4628_v63 = vmax.f32 %v4592_v39, 0.0 }
 0x2a0   : > { %v2995_v5 = vpop.f32.mrf.mxu1 }
 0x2a1   : > { %v4048_v22 = vadd.f32 %v3985_v58, %v3478_v53  ;;  %v4880_v40 = vmul.f32 %v4771_v19, %v4628_v63  ;;  %v3051_v15 = vadd.f32 %v2995_v5, %v6930_v8  ;;  %v4420_v24 = vpop.f32.mrf.mxu0  ;;  %v4786_v25 = vpop.permute.xlu2 %4785 }
 0x2a2   : > { %v4791_v58 = vpop.permute.xlu0 %4790 }
 0x2a3   : > { %v4481_v0 = vadd.f32 %v4418_v46, %v4048_v22  ;;  %v4915_v59 = vadd.f32 %v4914_v55, %v4880_v40 }
 0x2a5   : > { %v4593_v47 = vadd.f32 %v7181_v20, %v4481_v0 }
 0x2a6   : > { %v3417_v27 = vpop.f32.mrf.mxu2 }
 0x2a7   : > { %v3479_v4 = vadd.f32 %v3417_v27, %v7532_v54  ;;  %v3987_v56 = vpop.f32.mrf.mxu3  ;;  %v4629_v49 = vmax.f32 %v4593_v47, 0.0 }
 0x2a8   : > { %v2998_v34 = vpop.f32.mrf.mxu1 }
 0x2a9   : > { %v4049_v57 = vadd.f32 %v3987_v56, %v3479_v4  ;;  %v4881_v31 = vmul.f32 %v4776_v14, %v4629_v49  ;;  %v3052_v36 = vadd.f32 %v2998_v34, %v6948_v30  ;;  %v4423_v42 = vpop.f32.mrf.mxu0  ;;  %v4796_v4 = vpop.permute.xlu1 %4795 }
 0x2ab   : > { %v4482_v6 = vadd.f32 %v4420_v24, %v4049_v57  ;;  %v4916_v7 = vadd.f32 %v4915_v59, %v4881_v31  ;;  %v6112_v24 = vld [vmem:[%s7659_s4 + $0x10] sm:$0xff] }
 0x2ac   : > { %5011 = vmatpush.bf16.msrb.mxu1 %v6112_v24 }
 0x2ad   : > { %v4594_v8 = vadd.f32 %v7181_v20, %v4482_v6 }
 0x2ae   : > { %v3420_v35 = vpop.f32.mrf.mxu2 }
 0x2af   : > { %v4630_v26 = vmax.f32 %v4594_v8, 0.0  ;;  %v3480_v3 = vadd.f32 %v3420_v35, %v7545_v52  ;;  %v3990_v11 = vpop.f32.mrf.mxu3 }
 0x2b0   : > { %v3000_v1 = vpop.f32.mrf.mxu1 }
 0x2b1   : > { %v4882_v38 = vmul.f32 %v4781_v10, %v4630_v26  ;;  %v4050_v54 = vadd.f32 %v3990_v11, %v3480_v3  ;;  %v4425_v29 = vpop.f32.mrf.mxu0  ;;  %v4801_v26 = vpop.permute.xlu2 %4800 }
 0x2b3   : > { %v4917_v48 = vadd.f32 %v4916_v7, %v4882_v38  ;;  %v4483_v33 = vadd.f32 %v4423_v42, %v4050_v54 }
 0x2b5   : > { %v4595_v60 = vadd.f32 %v7181_v20, %v4483_v33 }
 0x2b6   : > { %v3422_v16 = vpop.f32.mrf.mxu2 }
 0x2b7   : > { %v4631_v30 = vmax.f32 %v4595_v60, 0.0  ;;  %v3481_v37 = vadd.f32 %v3422_v16, %v7556_v18  ;;  %v3992_v44 = vpop.f32.mrf.mxu3 }
 0x2b9   : > { %v4883_v13 = vmul.f32 %v4786_v25, %v4631_v30  ;;  %v4051_v46 = vadd.f32 %v3992_v44, %v3481_v37  ;;  %v4428_v45 = vpop.f32.mrf.mxu0  ;;  %v4806_v30 = vpop.permute.xlu0 %4805 }
 0x2bb   : > { %v4918_v41 = vadd.f32 %v4917_v48, %v4883_v13  ;;  %v4484_v52 = vadd.f32 %v4425_v29, %v4051_v46  ;;  %v3053_v29 = vadd.f32 %v3000_v1, %v6963_v9  ;;  %v7590_v48 = vld [vmem:[%s7657_s2] ss:$0 sm:$0xff] }
 0x2bd   : > { %v4596_v55 = vadd.f32 %v7181_v20, %v4484_v52 }
 0x2be   : > { %v3425_v39 = vpop.f32.mrf.mxu2 }
 0x2bf   : > { %v4632_v43 = vmax.f32 %v4596_v55, 0.0  ;;  %v3482_v19 = vadd.f32 %v3425_v39, %v3050_v2  ;;  %v3995_v53 = vpop.f32.mrf.mxu3  ;;  %v3003_v2 = vpop.f32.mrf.mxu1 }
 0x2c0   : > { %v3054_v9 = vadd.f32 %v3003_v2, %v6983_v23 }
 0x2c1   : > { %v4884_v63 = vmul.f32 %v4791_v58, %v4632_v43  ;;  %v4052_v5 = vadd.f32 %v3995_v53, %v3482_v19  ;;  %v4430_v22 = vpop.f32.mrf.mxu0  ;;  %v4811_v43 = vpop.permute.xlu1 %4810 }
 0x2c3   : > { %v4919_v40 = vadd.f32 %v4918_v41, %v4884_v63  ;;  %v4485_v18 = vadd.f32 %v4428_v45, %v4052_v5 }
 0x2c5   : > { %v4597_v0 = vadd.f32 %v7181_v20, %v4485_v18 }
 0x2c6   : > { %v3427_v59 = vpop.f32.mrf.mxu2 }
 0x2c7   : > { %v4633_v47 = vmax.f32 %v4597_v0, 0.0  ;;  %v3483_v27 = vadd.f32 %v3427_v59, %v3051_v15  ;;  %v3997_v14 = vpop.f32.mrf.mxu3  ;;  %v3005_v38 = vpop.f32.mrf.mxu1 }
 0x2c9   : > { %v4885_v56 = vmul.f32 %v4796_v4, %v4633_v47  ;;  %v4053_v49 = vadd.f32 %v3997_v14, %v3483_v27  ;;  %v4433_v34 = vpop.f32.mrf.mxu0  ;;  %v4816_v27 = vpop.permute.xlu2 %4815 }
 0x2cb   : > { %v4920_v57 = vadd.f32 %v4919_v40, %v4885_v56  ;;  %v4486_v31 = vadd.f32 %v4430_v22, %v4053_v49  ;;  %v6111_v22 = vld [vmem:[%s7659_s4 + $0x8] sm:$0xff]  ;;  %v3055_v40 = vadd.f32 %v3005_v38, %v6996_v17 }
 0x2cc   : > { %5012 = vmatpush.bf16.msrb.mxu1 %v6111_v22 }
 0x2cd   : > { %v4598_v42 = vadd.f32 %v7181_v20, %v4486_v31 }
 0x2ce   : > { %v3430_v6 = vpop.f32.mrf.mxu2 }
 0x2cf   : > { %v4634_v7 = vmax.f32 %v4598_v42, 0.0  ;;  %v3484_v8 = vadd.f32 %v3430_v6, %v3052_v36  ;;  %v4000_v35 = vpop.f32.mrf.mxu3  ;;  %v3008_v45 = vpop.f32.mrf.mxu1 }
 0x2d1   : > { %v4886_v3 = vmul.f32 %v4801_v26, %v4634_v7  ;;  %v4054_v11 = vadd.f32 %v4000_v35, %v3484_v8  ;;  %v4435_v10 = vpop.f32.mrf.mxu0  ;;  %v4821_v7 = vpop.permute.xlu0 %4820 }
 0x2d3   : > { %v4921_v15 = vadd.f32 %v4920_v57, %v4886_v3  ;;  %v4487_v54 = vadd.f32 %v4433_v34, %v4054_v11  ;;  %v3056_v34 = vadd.f32 %v3008_v45, %v7013_v61 }
 0x2d5   : > { %v4599_v20 = vadd.f32 %v7590_v48, %v4487_v54 }
 0x2d6   : > { %v3432_v33 = vpop.f32.mrf.mxu2 }
 0x2d7   : > { %v4635_v60 = vmax.f32 %v4599_v20, 0.0  ;;  %v3485_v36 = vadd.f32 %v3432_v33, %v3053_v29  ;;  %v4002_v16 = vpop.f32.mrf.mxu3  ;;  %v3010_v18 = vpop.f32.mrf.mxu1 }
 0x2d8   : > { %v3057_v38 = vadd.f32 %v3010_v18, %v7026_v12  ;;  %v4826_v33 = vpop.permute.xlu1 %4825 }
 0x2d9   : > { %v4887_v37 = vmul.f32 %v4806_v30, %v4635_v60  ;;  %v4055_v44 = vadd.f32 %v4002_v16, %v3485_v36  ;;  %v4438_v25 = vpop.f32.mrf.mxu0 }
 0x2db   : > { %v4922_v13 = vadd.f32 %v4921_v15, %v4887_v37  ;;  %v4488_v46 = vadd.f32 %v4435_v10, %v4055_v44 }
 0x2dd   : > { %v4600_v41 = vadd.f32 %v7590_v48, %v4488_v46 }
 0x2de   : > { %v3435_v52 = vpop.f32.mrf.mxu2 }
 0x2df   : > { %v4636_v55 = vmax.f32 %v4600_v41, 0.0  ;;  %v3486_v1 = vadd.f32 %v3435_v52, %v3054_v9  ;;  %v4005_v39 = vpop.f32.mrf.mxu3  ;;  %v3013_v8 = vpop.f32.mrf.mxu1 }
 0x2e0   : > { %v4831_v41 = vpop.permute.xlu2 %4830 }
 0x2e1   : > { %v4888_v19 = vmul.f32 %v4811_v43, %v4636_v55  ;;  %v4056_v53 = vadd.f32 %v4005_v39, %v3486_v1  ;;  %v4440_v58 = vpop.f32.mrf.mxu0 }
 0x2e3   : > { %v4923_v63 = vadd.f32 %v4922_v13, %v4888_v19  ;;  %v4489_v5 = vadd.f32 %v4438_v25, %v4056_v53  ;;  %v3058_v25 = vadd.f32 %v3013_v8, %v7049_v21 }
 0x2e5   : > { %v4601_v23 = vadd.f32 %v7590_v48, %v4489_v5 }
 0x2e6   : > { %v3437_v24 = vpop.f32.mrf.mxu2 }
 0x2e7   : > { %v4637_v0 = vmax.f32 %v4601_v23, 0.0  ;;  %v3487_v59 = vadd.f32 %v3437_v24, %v3055_v40  ;;  %v4007_v47 = vpop.f32.mrf.mxu3  ;;  %v3015_v30 = vpop.f32.mrf.mxu1 }
 0x2e8   : > { %v3059_v53 = vadd.f32 %v3015_v30, %v7066_v28  ;;  %v4836_v40 = vpop.permute.xlu0 %4835 }
 0x2e9   : > { %v4889_v14 = vmul.f32 %v4816_v27, %v4637_v0  ;;  %v4057_v4 = vadd.f32 %v4007_v47, %v3487_v59  ;;  %v4443_v2 = vpop.f32.mrf.mxu0  ;;  %v6110_v59 = vld [vmem:[%s7659_s4] sm:$0xff] }
 0x2ea   : > { %5013 = vmatpush.bf16.msrb.mxu1 %v6110_v59 }
 0x2eb   : > { %v4924_v56 = vadd.f32 %v4923_v63, %v4889_v14  ;;  %v4490_v49 = vadd.f32 %v4440_v58, %v4057_v4 }
 0x2ed   : > { %v4602_v57 = vadd.f32 %v7590_v48, %v4490_v49 }
 0x2ee   : > { %v3440_v31 = vpop.f32.mrf.mxu2 }
 0x2ef   : > { %v4638_v17 = vmax.f32 %v4602_v57, 0.0  ;;  %v3488_v42 = vadd.f32 %v3440_v31, %v3056_v34  ;;  %v4010_v6 = vpop.f32.mrf.mxu3  ;;  %v3018_v19 = vpop.f32.mrf.mxu1 }
 0x2f0   : > { %v3060_v27 = vadd.f32 %v3018_v19, %v7090_v51  ;;  %v4841_v34 = vpop.permute.xlu1 %4840 }
 0x2f1   : > { %v4890_v35 = vmul.f32 %v4821_v7, %v4638_v17  ;;  %v4058_v26 = vadd.f32 %v4010_v6, %v3488_v42  ;;  %v4445_v3 = vpop.f32.mrf.mxu0 }
 0x2f3   : > { %v4925_v11 = vadd.f32 %v4924_v56, %v4890_v35  ;;  %v4491_v10 = vadd.f32 %v4443_v2, %v4058_v26 }
 0x2f5   : > { %v4603_v15 = vadd.f32 %v7590_v48, %v4491_v10 }
 0x2f6   : > { %v3442_v54 = vpop.f32.mrf.mxu2 }
 0x2f7   : > { %v4639_v29 = vmax.f32 %v4603_v15, 0.0  ;;  %v3489_v61 = vadd.f32 %v3442_v54, %v3057_v38  ;;  %v4012_v20 = vpop.f32.mrf.mxu3  ;;  %v3020_v14 = vpop.f32.mrf.mxu1 }
 0x2f8   : > { %v3061_v6 = vadd.f32 %v3020_v14, %v7107_v62 }
 0x2f9   : > { %v4891_v60 = vmul.f32 %v4826_v33, %v4639_v29  ;;  %v4059_v36 = vadd.f32 %v4012_v20, %v3489_v61  ;;  %v4448_v16 = vpop.f32.mrf.mxu0 }
 0x2fb   : > { %v4926_v37 = vadd.f32 %v4925_v11, %v4891_v60  ;;  %v4492_v44 = vadd.f32 %v4445_v3, %v4059_v36  ;;  %v4846_v11 = vpop.permute.xlu2 %4845 }
 0x2fd   : > { %v4604_v13 = vadd.f32 %v7590_v48, %v4492_v44 }
 0x2fe   : > { %v3445_v46 = vpop.f32.mrf.mxu2 }
 0x2ff   : > { %v4640_v45 = vmax.f32 %v4604_v13, 0.0  ;;  %v3490_v12 = vadd.f32 %v3445_v46, %v3058_v25  ;;  %v4015_v9 = vpop.f32.mrf.mxu3  ;;  %v3023_v10 = vpop.f32.mrf.mxu1 }
 0x300   : > { %v3062_v61 = vadd.f32 %v3023_v10, %v7134_v32 }
 0x301   : > { %v4892_v52 = vmul.f32 %v4831_v41, %v4640_v45  ;;  %v4060_v55 = vadd.f32 %v4015_v9, %v3490_v12  ;;  %v4450_v1 = vpop.f32.mrf.mxu0 }
 0x303   : > { %v4927_v39 = vadd.f32 %v4926_v37, %v4892_v52  ;;  %v4493_v43 = vadd.f32 %v4448_v16, %v4060_v55  ;;  %v4851_v16 = vpop.permute.xlu0 %4850  ;;  %v4856_v52 = vpop.permute.xlu1 %4855 }
 0x305   : > { %v4605_v58 = vadd.f32 %v7590_v48, %v4493_v43 }
 0x306   : > { %v3447_v63 = vpop.f32.mrf.mxu2 }
 0x307   : > { %v4641_v5 = vmax.f32 %v4605_v58, 0.0  ;;  %v3491_v21 = vadd.f32 %v3447_v63, %v3059_v53  ;;  %v4017_v22 = vpop.f32.mrf.mxu3  ;;  %v3025_v25 = vpop.f32.mrf.mxu1 }
 0x308   : > { %v3063_v45 = vadd.f32 %v3025_v25, %v7151_v50 }
 0x309   : > { %v4893_v23 = vmul.f32 %v4836_v40, %v4641_v5  ;;  %v4061_v18 = vadd.f32 %v4017_v22, %v3491_v21  ;;  %v4453_v47 = vpop.f32.mrf.mxu0  ;;  %v4861_v5 = vpop.permute.xlu2 %4860 }
 0x30b   : > { %v4928_v24 = vadd.f32 %v4927_v39, %v4893_v23  ;;  %v4494_v0 = vadd.f32 %v4450_v1, %v4061_v18 }
 0x30d   : > { %v4606_v28 = vadd.f32 %v7590_v48, %v4494_v0 }
 0x30e   : > { %v3450_v4 = vpop.f32.mrf.mxu2 }
 0x30f   : > { %v4642_v2 = vmax.f32 %v4606_v28, 0.0  ;;  %v3492_v56 = vadd.f32 %v3450_v4, %v3060_v27  ;;  %v4020_v49 = vpop.f32.mrf.mxu3 }
 0x311   : > { %v4894_v57 = vmul.f32 %v4841_v34, %v4642_v2  ;;  %v4062_v31 = vadd.f32 %v4020_v49, %v3492_v56  ;;  %v4455_v8 = vpop.f32.mrf.mxu0 }
 0x313   : > { %v4929_v17 = vadd.f32 %v4928_v24, %v4894_v57  ;;  %v4495_v42 = vadd.f32 %v4453_v47, %v4062_v31 }
 0x315   : > { %v4607_v7 = vadd.f32 %v7590_v48, %v4495_v42 }
 0x316   : > { %v3452_v35 = vpop.f32.mrf.mxu2 }
 0x317   : > { %v4643_v51 = vmax.f32 %v4607_v7, 0.0  ;;  %v3493_v26 = vadd.f32 %v3452_v35, %v3061_v6  ;;  %v4022_v3 = vpop.f32.mrf.mxu3 }
 0x319   : > { %v4895_v38 = vmul.f32 %v4846_v11, %v4643_v51  ;;  %v4063_v15 = vadd.f32 %v4022_v3, %v3493_v26  ;;  %v4458_v30 = vpop.f32.mrf.mxu0 }
 0x31b   : > { %v4930_v54 = vadd.f32 %v4929_v17, %v4895_v38  ;;  %v4496_v29 = vadd.f32 %v4455_v8, %v4063_v15 }
 0x31d   : > { %v4608_v20 = vadd.f32 %v7590_v48, %v4496_v29 }
 0x31e   : > { %v3455_v33 = vpop.f32.mrf.mxu2 }
 0x31f   : > { %v4644_v60 = vmax.f32 %v4608_v20, 0.0  ;;  %v3494_v62 = vadd.f32 %v3455_v33, %v3062_v61  ;;  %v4025_v36 = vpop.f32.mrf.mxu3 }
 0x321   : > { %v4896_v37 = vmul.f32 %v4851_v16, %v4644_v60  ;;  %v4064_v44 = vadd.f32 %v4025_v36, %v3494_v62  ;;  %v4460_v43 = vpop.f32.mrf.mxu0 }
 0x323   : > { %v4931_v13 = vadd.f32 %v4930_v54, %v4896_v37  ;;  %v4497_v46 = vadd.f32 %v4458_v30, %v4064_v44 }
 0x325   : > { %v4609_v12 = vadd.f32 %v7590_v48, %v4497_v46 }
 0x326   : > { %v3457_v9 = vpop.f32.mrf.mxu2 }
 0x327   : > { %v4645_v41 = vmax.f32 %v4609_v12, 0.0  ;;  %v3495_v32 = vadd.f32 %v3457_v9, %v3063_v45  ;;  %v4027_v55 = vpop.f32.mrf.mxu3 }
 0x329   : > { %v4897_v1 = vmul.f32 %v4856_v52, %v4645_v41  ;;  %v4065_v39 = vadd.f32 %v4027_v55, %v3495_v32 }
 0x32b   : > { %v4932_v19 = vadd.f32 %v4931_v13, %v4897_v1  ;;  %v4498_v53 = vadd.f32 %v4460_v43, %v4065_v39 }
 0x32d   : > { %v4610_v58 = vadd.f32 %v7590_v48, %v4498_v53  ;;  %v4957_v48 = vld [vmem:[%s7660_s5] sm:$0x1] }
 0x32f   : > { %v4646_v63 = vmax.f32 %v4610_v58, 0.0 }
 0x331   : > { %v4898_v21 = vmul.f32 %v4861_v5, %v4646_v63 }
 0x333   : > { %v4933_v50 = vadd.f32 %v4932_v19, %v4898_v21 }
 0x335   : > { %v4934_v22 = vrot.slane %v4933_v50, 4 }
 0x337   : > { %v4935_v40 = vadd.f32 %v4934_v22, %v4933_v50 }
 0x339   : > { %v4936_v23 = vrot.slane %v4935_v40, 2 }
 0x33b   : > { %v4937_v18 = vadd.f32 %v4936_v23, %v4935_v40 }
 0x33d   : > { %v4938_v24 = vrot.slane %v4937_v18, 1 }
 0x33f   : > { %v4939_v0 = vadd.f32 %v4938_v24, %v4937_v18 }
 0x341   : > { %v4940_v59 = vpack.c.bf16 %v4939_v0, %v4939_v0 }
 0x343   : > { %5014 = vmatmul.bf16.vlgmr.msrb.gmra.mxu1 %v4940_v59 }
 0x3c0   : > { %v5015_v47 = vpop.f32.mrf.mxu1 }
 0x3c1   : > { %v5016_v27 = vadd.f32 %v5015_v47, %v4957_v48 }
 0x3c3   : > { %v5019_v28 = vperm.slane %v5016_v27, 0 }
 0x3c5   : > { %5020 = vst [vmem:[%s244_s17] sm:$0xff] %v5019_v28 }
 0x3c6   : > { %6194 = shalt.err (!%p6191_p3)
}
 0x3c7   : > { %6122 = dma.vmem_to_hbm [thread:$0]  (%p6305_p5), %s5035_s18, 128, %s5037_s19, %s5022_s20  }
 0x3c8   : > { %v5017_v14 = vpop.f32.mrf.mxu1 }
 0x3c9 PF: > { %p6128_p4 = scmp.ge.s32.totalorder %s6229_s24, 2  ;;  %s5048_s10 = sand.u32 1, %s6217_s21  }
 0x3ca   : > { %s5049_s14 = scalar_lea.sflag [#allocation4], %s5048_s10 }
 0x3cb   : > { %p6125_p7 = pnand %p6128_p4, %p6309_p6 }
 0x3cd   : > { %p6126_p8 = pneg %p6125_p7 }
 0x3cf   : > { %6212 = dma.done.wait (%p6126_p8), %s5049_s14, 128  }
 0x3d0   : > { %6214 = vsyncadd (%p6126_p8), %s5049_s14, 4294967168  ;;  %p16_p9 = scmp.ge.s32.totalorder %s6292_s27, 4   ;;  %s7674_s21 = smov %s6221_s22 }
 0x3d1   : > { %s7675_s22 = smov %s6225_s23  ;;  %s7676_s23 = smov %s6303_s30 }
 0x3d2   : > { %s7677_s24 = smov %s6292_s27  ;;  %18 = sbr.rel (!%p16_p9) target bundleno = 3 (0x3), region = 79 }
 0x3d7   :  { %5055 = vsyncpa [#allocation4], 1 }
 0x3d8   :  { %5057 = vsyncpa [#allocation4 + $0x1], 1 }

</bundles_post_ra>
